<compile_context>
chip_gen: v5e
topology: v5e:2x2
jax: 0.10.0
libtpu: 0.0.40
codegen_flags: <defaults>
</compile_context>

<pallas_src>
import math

import jax
import jax.numpy as jnp
from jax import lax
from jax.experimental import pallas as pl
from jax.experimental.pallas import tpu as pltpu


# ----------------------------------------------------------------------------
# Fused kernel: whole LiteHRModule for one batch element per grid step.
# ----------------------------------------------------------------------------
def _lite_hr_kernel(x_ref,
                    dw1w_ref, b1a_ref, pw1w_ref, b1b_ref,
                    pw2aw_ref, b2a_ref, dw2w_ref, b2b_ref, pw2cw_ref, b2c_ref,
                    o_ref,
                    pad_in_ref, pad_mid_ref):
    # x_ref:  (1, H, W, Cin)   one batch element (NHWC)
    # dw*_w:  (9, C)           depthwise taps (BN scale already folded in)
    # pw*_w:  (Cin, Cout)      1x1 conv weights (BN scale already folded in)
    # b*:     (1, C)           folded BN bias
    # o_ref:  (1, H, W, Cout)
    # pad_*:  (H+2, W+2, C)    f32 VMEM scratch used for in-kernel zero padding
    H, W = o_ref.shape[1], o_ref.shape[2]

    def dw3x3_bias_relu(v, pad_ref, w9c_ref, bias_ref):
        # Depthwise 3x3, pad=1, stride=1 — unrolled 9-tap stencil on the VPU.
        C = v.shape[-1]
        w = w9c_ref[...].astype(jnp.float32)                 # (9, C)
        pad_ref[...] = jnp.zeros_like(pad_ref)               # zero halo
        pad_ref[1:H + 1, 1:W + 1, :] = v                     # interior
        acc = jnp.zeros((H, W, C), jnp.float32)
        for k in range(9):
            dh, dw = k // 3, k % 3
            acc = acc + pad_ref[dh:dh + H, dw:dw + W, :] * w[k].reshape(1, 1, C)
        bias = bias_ref[...].astype(jnp.float32).reshape(1, 1, C)
        return jnp.maximum(acc + bias, 0.0)

    def pw1x1_bias_relu(v, w_ref, bias_ref):
        # 1x1 conv == channel matmul on the MXU over the flattened spatial dim.
        w = w_ref[...].astype(jnp.float32)                   # (Cin, Cout)
        cout = w.shape[1]
        y = jnp.dot(v.reshape(H * W, v.shape[-1]), w,
                    preferred_element_type=jnp.float32)
        y = y + bias_ref[...].astype(jnp.float32)
        return jnp.maximum(y, 0.0).reshape(H, W, cout)

    x = x_ref[0].astype(jnp.float32)                         # (H, W, Cin)

    # branch1: dw3x3 -> 1x1
    t1 = dw3x3_bias_relu(x, pad_in_ref, dw1w_ref, b1a_ref)
    b1 = pw1x1_bias_relu(t1, pw1w_ref, b1b_ref)

    # branch2: 1x1 -> dw3x3 -> 1x1
    t2 = pw1x1_bias_relu(x, pw2aw_ref, b2a_ref)
    t2 = dw3x3_bias_relu(t2, pad_mid_ref, dw2w_ref, b2b_ref)
    b2 = pw1x1_bias_relu(t2, pw2cw_ref, b2c_ref)

    # branch1 + branch2, single HBM writeback.
    o_ref[0] = (b1 + b2).astype(o_ref.dtype)


def lite_hr_module(x_nhwc, p):
    """Fused LiteHRModule forward.  x_nhwc: (N, H, W, Cin) -> (N, H, W, Cout)."""
    N, H, W, Cin = x_nhwc.shape
    Cout = p["pw1_w"].shape[1]

    rep2 = lambda n: (0, 0)   # weights / biases: same block every grid step
    in_specs = [
        pl.BlockSpec((1, H, W, Cin), lambda n: (n, 0, 0, 0)),   # x
        pl.BlockSpec((9, Cin), rep2),    pl.BlockSpec((1, Cin), rep2),    # dw1
        pl.BlockSpec((Cin, Cout), rep2), pl.BlockSpec((1, Cout), rep2),   # pw1
        pl.BlockSpec((Cin, Cout), rep2), pl.BlockSpec((1, Cout), rep2),   # pw2a
        pl.BlockSpec((9, Cout), rep2),   pl.BlockSpec((1, Cout), rep2),   # dw2
        pl.BlockSpec((Cout, Cout), rep2), pl.BlockSpec((1, Cout), rep2),  # pw2c
    ]
    return pl.pallas_call(
        _lite_hr_kernel,
        out_shape=jax.ShapeDtypeStruct((N, H, W, Cout), x_nhwc.dtype),
        grid=(N,),
        in_specs=in_specs,
        out_specs=pl.BlockSpec((1, H, W, Cout), lambda n: (n, 0, 0, 0)),
        scratch_shapes=[
            pltpu.VMEM((H + 2, W + 2, Cin), jnp.float32),    # pad buffer, branch1 dw
            pltpu.VMEM((H + 2, W + 2, Cout), jnp.float32),   # pad buffer, branch2 dw
        ],
        compiler_params=pltpu.CompilerParams(
            dimension_semantics=("parallel",)),
    )(x_nhwc,
      p["dw1_w"], p["b1a"], p["pw1_w"], p["b1b"],
      p["pw2a_w"], p["b2a"], p["dw2_w"], p["b2b"], p["pw2c_w"], p["b2c"])


# ----------------------------------------------------------------------------
# Parameters: raw conv + BN params, then one-time BN-scale fold into weights.
# ----------------------------------------------------------------------------
def init_raw_params(key, cin, cout):
    ks = jax.random.split(key, 10)

    def bn(k, c):
        k1, k2, k3, k4 = jax.random.split(k, 4)
        return dict(
            gamma=1.0 + 0.1 * jax.random.normal(k1, (c,), jnp.float32),
            beta=0.1 * jax.random.normal(k2, (c,), jnp.float32),
            mean=0.1 * jax.random.normal(k3, (c,), jnp.float32),
            var=jax.random.uniform(k4, (c,), jnp.float32, 0.5, 1.5),
        )

    raw = {}
    # branch1: depthwise 3x3 (groups=cin) weight (cin,1,3,3) -> stored (9, cin)
    raw["dw1_w"] = 0.3 * jax.random.normal(ks[0], (9, cin), jnp.float32)
    raw["bn1a"] = bn(ks[1], cin)
    # branch1: 1x1 conv (cout, cin, 1, 1) -> stored (cin, cout)
    raw["pw1_w"] = jax.random.normal(ks[2], (cin, cout), jnp.float32) / math.sqrt(cin)
    raw["bn1b"] = bn(ks[3], cout)
    # branch2: 1x1 conv (cout, cin, 1, 1)
    raw["pw2a_w"] = jax.random.normal(ks[4], (cin, cout), jnp.float32) / math.sqrt(cin)
    raw["bn2a"] = bn(ks[5], cout)
    # branch2: depthwise 3x3 (groups=cout) -> (9, cout)
    raw["dw2_w"] = 0.3 * jax.random.normal(ks[6], (9, cout), jnp.float32)
    raw["bn2b"] = bn(ks[7], cout)
    # branch2: 1x1 conv (cout, cout, 1, 1)
    raw["pw2c_w"] = jax.random.normal(ks[8], (cout, cout), jnp.float32) / math.sqrt(cout)
    raw["bn2c"] = bn(ks[9], cout)
    return raw


def _bn_scale_bias(bn, eps=1e-5):
    scale = bn["gamma"] / jnp.sqrt(bn["var"] + eps)
    bias = bn["beta"] - bn["mean"] * scale
    return scale, bias


def fold_params(raw):
    """One-time weight transform: fold BN scale into the conv weights
    (per output channel); only the bias add remains in-kernel."""
    p = {}
    s, b = _bn_scale_bias(raw["bn1a"])
    p["dw1_w"] = raw["dw1_w"] * s.reshape(1, -1)
    p["b1a"] = b.reshape(1, -1)
    s, b = _bn_scale_bias(raw["bn1b"])
    p["pw1_w"] = raw["pw1_w"] * s.reshape(1, -1)
    p["b1b"] = b.reshape(1, -1)
    s, b = _bn_scale_bias(raw["bn2a"])
    p["pw2a_w"] = raw["pw2a_w"] * s.reshape(1, -1)
    p["b2a"] = b.reshape(1, -1)
    s, b = _bn_scale_bias(raw["bn2b"])
    p["dw2_w"] = raw["dw2_w"] * s.reshape(1, -1)
    p["b2b"] = b.reshape(1, -1)
    s, b = _bn_scale_bias(raw["bn2c"])
    p["pw2c_w"] = raw["pw2c_w"] * s.reshape(1, -1)
    p["b2c"] = b.reshape(1, -1)
    return p


# ----------------------------------------------------------------------------
# Pure-JAX reference (unfolded BN, NHWC) for correctness checking.
# ----------------------------------------------------------------------------
def _ref_cbr_dw(x, w9c, bn, eps=1e-5):
    C = x.shape[-1]
    w_hwio = w9c.reshape(3, 3, C)[:, :, None, :]     # (3,3,1,C)
    y = lax.conv_general_dilated(
        x, w_hwio, window_strides=(1, 1), padding=[(1, 1), (1, 1)],
        dimension_numbers=("NHWC", "HWIO", "NHWC"), feature_group_count=C)
    y = (y - bn["mean"]) / jnp.sqrt(bn["var"] + eps) * bn["gamma"] + bn["beta"]
    return jnp.maximum(y, 0.0)


def _ref_cbr_pw(x, w, bn, eps=1e-5):
    y = jnp.einsum("nhwc,cd->nhwd", x, w)
    y = (y - bn["mean"]) / jnp.sqrt(bn["var"] + eps) * bn["gamma"] + bn["beta"]
    return jnp.maximum(y, 0.0)


def ref_lite_hr_module(x_nhwc, raw):
    b1 = _ref_cbr_pw(_ref_cbr_dw(x_nhwc, raw["dw1_w"], raw["bn1a"]),
                     raw["pw1_w"], raw["bn1b"])
    y2 = _ref_cbr_pw(x_nhwc, raw["pw2a_w"], raw["bn2a"])
    y2 = _ref_cbr_dw(y2, raw["dw2_w"], raw["bn2b"])
    b2 = _ref_cbr_pw(y2, raw["pw2c_w"], raw["bn2c"])
    return b1 + b2


if __name__ == "__main__":
    N, Cin, Cout, H, W = 2, 4, 8, 16, 16
    key = jax.random.PRNGKey(0)
    kx, kp = jax.random.split(key)

    # NHWC is the module's native layout (channels on the lane axis); the
    # PyTorch NCHW boundary transpose is intentionally not materialized.
    x = jax.random.normal(kx, (N, H, W, Cin), jnp.float32)
    raw = init_raw_params(kp, Cin, Cout)
    params = fold_params(raw)

    out = jax.block_until_ready(lite_hr_module(x, params))
    ref = ref_lite_hr_module(x, raw)

    assert out.shape == (N, H, W, Cout), out.shape
    if not bool(jnp.allclose(out, ref, rtol=1e-4, atol=1e-4)):
        raise AssertionError(
            "mismatch vs reference, max abs err = %e"
            % float(jnp.max(jnp.abs(out - ref))))
    print("KERNEL_OK")
</pallas_src>

<mosaic_0001>
module attributes {stable_mosaic.version = 11 : i64} {
  func.func @_lite_hr_kernel(%arg0: i32, %arg1: memref<1x16x16x4xf32, #tpu.memory_space<vmem>>, %arg2: memref<9x4xf32, #tpu.memory_space<vmem>>, %arg3: memref<1x4xf32, #tpu.memory_space<vmem>>, %arg4: memref<4x8xf32, #tpu.memory_space<vmem>>, %arg5: memref<1x8xf32, #tpu.memory_space<vmem>>, %arg6: memref<4x8xf32, #tpu.memory_space<vmem>>, %arg7: memref<1x8xf32, #tpu.memory_space<vmem>>, %arg8: memref<9x8xf32, #tpu.memory_space<vmem>>, %arg9: memref<1x8xf32, #tpu.memory_space<vmem>>, %arg10: memref<8x8xf32, #tpu.memory_space<vmem>>, %arg11: memref<1x8xf32, #tpu.memory_space<vmem>>, %arg12: memref<1x16x16x8xf32, #tpu.memory_space<vmem>>, %arg13: memref<18x18x4xf32, #tpu.memory_space<vmem>>, %arg14: memref<18x18x8xf32, #tpu.memory_space<vmem>>) attributes {dimension_semantics = [#tpu.dimension_semantics<parallel>], iteration_bounds = array<i64: 2>, scalar_prefetch = 0 : i64, scratch_operands = 2 : i64, tpu.core_type = #tpu.core_type<tc>, window_params = [{transform_indices = @transform_0, window_bounds = array<i64: 1, 16, 16, 4>}, {pipeline_mode = #tpu.pipeline_mode<synchronous>, transform_indices = @transform_1, window_bounds = array<i64: 9, 4>}, {pipeline_mode = #tpu.pipeline_mode<synchronous>, transform_indices = @transform_2, window_bounds = array<i64: 1, 4>}, {pipeline_mode = #tpu.pipeline_mode<synchronous>, transform_indices = @transform_3, window_bounds = array<i64: 4, 8>}, {pipeline_mode = #tpu.pipeline_mode<synchronous>, transform_indices = @transform_4, window_bounds = array<i64: 1, 8>}, {pipeline_mode = #tpu.pipeline_mode<synchronous>, transform_indices = @transform_5, window_bounds = array<i64: 4, 8>}, {pipeline_mode = #tpu.pipeline_mode<synchronous>, transform_indices = @transform_6, window_bounds = array<i64: 1, 8>}, {pipeline_mode = #tpu.pipeline_mode<synchronous>, transform_indices = @transform_7, window_bounds = array<i64: 9, 8>}, {pipeline_mode = #tpu.pipeline_mode<synchronous>, transform_indices = @transform_8, window_bounds = array<i64: 1, 8>}, {pipeline_mode = #tpu.pipeline_mode<synchronous>, transform_indices = @transform_9, window_bounds = array<i64: 8, 8>}, {pipeline_mode = #tpu.pipeline_mode<synchronous>, transform_indices = @transform_10, window_bounds = array<i64: 1, 8>}, {transform_indices = @transform_11, window_bounds = array<i64: 1, 16, 16, 8>}]} {
    %c0 = arith.constant 0 : index
    %c0_0 = arith.constant 0 : index
    %c0_1 = arith.constant 0 : index
    %c0_2 = arith.constant 0 : index
    %0 = vector.load %arg1[%c0, %c0_0, %c0_1, %c0_2] : memref<1x16x16x4xf32, #tpu.memory_space<vmem>>, vector<1x16x16x4xf32>
    %1 = vector.shape_cast %0 : vector<1x16x16x4xf32> to vector<16x16x4xf32>
    %c0_3 = arith.constant 0 : index
    %c0_4 = arith.constant 0 : index
    %2 = vector.load %arg2[%c0_3, %c0_4] : memref<9x4xf32, #tpu.memory_space<vmem>>, vector<9x4xf32>
    %cst = arith.constant 0.000000e+00 : f32
    %3 = vector.broadcast %cst : f32 to vector<18x18x4xf32>
    %c0_5 = arith.constant 0 : index
    %c0_6 = arith.constant 0 : index
    %c0_7 = arith.constant 0 : index
    %4 = vector.load %arg13[%c0_5, %c0_6, %c0_7] : memref<18x18x4xf32, #tpu.memory_space<vmem>>, vector<18x18x4xf32>
    tpu.vector_store %arg13[%c0_5, %c0_6, %c0_7], %3 {strides = array<i32>} : memref<18x18x4xf32, #tpu.memory_space<vmem>>, vector<18x18x4xf32>,
    %c1 = arith.constant 1 : index
    %c1_8 = arith.constant 1 : index
    %c0_9 = arith.constant 0 : index
    %5 = vector.load %arg13[%c1, %c1_8, %c0_9] : memref<18x18x4xf32, #tpu.memory_space<vmem>>, vector<16x16x4xf32>
    tpu.vector_store %arg13[%c1, %c1_8, %c0_9], %1 {strides = array<i32>} : memref<18x18x4xf32, #tpu.memory_space<vmem>>, vector<16x16x4xf32>,
    %cst_10 = arith.constant 0.000000e+00 : f32
    %6 = vector.broadcast %cst_10 : f32 to vector<16x16x4xf32>
    %c0_11 = arith.constant 0 : index
    %c0_12 = arith.constant 0 : index
    %c0_13 = arith.constant 0 : index
    %7 = vector.load %arg13[%c0_11, %c0_12, %c0_13] : memref<18x18x4xf32, #tpu.memory_space<vmem>>, vector<16x16x4xf32>
    %8 = vector.extract_strided_slice %2 {offsets = [0, 0], sizes = [1, 4], strides = [1, 1]} : vector<9x4xf32> to vector<1x4xf32>
    %9 = vector.shape_cast %8 : vector<1x4xf32> to vector<4xf32>
    %10 = vector.shape_cast %9 : vector<4xf32> to vector<1x1x4xf32>
    %11 = vector.broadcast %10 : vector<1x1x4xf32> to vector<16x16x4xf32>
    %12 = arith.mulf %7, %11 : vector<16x16x4xf32>
    %13 = arith.addf %6, %12 : vector<16x16x4xf32>
    %c0_14 = arith.constant 0 : index
    %c1_15 = arith.constant 1 : index
    %c0_16 = arith.constant 0 : index
    %14 = vector.load %arg13[%c0_14, %c1_15, %c0_16] : memref<18x18x4xf32, #tpu.memory_space<vmem>>, vector<16x16x4xf32>
    %15 = vector.extract_strided_slice %2 {offsets = [1, 0], sizes = [1, 4], strides = [1, 1]} : vector<9x4xf32> to vector<1x4xf32>
    %16 = vector.shape_cast %15 : vector<1x4xf32> to vector<4xf32>
    %17 = vector.shape_cast %16 : vector<4xf32> to vector<1x1x4xf32>
    %18 = vector.broadcast %17 : vector<1x1x4xf32> to vector<16x16x4xf32>
    %19 = arith.mulf %14, %18 : vector<16x16x4xf32>
    %20 = arith.addf %13, %19 : vector<16x16x4xf32>
    %c0_17 = arith.constant 0 : index
    %c2 = arith.constant 2 : index
    %c0_18 = arith.constant 0 : index
    %21 = vector.load %arg13[%c0_17, %c2, %c0_18] : memref<18x18x4xf32, #tpu.memory_space<vmem>>, vector<16x16x4xf32>
    %22 = vector.extract_strided_slice %2 {offsets = [2, 0], sizes = [1, 4], strides = [1, 1]} : vector<9x4xf32> to vector<1x4xf32>
    %23 = vector.shape_cast %22 : vector<1x4xf32> to vector<4xf32>
    %24 = vector.shape_cast %23 : vector<4xf32> to vector<1x1x4xf32>
    %25 = vector.broadcast %24 : vector<1x1x4xf32> to vector<16x16x4xf32>
    %26 = arith.mulf %21, %25 : vector<16x16x4xf32>
    %27 = arith.addf %20, %26 : vector<16x16x4xf32>
    %c1_19 = arith.constant 1 : index
    %c0_20 = arith.constant 0 : index
    %c0_21 = arith.constant 0 : index
    %28 = vector.load %arg13[%c1_19, %c0_20, %c0_21] : memref<18x18x4xf32, #tpu.memory_space<vmem>>, vector<16x16x4xf32>
    %29 = vector.extract_strided_slice %2 {offsets = [3, 0], sizes = [1, 4], strides = [1, 1]} : vector<9x4xf32> to vector<1x4xf32>
    %30 = vector.shape_cast %29 : vector<1x4xf32> to vector<4xf32>
    %31 = vector.shape_cast %30 : vector<4xf32> to vector<1x1x4xf32>
    %32 = vector.broadcast %31 : vector<1x1x4xf32> to vector<16x16x4xf32>
    %33 = arith.mulf %28, %32 : vector<16x16x4xf32>
    %34 = arith.addf %27, %33 : vector<16x16x4xf32>
    %c1_22 = arith.constant 1 : index
    %c1_23 = arith.constant 1 : index
    %c0_24 = arith.constant 0 : index
    %35 = vector.load %arg13[%c1_22, %c1_23, %c0_24] : memref<18x18x4xf32, #tpu.memory_space<vmem>>, vector<16x16x4xf32>
    %36 = vector.extract_strided_slice %2 {offsets = [4, 0], sizes = [1, 4], strides = [1, 1]} : vector<9x4xf32> to vector<1x4xf32>
    %37 = vector.shape_cast %36 : vector<1x4xf32> to vector<4xf32>
    %38 = vector.shape_cast %37 : vector<4xf32> to vector<1x1x4xf32>
    %39 = vector.broadcast %38 : vector<1x1x4xf32> to vector<16x16x4xf32>
    %40 = arith.mulf %35, %39 : vector<16x16x4xf32>
    %41 = arith.addf %34, %40 : vector<16x16x4xf32>
    %c1_25 = arith.constant 1 : index
    %c2_26 = arith.constant 2 : index
    %c0_27 = arith.constant 0 : index
    %42 = vector.load %arg13[%c1_25, %c2_26, %c0_27] : memref<18x18x4xf32, #tpu.memory_space<vmem>>, vector<16x16x4xf32>
    %43 = vector.extract_strided_slice %2 {offsets = [5, 0], sizes = [1, 4], strides = [1, 1]} : vector<9x4xf32> to vector<1x4xf32>
    %44 = vector.shape_cast %43 : vector<1x4xf32> to vector<4xf32>
    %45 = vector.shape_cast %44 : vector<4xf32> to vector<1x1x4xf32>
    %46 = vector.broadcast %45 : vector<1x1x4xf32> to vector<16x16x4xf32>
    %47 = arith.mulf %42, %46 : vector<16x16x4xf32>
    %48 = arith.addf %41, %47 : vector<16x16x4xf32>
    %c2_28 = arith.constant 2 : index
    %c0_29 = arith.constant 0 : index
    %c0_30 = arith.constant 0 : index
    %49 = vector.load %arg13[%c2_28, %c0_29, %c0_30] : memref<18x18x4xf32, #tpu.memory_space<vmem>>, vector<16x16x4xf32>
    %50 = vector.extract_strided_slice %2 {offsets = [6, 0], sizes = [1, 4], strides = [1, 1]} : vector<9x4xf32> to vector<1x4xf32>
    %51 = vector.shape_cast %50 : vector<1x4xf32> to vector<4xf32>
    %52 = vector.shape_cast %51 : vector<4xf32> to vector<1x1x4xf32>
    %53 = vector.broadcast %52 : vector<1x1x4xf32> to vector<16x16x4xf32>
    %54 = arith.mulf %49, %53 : vector<16x16x4xf32>
    %55 = arith.addf %48, %54 : vector<16x16x4xf32>
    %c2_31 = arith.constant 2 : index
    %c1_32 = arith.constant 1 : index
    %c0_33 = arith.constant 0 : index
    %56 = vector.load %arg13[%c2_31, %c1_32, %c0_33] : memref<18x18x4xf32, #tpu.memory_space<vmem>>, vector<16x16x4xf32>
    %57 = vector.extract_strided_slice %2 {offsets = [7, 0], sizes = [1, 4], strides = [1, 1]} : vector<9x4xf32> to vector<1x4xf32>
    %58 = vector.shape_cast %57 : vector<1x4xf32> to vector<4xf32>
    %59 = vector.shape_cast %58 : vector<4xf32> to vector<1x1x4xf32>
    %60 = vector.broadcast %59 : vector<1x1x4xf32> to vector<16x16x4xf32>
    %61 = arith.mulf %56, %60 : vector<16x16x4xf32>
    %62 = arith.addf %55, %61 : vector<16x16x4xf32>
    %c2_34 = arith.constant 2 : index
    %c2_35 = arith.constant 2 : index
    %c0_36 = arith.constant 0 : index
    %63 = vector.load %arg13[%c2_34, %c2_35, %c0_36] : memref<18x18x4xf32, #tpu.memory_space<vmem>>, vector<16x16x4xf32>
    %64 = vector.extract_strided_slice %2 {offsets = [8, 0], sizes = [1, 4], strides = [1, 1]} : vector<9x4xf32> to vector<1x4xf32>
    %65 = vector.shape_cast %64 : vector<1x4xf32> to vector<4xf32>
    %66 = vector.shape_cast %65 : vector<4xf32> to vector<1x1x4xf32>
    %67 = vector.broadcast %66 : vector<1x1x4xf32> to vector<16x16x4xf32>
    %68 = arith.mulf %63, %67 : vector<16x16x4xf32>
    %69 = arith.addf %62, %68 : vector<16x16x4xf32>
    %c0_37 = arith.constant 0 : index
    %c0_38 = arith.constant 0 : index
    %70 = vector.load %arg3[%c0_37, %c0_38] : memref<1x4xf32, #tpu.memory_space<vmem>>, vector<1x4xf32>
    %71 = vector.shape_cast %70 : vector<1x4xf32> to vector<1x1x4xf32>
    %72 = vector.broadcast %71 : vector<1x1x4xf32> to vector<16x16x4xf32>
    %73 = arith.addf %69, %72 : vector<16x16x4xf32>
    %cst_39 = arith.constant 0.000000e+00 : f32
    %74 = vector.broadcast %cst_39 : f32 to vector<16x16x4xf32>
    %75 = arith.maximumf %73, %74 : vector<16x16x4xf32>
    %c0_40 = arith.constant 0 : index
    %c0_41 = arith.constant 0 : index
    %76 = vector.load %arg4[%c0_40, %c0_41] : memref<4x8xf32, #tpu.memory_space<vmem>>, vector<4x8xf32>
    %77 = vector.shape_cast %75 : vector<16x16x4xf32> to vector<256x4xf32>
    %cst_42 = arith.constant dense<0.000000e+00> : vector<256x8xf32>
    %78 = tpu.matmul %77, %76, %cst_42 {dimension_numbers = #tpu.dot_dimension_numbers<[1], [0], [0], [1], [0, 0, 1, 1], [], []>} : vector<256x4xf32>, vector<4x8xf32>, vector<256x8xf32> -> vector<256x8xf32>
    %c0_43 = arith.constant 0 : index
    %c0_44 = arith.constant 0 : index
    %79 = vector.load %arg5[%c0_43, %c0_44] : memref<1x8xf32, #tpu.memory_space<vmem>>, vector<1x8xf32>
    %80 = vector.broadcast %79 : vector<1x8xf32> to vector<256x8xf32>
    %81 = arith.addf %78, %80 : vector<256x8xf32>
    %cst_45 = arith.constant 0.000000e+00 : f32
    %82 = vector.broadcast %cst_45 : f32 to vector<256x8xf32>
    %83 = arith.maximumf %81, %82 : vector<256x8xf32>
    %84 = vector.shape_cast %83 : vector<256x8xf32> to vector<16x16x8xf32>
    %c0_46 = arith.constant 0 : index
    %c0_47 = arith.constant 0 : index
    %85 = vector.load %arg6[%c0_46, %c0_47] : memref<4x8xf32, #tpu.memory_space<vmem>>, vector<4x8xf32>
    %86 = vector.shape_cast %1 : vector<16x16x4xf32> to vector<256x4xf32>
    %cst_48 = arith.constant dense<0.000000e+00> : vector<256x8xf32>
    %87 = tpu.matmul %86, %85, %cst_48 {dimension_numbers = #tpu.dot_dimension_numbers<[1], [0], [0], [1], [0, 0, 1, 1], [], []>} : vector<256x4xf32>, vector<4x8xf32>, vector<256x8xf32> -> vector<256x8xf32>
    %c0_49 = arith.constant 0 : index
    %c0_50 = arith.constant 0 : index
    %88 = vector.load %arg7[%c0_49, %c0_50] : memref<1x8xf32, #tpu.memory_space<vmem>>, vector<1x8xf32>
    %89 = vector.broadcast %88 : vector<1x8xf32> to vector<256x8xf32>
    %90 = arith.addf %87, %89 : vector<256x8xf32>
    %cst_51 = arith.constant 0.000000e+00 : f32
    %91 = vector.broadcast %cst_51 : f32 to vector<256x8xf32>
    %92 = arith.maximumf %90, %91 : vector<256x8xf32>
    %93 = vector.shape_cast %92 : vector<256x8xf32> to vector<16x16x8xf32>
    %c0_52 = arith.constant 0 : index
    %c0_53 = arith.constant 0 : index
    %94 = vector.load %arg8[%c0_52, %c0_53] : memref<9x8xf32, #tpu.memory_space<vmem>>, vector<9x8xf32>
    %cst_54 = arith.constant 0.000000e+00 : f32
    %95 = vector.broadcast %cst_54 : f32 to vector<18x18x8xf32>
    %c0_55 = arith.constant 0 : index
    %c0_56 = arith.constant 0 : index
    %c0_57 = arith.constant 0 : index
    %96 = vector.load %arg14[%c0_55, %c0_56, %c0_57] : memref<18x18x8xf32, #tpu.memory_space<vmem>>, vector<18x18x8xf32>
    tpu.vector_store %arg14[%c0_55, %c0_56, %c0_57], %95 {strides = array<i32>} : memref<18x18x8xf32, #tpu.memory_space<vmem>>, vector<18x18x8xf32>,
    %c1_58 = arith.constant 1 : index
    %c1_59 = arith.constant 1 : index
    %c0_60 = arith.constant 0 : index
    %97 = vector.load %arg14[%c1_58, %c1_59, %c0_60] : memref<18x18x8xf32, #tpu.memory_space<vmem>>, vector<16x16x8xf32>
    tpu.vector_store %arg14[%c1_58, %c1_59, %c0_60], %93 {strides = array<i32>} : memref<18x18x8xf32, #tpu.memory_space<vmem>>, vector<16x16x8xf32>,
    %cst_61 = arith.constant 0.000000e+00 : f32
    %98 = vector.broadcast %cst_61 : f32 to vector<16x16x8xf32>
    %c0_62 = arith.constant 0 : index
    %c0_63 = arith.constant 0 : index
    %c0_64 = arith.constant 0 : index
    %99 = vector.load %arg14[%c0_62, %c0_63, %c0_64] : memref<18x18x8xf32, #tpu.memory_space<vmem>>, vector<16x16x8xf32>
    %100 = vector.extract_strided_slice %94 {offsets = [0, 0], sizes = [1, 8], strides = [1, 1]} : vector<9x8xf32> to vector<1x8xf32>
    %101 = vector.shape_cast %100 : vector<1x8xf32> to vector<8xf32>
    %102 = vector.shape_cast %101 : vector<8xf32> to vector<1x1x8xf32>
    %103 = vector.broadcast %102 : vector<1x1x8xf32> to vector<16x16x8xf32>
    %104 = arith.mulf %99, %103 : vector<16x16x8xf32>
    %105 = arith.addf %98, %104 : vector<16x16x8xf32>
    %c0_65 = arith.constant 0 : index
    %c1_66 = arith.constant 1 : index
    %c0_67 = arith.constant 0 : index
    %106 = vector.load %arg14[%c0_65, %c1_66, %c0_67] : memref<18x18x8xf32, #tpu.memory_space<vmem>>, vector<16x16x8xf32>
    %107 = vector.extract_strided_slice %94 {offsets = [1, 0], sizes = [1, 8], strides = [1, 1]} : vector<9x8xf32> to vector<1x8xf32>
    %108 = vector.shape_cast %107 : vector<1x8xf32> to vector<8xf32>
    %109 = vector.shape_cast %108 : vector<8xf32> to vector<1x1x8xf32>
    %110 = vector.broadcast %109 : vector<1x1x8xf32> to vector<16x16x8xf32>
    %111 = arith.mulf %106, %110 : vector<16x16x8xf32>
    %112 = arith.addf %105, %111 : vector<16x16x8xf32>
    %c0_68 = arith.constant 0 : index
    %c2_69 = arith.constant 2 : index
    %c0_70 = arith.constant 0 : index
    %113 = vector.load %arg14[%c0_68, %c2_69, %c0_70] : memref<18x18x8xf32, #tpu.memory_space<vmem>>, vector<16x16x8xf32>
    %114 = vector.extract_strided_slice %94 {offsets = [2, 0], sizes = [1, 8], strides = [1, 1]} : vector<9x8xf32> to vector<1x8xf32>
    %115 = vector.shape_cast %114 : vector<1x8xf32> to vector<8xf32>
    %116 = vector.shape_cast %115 : vector<8xf32> to vector<1x1x8xf32>
    %117 = vector.broadcast %116 : vector<1x1x8xf32> to vector<16x16x8xf32>
    %118 = arith.mulf %113, %117 : vector<16x16x8xf32>
    %119 = arith.addf %112, %118 : vector<16x16x8xf32>
    %c1_71 = arith.constant 1 : index
    %c0_72 = arith.constant 0 : index
    %c0_73 = arith.constant 0 : index
    %120 = vector.load %arg14[%c1_71, %c0_72, %c0_73] : memref<18x18x8xf32, #tpu.memory_space<vmem>>, vector<16x16x8xf32>
    %121 = vector.extract_strided_slice %94 {offsets = [3, 0], sizes = [1, 8], strides = [1, 1]} : vector<9x8xf32> to vector<1x8xf32>
    %122 = vector.shape_cast %121 : vector<1x8xf32> to vector<8xf32>
    %123 = vector.shape_cast %122 : vector<8xf32> to vector<1x1x8xf32>
    %124 = vector.broadcast %123 : vector<1x1x8xf32> to vector<16x16x8xf32>
    %125 = arith.mulf %120, %124 : vector<16x16x8xf32>
    %126 = arith.addf %119, %125 : vector<16x16x8xf32>
    %c1_74 = arith.constant 1 : index
    %c1_75 = arith.constant 1 : index
    %c0_76 = arith.constant 0 : index
    %127 = vector.load %arg14[%c1_74, %c1_75, %c0_76] : memref<18x18x8xf32, #tpu.memory_space<vmem>>, vector<16x16x8xf32>
    %128 = vector.extract_strided_slice %94 {offsets = [4, 0], sizes = [1, 8], strides = [1, 1]} : vector<9x8xf32> to vector<1x8xf32>
    %129 = vector.shape_cast %128 : vector<1x8xf32> to vector<8xf32>
    %130 = vector.shape_cast %129 : vector<8xf32> to vector<1x1x8xf32>
    %131 = vector.broadcast %130 : vector<1x1x8xf32> to vector<16x16x8xf32>
    %132 = arith.mulf %127, %131 : vector<16x16x8xf32>
    %133 = arith.addf %126, %132 : vector<16x16x8xf32>
    %c1_77 = arith.constant 1 : index
    %c2_78 = arith.constant 2 : index
    %c0_79 = arith.constant 0 : index
    %134 = vector.load %arg14[%c1_77, %c2_78, %c0_79] : memref<18x18x8xf32, #tpu.memory_space<vmem>>, vector<16x16x8xf32>
    %135 = vector.extract_strided_slice %94 {offsets = [5, 0], sizes = [1, 8], strides = [1, 1]} : vector<9x8xf32> to vector<1x8xf32>
    %136 = vector.shape_cast %135 : vector<1x8xf32> to vector<8xf32>
    %137 = vector.shape_cast %136 : vector<8xf32> to vector<1x1x8xf32>
    %138 = vector.broadcast %137 : vector<1x1x8xf32> to vector<16x16x8xf32>
    %139 = arith.mulf %134, %138 : vector<16x16x8xf32>
    %140 = arith.addf %133, %139 : vector<16x16x8xf32>
    %c2_80 = arith.constant 2 : index
    %c0_81 = arith.constant 0 : index
    %c0_82 = arith.constant 0 : index
    %141 = vector.load %arg14[%c2_80, %c0_81, %c0_82] : memref<18x18x8xf32, #tpu.memory_space<vmem>>, vector<16x16x8xf32>
    %142 = vector.extract_strided_slice %94 {offsets = [6, 0], sizes = [1, 8], strides = [1, 1]} : vector<9x8xf32> to vector<1x8xf32>
    %143 = vector.shape_cast %142 : vector<1x8xf32> to vector<8xf32>
    %144 = vector.shape_cast %143 : vector<8xf32> to vector<1x1x8xf32>
    %145 = vector.broadcast %144 : vector<1x1x8xf32> to vector<16x16x8xf32>
    %146 = arith.mulf %141, %145 : vector<16x16x8xf32>
    %147 = arith.addf %140, %146 : vector<16x16x8xf32>
    %c2_83 = arith.constant 2 : index
    %c1_84 = arith.constant 1 : index
    %c0_85 = arith.constant 0 : index
    %148 = vector.load %arg14[%c2_83, %c1_84, %c0_85] : memref<18x18x8xf32, #tpu.memory_space<vmem>>, vector<16x16x8xf32>
    %149 = vector.extract_strided_slice %94 {offsets = [7, 0], sizes = [1, 8], strides = [1, 1]} : vector<9x8xf32> to vector<1x8xf32>
    %150 = vector.shape_cast %149 : vector<1x8xf32> to vector<8xf32>
    %151 = vector.shape_cast %150 : vector<8xf32> to vector<1x1x8xf32>
    %152 = vector.broadcast %151 : vector<1x1x8xf32> to vector<16x16x8xf32>
    %153 = arith.mulf %148, %152 : vector<16x16x8xf32>
    %154 = arith.addf %147, %153 : vector<16x16x8xf32>
    %c2_86 = arith.constant 2 : index
    %c2_87 = arith.constant 2 : index
    %c0_88 = arith.constant 0 : index
    %155 = vector.load %arg14[%c2_86, %c2_87, %c0_88] : memref<18x18x8xf32, #tpu.memory_space<vmem>>, vector<16x16x8xf32>
    %156 = vector.extract_strided_slice %94 {offsets = [8, 0], sizes = [1, 8], strides = [1, 1]} : vector<9x8xf32> to vector<1x8xf32>
    %157 = vector.shape_cast %156 : vector<1x8xf32> to vector<8xf32>
    %158 = vector.shape_cast %157 : vector<8xf32> to vector<1x1x8xf32>
    %159 = vector.broadcast %158 : vector<1x1x8xf32> to vector<16x16x8xf32>
    %160 = arith.mulf %155, %159 : vector<16x16x8xf32>
    %161 = arith.addf %154, %160 : vector<16x16x8xf32>
    %c0_89 = arith.constant 0 : index
    %c0_90 = arith.constant 0 : index
    %162 = vector.load %arg9[%c0_89, %c0_90] : memref<1x8xf32, #tpu.memory_space<vmem>>, vector<1x8xf32>
    %163 = vector.shape_cast %162 : vector<1x8xf32> to vector<1x1x8xf32>
    %164 = vector.broadcast %163 : vector<1x1x8xf32> to vector<16x16x8xf32>
    %165 = arith.addf %161, %164 : vector<16x16x8xf32>
    %cst_91 = arith.constant 0.000000e+00 : f32
    %166 = vector.broadcast %cst_91 : f32 to vector<16x16x8xf32>
    %167 = arith.maximumf %165, %166 : vector<16x16x8xf32>
    %c0_92 = arith.constant 0 : index
    %c0_93 = arith.constant 0 : index
    %168 = vector.load %arg10[%c0_92, %c0_93] : memref<8x8xf32, #tpu.memory_space<vmem>>, vector<8x8xf32>
    %169 = vector.shape_cast %167 : vector<16x16x8xf32> to vector<256x8xf32>
    %cst_94 = arith.constant dense<0.000000e+00> : vector<256x8xf32>
    %170 = tpu.matmul %169, %168, %cst_94 {dimension_numbers = #tpu.dot_dimension_numbers<[1], [0], [0], [1], [0, 0, 1, 1], [], []>} : vector<256x8xf32>, vector<8x8xf32>, vector<256x8xf32> -> vector<256x8xf32>
    %c0_95 = arith.constant 0 : index
    %c0_96 = arith.constant 0 : index
    %171 = vector.load %arg11[%c0_95, %c0_96] : memref<1x8xf32, #tpu.memory_space<vmem>>, vector<1x8xf32>
    %172 = vector.broadcast %171 : vector<1x8xf32> to vector<256x8xf32>
    %173 = arith.addf %170, %172 : vector<256x8xf32>
    %cst_97 = arith.constant 0.000000e+00 : f32
    %174 = vector.broadcast %cst_97 : f32 to vector<256x8xf32>
    %175 = arith.maximumf %173, %174 : vector<256x8xf32>
    %176 = vector.shape_cast %175 : vector<256x8xf32> to vector<16x16x8xf32>
    %177 = arith.addf %84, %176 : vector<16x16x8xf32>
    %c0_98 = arith.constant 0 : index
    %c0_99 = arith.constant 0 : index
    %c0_100 = arith.constant 0 : index
    %c0_101 = arith.constant 0 : index
    %178 = vector.load %arg12[%c0_98, %c0_99, %c0_100, %c0_101] : memref<1x16x16x8xf32, #tpu.memory_space<vmem>>, vector<1x16x16x8xf32>
    %179 = vector.shape_cast %178 : vector<1x16x16x8xf32> to vector<16x16x8xf32>
    %180 = vector.shape_cast %177 : vector<16x16x8xf32> to vector<1x16x16x8xf32>
    tpu.vector_store %arg12[%c0_98, %c0_99, %c0_100, %c0_101], %180 {strides = array<i32>} : memref<1x16x16x8xf32, #tpu.memory_space<vmem>>, vector<1x16x16x8xf32>,
    return
  }
  func.func @transform_0(%arg0: i32) -> (i32, i32, i32, i32) {
    %c0_i32 = arith.constant 0 : i32
    %c0_i32_0 = arith.constant 0 : i32
    %c0_i32_1 = arith.constant 0 : i32
    %c0_i32_2 = arith.constant 0 : i32
    return %arg0, %c0_i32, %c0_i32_0, %c0_i32_1 : i32, i32, i32, i32
  }
  func.func @transform_1(%arg0: i32) -> (i32, i32) {
    %c0_i32 = arith.constant 0 : i32
    %c0_i32_0 = arith.constant 0 : i32
    %c0_i32_1 = arith.constant 0 : i32
    return %c0_i32, %c0_i32_0 : i32, i32
  }
  func.func @transform_2(%arg0: i32) -> (i32, i32) {
    %c0_i32 = arith.constant 0 : i32
    %c0_i32_0 = arith.constant 0 : i32
    %c0_i32_1 = arith.constant 0 : i32
    return %c0_i32, %c0_i32_0 : i32, i32
  }
  func.func @transform_3(%arg0: i32) -> (i32, i32) {
    %c0_i32 = arith.constant 0 : i32
    %c0_i32_0 = arith.constant 0 : i32
    %c0_i32_1 = arith.constant 0 : i32
    return %c0_i32, %c0_i32_0 : i32, i32
  }
  func.func @transform_4(%arg0: i32) -> (i32, i32) {
    %c0_i32 = arith.constant 0 : i32
    %c0_i32_0 = arith.constant 0 : i32
    %c0_i32_1 = arith.constant 0 : i32
    return %c0_i32, %c0_i32_0 : i32, i32
  }
  func.func @transform_5(%arg0: i32) -> (i32, i32) {
    %c0_i32 = arith.constant 0 : i32
    %c0_i32_0 = arith.constant 0 : i32
    %c0_i32_1 = arith.constant 0 : i32
    return %c0_i32, %c0_i32_0 : i32, i32
  }
  func.func @transform_6(%arg0: i32) -> (i32, i32) {
    %c0_i32 = arith.constant 0 : i32
    %c0_i32_0 = arith.constant 0 : i32
    %c0_i32_1 = arith.constant 0 : i32
    return %c0_i32, %c0_i32_0 : i32, i32
  }
  func.func @transform_7(%arg0: i32) -> (i32, i32) {
    %c0_i32 = arith.constant 0 : i32
    %c0_i32_0 = arith.constant 0 : i32
    %c0_i32_1 = arith.constant 0 : i32
    return %c0_i32, %c0_i32_0 : i32, i32
  }
  func.func @transform_8(%arg0: i32) -> (i32, i32) {
    %c0_i32 = arith.constant 0 : i32
    %c0_i32_0 = arith.constant 0 : i32
    %c0_i32_1 = arith.constant 0 : i32
    return %c0_i32, %c0_i32_0 : i32, i32
  }
  func.func @transform_9(%arg0: i32) -> (i32, i32) {
    %c0_i32 = arith.constant 0 : i32
    %c0_i32_0 = arith.constant 0 : i32
    %c0_i32_1 = arith.constant 0 : i32
    return %c0_i32, %c0_i32_0 : i32, i32
  }
  func.func @transform_10(%arg0: i32) -> (i32, i32) {
    %c0_i32 = arith.constant 0 : i32
    %c0_i32_0 = arith.constant 0 : i32
    %c0_i32_1 = arith.constant 0 : i32
    return %c0_i32, %c0_i32_0 : i32, i32
  }
  func.func @transform_11(%arg0: i32) -> (i32, i32, i32, i32) {
    %c0_i32 = arith.constant 0 : i32
    %c0_i32_0 = arith.constant 0 : i32
    %c0_i32_1 = arith.constant 0 : i32
    %c0_i32_2 = arith.constant 0 : i32
    return %arg0, %c0_i32, %c0_i32_0, %c0_i32_1 : i32, i32, i32, i32
  }
}

</mosaic_0001>

<bundles_post_ra>
// kernel: tpu_custom_call.1
= control target key start
LH: loop header
LB: loop body
LE: loop exit
PB: predicated region body
PF: predicated region fallthrough
CT: control target
= control target key end

     0   :  { %s3558_s17 = smov 0   ;;  %s5844_s0 = inlined_call_operand.vmem [shape: f32[2,16,16,4], index: 0, kind: input, shape index: {}]   ;;  %s5845_s1 = inlined_call_operand.vmem [shape: f32[9,4], index: 1, kind: input, shape index: {}]   ;;  %s5846_s2 = inlined_call_operand.vmem [shape: f32[1,4], index: 2, kind: input, shape index: {}]   ;;  %s5847_s3 = inlined_call_operand.vmem [shape: f32[4,8], index: 3, kind: input, shape index: {}]   ;;  %s5848_s4 = inlined_call_operand.vmem [shape: f32[1,8], index: 4, kind: input, shape index: {}]   ;;  %s5849_s5 = inlined_call_operand.vmem [shape: f32[4,8], index: 5, kind: input, shape index: {}]   ;;  %s5850_s6 = inlined_call_operand.vmem [shape: f32[1,8], index: 6, kind: input, shape index: {}]   ;;  %s5851_s7 = inlined_call_operand.vmem [shape: f32[9,8], index: 7, kind: input, shape index: {}]   ;;  %s5852_s8 = inlined_call_operand.vmem [shape: f32[1,8], index: 8, kind: input, shape index: {}]   ;;  %s5853_s9 = inlined_call_operand.vmem [shape: f32[8,8], index: 9, kind: input, shape index: {}]   ;;  %s5854_s10 = inlined_call_operand.vmem [shape: f32[1,8], index: 10, kind: input, shape index: {}]   ;;  %s5855_s11 = inlined_call_operand.vmem [shape: f32[2,16,16,8], index: 11, kind: output, shape index: {}]  }
   0x1 LB: > { %s3349_s18 = sadd.s32 4294967295, %s3495_s17   ;;  %p3353_p0 = scmp.ge.s32.totalorder %s3495_s17, 1  ;;  %s3495_s17 = sphi %s3558_s17, %s21_s17  }
   0x2   : > { %p337_p1 = scmp.lt.s32.totalorder %s3495_s17, 3 }
   0x4   : > { %p338_p2 = pnand %p3353_p0, %p337_p1 }
   0x6   : > { %341 = sbr.rel (%p338_p2) target bundleno = 625 (0x271), region = 64 }
   0xb   : > { %vm1553_vm0 = vcmask 1043456   ;;  %v3569_v0 = vld [vmem:[%s5849_s5] sm:$0xf]  ;;  %p377_p3 = scmp.lt.s32.totalorder %s3349_s18, 1  ;;  %vm421_vm1 = vcmask 31744   ;;  %v3497_v1 = vmov 0.0  }
   0xc   : > { %3391 = vmatpush.msk.msra.mxu1 %vm1553_vm0, %v3569_v0  ;;  %426 = vst.msk [vmem:[#allocation2 + $0x18] sm:$0xff] %vm421_vm1, %v3497_v1  ;;  %vm424_vm2 = vcmask 25600   ;;  %v1452_v7 = vld [vmem:[%s5847_s3] sm:$0xf]  ;;  %v420_v27 = vld [vmem:[%s5845_s1 + $0x8] sm:$0x1] }
   0xd   : > { %s6087_s18 = smov (!%p377_p3, %s3349_s18), 1  ;;  %427 = vst.msk [vmem:[#allocation2 + $0x20] sm:$0xff] %vm421_vm1, %v3497_v1  ;;  %3460 = vmatpush.msk.msra.mxu3 %vm1553_vm0, %v1452_v7  ;;  %3358 = vmatpush.msk.msra.mxu0 %vm1553_vm0, %v1452_v7  ;;  %v419_v17 = vld [vmem:[%s5845_s1] sm:$0xff]  ;;  %v3803_v57 = vperm.slane %v420_v27, 0  ;;  %vm1953_vm3 = vcmask 64512   ;;  %vm1956_vm4 = vcmask 58368  }
   0xe   : > { %422 = vst.msk [vmem:[#allocation2] sm:$0xff] %vm421_vm1, %v3497_v1  ;;  %s3458_s21 = sshll.u32 %s6087_s18, 8  ;;  %v3755_v19 = vperm.slane %v419_v17, 0  ;;  %v3757_v20 = vperm.slane %v419_v17, 1  ;;  %v3761_v21 = vperm.slane %v419_v17, 2  ;;  %v3767_v24 = vperm.slane %v419_v17, 3 }
   0xf   : > { %423 = vst.msk [vmem:[#allocation2 + $0x8] sm:$0xff] %vm421_vm1, %v3497_v1  ;;  %s3589_s24 = scalar_lea.vmem %s5844_s0, %s3458_s21  ;;  %3461 = vmatpush.msk.msrb.mxu3 %vm1553_vm0, %v3569_v0  ;;  %v3784_v33 = vperm.slane %v419_v17, 4  ;;  %v3789_v39 = vperm.slane %v419_v17, 5  ;;  %v3796_v46 = vperm.slane %v419_v17, 6  ;;  %v3799_v51 = vperm.slane %v419_v17, 7  ;;  %s5109_s27 = scalar_lea.vmem %s5855_s11, %s3458_s21 }
  0x10   : > { %429 = vst.msk [vmem:[#allocation2 + $0x30] sm:$0xff] %vm421_vm1, %v3497_v1  ;;  %v387_v2 = vld [vmem:[%s3589_s24] sm:$0xff]  ;;  %v388_v3 = vld [vmem:[%s3589_s24 + $0x8] sm:$0xff]  ;;  %v389_v4 = vld [vmem:[%s3589_s24 + $0x10] sm:$0xff] }
  0x11   : > { %430 = vst.msk [vmem:[#allocation2 + $0x38] sm:$0xff] %vm421_vm1, %v3497_v1  ;;  %3392 = vmatmul.msk.f32.vlgmr.msra.gmra.mxu1 %vm421_vm1, %v387_v2  ;;  %v390_v5 = vld [vmem:[%s3589_s24 + $0x18] sm:$0xff]  ;;  %v391_v6 = vld [vmem:[%s3589_s24 + $0x20] sm:$0xff]  ;;  %v392_v8 = vld [vmem:[%s3589_s24 + $0x28] sm:$0xff] }
  0x12   : > { %478 = vst.msk [vmem:[#allocation2 + $0x19] sm:$0xff] %vm421_vm1, %v387_v2  ;;  %v393_v9 = vld [vmem:[%s3589_s24 + $0x30] sm:$0xff]  ;;  %v394_v10 = vld [vmem:[%s3589_s24 + $0x38] sm:$0xff]  ;;  %v395_v12 = vld [vmem:[%s3589_s24 + $0x40] sm:$0xff] }
  0x13   : > { %432 = vst.msk [vmem:[#allocation2 + $0x48] sm:$0xff] %vm421_vm1, %v3497_v1  ;;  %v3721_v11 = vld [vmem:[%s3589_s24 + $0xb0] sm:$0xff]  ;;  %v3726_v13 = vld [vmem:[%s3589_s24 + $0xb8] sm:$0xff]  ;;  %v3731_v14 = vld [vmem:[%s3589_s24 + $0xc0] sm:$0xff] }
  0x14   : > { %433 = vst.msk [vmem:[#allocation2 + $0x50] sm:$0xff] %vm421_vm1, %v3497_v1  ;;  %v3734_v15 = vld [vmem:[%s3589_s24 + $0xc8] sm:$0xff]  ;;  %v3739_v16 = vld [vmem:[%s3589_s24 + $0xd0] sm:$0xff]  ;;  %v3747_v18 = vld [vmem:[%s3589_s24 + $0xd8] sm:$0xff] }
  0x15   : > { %435 = vst.msk [vmem:[#allocation2 + $0x60] sm:$0xff] %vm421_vm1, %v3497_v1  ;;  %v396_v22 = vld [vmem:[%s3589_s24 + $0x48] sm:$0xff]  ;;  %v3765_v23 = vld [vmem:[%s3589_s24 + $0xe0] sm:$0xff]  ;;  %v3771_v25 = vld [vmem:[%s3589_s24 + $0x50] sm:$0xff] }
  0x16   : > { %436 = vst.msk [vmem:[#allocation2 + $0x68] sm:$0xff] %vm421_vm1, %v3497_v1  ;;  %v3774_v26 = vld [vmem:[%s3589_s24 + $0xe8] sm:$0xff]  ;;  %v3808_v63 = vld [vmem:[%s3589_s24 + $0x58] sm:$0xff]  ;;  %v3811_v0 = vld [vmem:[%s3589_s24 + $0xf0] sm:$0xff] }
  0x17   : > { %438 = vst.msk [vmem:[#allocation2 + $0x78] sm:$0xff] %vm421_vm1, %v3497_v1  ;;  %v3821_v7 = vld [vmem:[%s3589_s24 + $0xf8] sm:$0xff] }
  0x18   : > { %439 = vst.msk [vmem:[#allocation2 + $0x80] sm:$0xff] %vm421_vm1, %v3497_v1 }
  0x19   : > { %441 = vst.msk [vmem:[#allocation2 + $0x90] sm:$0xff] %vm421_vm1, %v3497_v1  ;;  %3393 = vmatmul.msk.f32.gmra.mxu1 %vm421_vm1, %v388_v3 }
  0x1a   : > { %442 = vst.msk [vmem:[#allocation2 + $0x98] sm:$0xff] %vm421_vm1, %v3497_v1 }
  0x1b   : > { %444 = vst.msk [vmem:[#allocation2 + $0xa8] sm:$0xff] %vm421_vm1, %v3497_v1 }
  0x1c   : > { %445 = vst.msk [vmem:[#allocation2 + $0xb0] sm:$0xff] %vm421_vm1, %v3497_v1 }
  0x1d   : > { %447 = vst.msk [vmem:[#allocation2 + $0xc0] sm:$0xff] %vm421_vm1, %v3497_v1 }
  0x1e   : > { %448 = vst.msk [vmem:[#allocation2 + $0xc8] sm:$0xff] %vm421_vm1, %v3497_v1 }
  0x1f   : > { %450 = vst.msk [vmem:[#allocation2 + $0xd8] sm:$0xff] %vm421_vm1, %v3497_v1 }
  0x20   : > { %451 = vst.msk [vmem:[#allocation2 + $0xe0] sm:$0xff] %vm421_vm1, %v3497_v1 }
  0x21   : > { %453 = vst.msk [vmem:[#allocation2 + $0xf0] sm:$0xff] %vm421_vm1, %v3497_v1  ;;  %3394 = vmatmul.msk.f32.gmra.mxu1 %vm421_vm1, %v389_v4 }
  0x22   : > { %454 = vst.msk [vmem:[#allocation2 + $0xf8] sm:$0xff] %vm421_vm1, %v3497_v1 }
  0x23   : > { %456 = vst.msk [vmem:[#allocation2 + $0x108] sm:$0xff] %vm421_vm1, %v3497_v1 }
  0x24   : > { %457 = vst.msk [vmem:[#allocation2 + $0x110] sm:$0xff] %vm421_vm1, %v3497_v1 }
  0x25   : > { %459 = vst.msk [vmem:[#allocation2 + $0x120] sm:$0xff] %vm421_vm1, %v3497_v1 }
  0x26   : > { %460 = vst.msk [vmem:[#allocation2 + $0x128] sm:$0xff] %vm421_vm1, %v3497_v1 }
  0x27   : > { %462 = vst.msk [vmem:[#allocation2 + $0x138] sm:$0xff] %vm421_vm1, %v3497_v1 }
  0x28   : > { %463 = vst.msk [vmem:[#allocation2 + $0x140] sm:$0xff] %vm421_vm1, %v3497_v1 }
  0x29   : > { %465 = vst.msk [vmem:[#allocation2 + $0x150] sm:$0xff] %vm421_vm1, %v3497_v1  ;;  %3395 = vmatmul.msk.f32.gmra.mxu1 %vm421_vm1, %v390_v5 }
  0x2a   : > { %466 = vst.msk [vmem:[#allocation2 + $0x158] sm:$0xff] %vm421_vm1, %v3497_v1 }
  0x2b   : > { %468 = vst.msk [vmem:[#allocation2 + $0x168] sm:$0xff] %vm421_vm1, %v3497_v1 }
  0x2c   : > { %469 = vst.msk [vmem:[#allocation2 + $0x170] sm:$0xff] %vm421_vm1, %v3497_v1 }
  0x2d   : > { %471 = vst.msk [vmem:[#allocation2 + $0x180] sm:$0xff] %vm421_vm1, %v3497_v1 }
  0x2e   : > { %472 = vst.msk [vmem:[#allocation2 + $0x188] sm:$0xff] %vm421_vm1, %v3497_v1 }
  0x2f   : > { %474 = vst.msk [vmem:[#allocation2 + $0x198] sm:$0xff] %vm421_vm1, %v3497_v1 }
  0x30   : > { %475 = vst.msk [vmem:[#allocation2 + $0x1a0] sm:$0xff] %vm421_vm1, %v3497_v1 }
  0x31   : > { %428 = vst.msk [vmem:[#allocation2 + $0x28] sm:$0x3] %vm424_vm2, %v3497_v1  ;;  %3396 = vmatmul.msk.f32.gmra.mxu1 %vm421_vm1, %v391_v6 }
  0x32   : > { %479 = vst.msk [vmem:[#allocation2 + $0x21] sm:$0xff] %vm421_vm1, %v388_v3 }
  0x33   : > { %425 = vst.msk [vmem:[#allocation2 + $0x10] sm:$0x3] %vm424_vm2, %v3497_v1 }
  0x34   : > { %431 = vst.msk [vmem:[#allocation2 + $0x40] sm:$0x3] %vm424_vm2, %v3497_v1 }
  0x35   : > { %434 = vst.msk [vmem:[#allocation2 + $0x58] sm:$0x3] %vm424_vm2, %v3497_v1 }
  0x36   : > { %437 = vst.msk [vmem:[#allocation2 + $0x70] sm:$0x3] %vm424_vm2, %v3497_v1 }
  0x37   : > { %440 = vst.msk [vmem:[#allocation2 + $0x88] sm:$0x3] %vm424_vm2, %v3497_v1 }
  0x38   : > { %443 = vst.msk [vmem:[#allocation2 + $0xa0] sm:$0x3] %vm424_vm2, %v3497_v1 }
  0x39   : > { %446 = vst.msk [vmem:[#allocation2 + $0xb8] sm:$0x3] %vm424_vm2, %v3497_v1  ;;  %3397 = vmatmul.msk.f32.gmra.mxu1 %vm421_vm1, %v392_v8 }
  0x3a   : > { %449 = vst.msk [vmem:[#allocation2 + $0xd0] sm:$0x3] %vm424_vm2, %v3497_v1 }
  0x3b   : > { %452 = vst.msk [vmem:[#allocation2 + $0xe8] sm:$0x3] %vm424_vm2, %v3497_v1 }
  0x3c   : > { %455 = vst.msk [vmem:[#allocation2 + $0x100] sm:$0x3] %vm424_vm2, %v3497_v1 }
  0x3d   : > { %458 = vst.msk [vmem:[#allocation2 + $0x118] sm:$0x3] %vm424_vm2, %v3497_v1 }
  0x3e   : > { %461 = vst.msk [vmem:[#allocation2 + $0x130] sm:$0x3] %vm424_vm2, %v3497_v1 }
  0x3f   : > { %464 = vst.msk [vmem:[#allocation2 + $0x148] sm:$0x3] %vm424_vm2, %v3497_v1 }
  0x40   : > { %467 = vst.msk [vmem:[#allocation2 + $0x160] sm:$0x3] %vm424_vm2, %v3497_v1 }
  0x41   : > { %470 = vst.msk [vmem:[#allocation2 + $0x178] sm:$0x3] %vm424_vm2, %v3497_v1  ;;  %3398 = vmatmul.msk.f32.gmra.mxu1 %vm421_vm1, %v393_v9 }
  0x42   : > { %473 = vst.msk [vmem:[#allocation2 + $0x190] sm:$0x3] %vm424_vm2, %v3497_v1 }
  0x43   : > { %476 = vst.msk [vmem:[#allocation2 + $0x1a8] sm:$0x3] %vm424_vm2, %v3497_v1 }
  0x44   : > { %480 = vst.msk [vmem:[#allocation2 + $0x31] sm:$0xff] %vm421_vm1, %v389_v4 }
  0x45   : > { %481 = vst.msk [vmem:[#allocation2 + $0x39] sm:$0xff] %vm421_vm1, %v390_v5 }
  0x46   : > { %482 = vst.msk [vmem:[#allocation2 + $0x49] sm:$0xff] %vm421_vm1, %v391_v6 }
  0x47   : > { %483 = vst.msk [vmem:[#allocation2 + $0x51] sm:$0xff] %vm421_vm1, %v392_v8 }
  0x48   : > { %484 = vst.msk [vmem:[#allocation2 + $0x61] sm:$0xff] %vm421_vm1, %v393_v9 }
  0x49   : > { %485 = vst.msk [vmem:[#allocation2 + $0x69] sm:$0xff] %vm421_vm1, %v394_v10  ;;  %3399 = vmatmul.msk.f32.gmra.mxu1 %vm421_vm1, %v394_v10 }
  0x4a   : > { %5943 = vst [vmem:[#allocation4_spill] sm:$0xff] %v3726_v13 }
  0x4b   : > { %486 = vst.msk [vmem:[#allocation2 + $0x79] sm:$0xff] %vm421_vm1, %v395_v12 }
  0x4c   : > { %500 = vst.msk [vmem:[#allocation2 + $0x121] sm:$0xff] %vm421_vm1, %v3721_v11 }
  0x4d   : > { %501 = vst.msk [vmem:[#allocation2 + $0x129] sm:$0xff] %vm421_vm1, %v3726_v13 }
  0x4e   : > { %502 = vst.msk [vmem:[#allocation2 + $0x139] sm:$0xff] %vm421_vm1, %v3731_v14 }
  0x4f   : > { %503 = vst.msk [vmem:[#allocation2 + $0x141] sm:$0xff] %vm421_vm1, %v3734_v15 }
  0x50   : > { %504 = vst.msk [vmem:[#allocation2 + $0x151] sm:$0xff] %vm421_vm1, %v3739_v16 }
  0x51   : > { %505 = vst.msk [vmem:[#allocation2 + $0x159] sm:$0xff] %vm421_vm1, %v3747_v18  ;;  %3400 = vmatmul.msk.f32.gmra.mxu1 %vm421_vm1, %v395_v12 }
  0x52   : > { %5944 = vst [vmem:[#allocation5_spill] sm:$0xff] %v3765_v23 }
  0x53   : > { %487 = vst.msk [vmem:[#allocation2 + $0x81] sm:$0xff] %vm421_vm1, %v396_v22  ;;  %v534_v28 = vld [vmem:[#allocation2 + $0x120] sm:$0xff] }
  0x54   : > { %5945 = vst [vmem:[#allocation6_spill] sm:$0xff] %v3774_v26  ;;  %v631_v29 = vld [vmem:[#allocation2 + $0x121] sm:$0xff]  ;;  %v567_v30 = vmul.f32 %v3755_v19, %v534_v28  ;;  %v632_v35 = vld [vmem:[#allocation2 + $0x129] sm:$0xff] }
  0x55   : > { %488 = vst.msk [vmem:[#allocation2 + $0x91] sm:$0xff] %vm421_vm1, %v3771_v25  ;;  %v664_v31 = vmul.f32 %v3757_v20, %v631_v29  ;;  %v728_v32 = vld [vmem:[#allocation2 + $0x122] sm:$0xff]  ;;  %v825_v37 = vld [vmem:[#allocation2 + $0x138] sm:$0xff]  ;;  %v665_v41 = vmul.f32 %v3757_v20, %v632_v35  ;;  %v729_v42 = vld [vmem:[#allocation2 + $0x12a] sm:$0xff] }
  0x56   : > { %5946 = vst [vmem:[#allocation7_spill] sm:$0xff] %v3784_v33  ;;  %v535_v34 = vld [vmem:[#allocation2 + $0x128] sm:$0xff]  ;;  %v761_v36 = vmul.f32 %v3761_v21, %v728_v32  ;;  %v922_v38 = vld [vmem:[#allocation2 + $0x139] sm:$0xff]  ;;  %v858_v44 = vmul.f32 %v3767_v24, %v825_v37  ;;  %v762_v47 = vmul.f32 %v3761_v21, %v729_v42  ;;  %v569_v5 = vmul.f32 %v825_v37, %v3755_v19 }
  0x57   : > { %506 = vst.msk [vmem:[#allocation2 + $0x169] sm:$0xff] %vm421_vm1, %v3765_v23  ;;  %v568_v40 = vmul.f32 %v3755_v19, %v535_v34  ;;  %v696_v43 = vadd.f32 %v664_v31, %v567_v30  ;;  %v1019_v45 = vld [vmem:[#allocation2 + $0x13a] sm:$0xff]  ;;  %v1117_v50 = vld [vmem:[#allocation2 + $0x150] sm:$0xff]  ;;  %v955_v55 = vmul.f32 %v3784_v33, %v922_v38  ;;  %v1020_v58 = vld [vmem:[#allocation2 + $0x142] sm:$0xff]  ;;  %v666_v6 = vmul.f32 %v922_v38, %v3757_v20 }
  0x58   : > { %507 = vst.msk [vmem:[#allocation2 + $0x171] sm:$0xff] %vm421_vm1, %v3774_v26  ;;  %v826_v48 = vld [vmem:[#allocation2 + $0x140] sm:$0xff]  ;;  %v1214_v56 = vld [vmem:[#allocation2 + $0x151] sm:$0xff]  ;;  %v1052_v59 = vmul.f32 %v3789_v39, %v1019_v45  ;;  %v1150_v3 = vmul.f32 %v3796_v46, %v1117_v50  ;;  %v1053_v10 = vmul.f32 %v3789_v39, %v1020_v58  ;;  %v763_v12 = vmul.f32 %v1019_v45, %v3761_v21 }
  0x59   : > { %v923_v49 = vld [vmem:[#allocation2 + $0x141] sm:$0xff]  ;;  %v697_v52 = vadd.f32 %v665_v41, %v568_v40  ;;  %v859_v53 = vmul.f32 %v3767_v24, %v826_v48  ;;  %v793_v54 = vadd.f32 %v761_v36, %v696_v43  ;;  %v1311_v60 = vld [vmem:[#allocation2 + $0x152] sm:$0xff]  ;;  %5947 = vst [vmem:[#allocation8_spill] sm:$0xff] %v3811_v0  ;;  %v1247_v8 = vmul.f32 %v3799_v51, %v1214_v56 }
  0x5a   : > { %v956_v62 = vmul.f32 %v3784_v33, %v923_v49  ;;  %v3814_v4 = vld [vmem:[#allocation2 + $0x158] sm:$0xff]  ;;  %489 = vst.msk [vmem:[#allocation2 + $0x99] sm:$0xff] %vm421_vm1, %v3808_v63  ;;  %3401 = vmatmul.msk.f32.gmra.mxu1 %vm421_vm1, %v396_v22  ;;  %v1344_v27 = vmul.f32 %v3803_v57, %v1311_v60  ;;  %v698_v30 = vadd.f32 %v666_v6, %v569_v5 }
  0x5b   : > { %v794_v61 = vadd.f32 %v762_v47, %v697_v52  ;;  %v890_v2 = vadd.f32 %v858_v44, %v793_v54  ;;  %5948 = vst [vmem:[#allocation9_spill] sm:$0xff] %v3821_v7  ;;  %v1215_v28 = vld [vmem:[#allocation2 + $0x159] sm:$0xff]  ;;  %v860_v31 = vmul.f32 %v1117_v50, %v3767_v24  ;;  %v1151_v22 = vmul.f32 %v3796_v46, %v3814_v4 }
  0x5c   : > { %v3828_v29 = vld [vmem:[#allocation2 + $0x15a] sm:$0xff]  ;;  %508 = vst.msk [vmem:[#allocation2 + $0x181] sm:$0xff] %vm421_vm1, %v3811_v0  ;;  %v957_v34 = vmul.f32 %v1214_v56, %v3784_v33  ;;  %v570_v35 = vmul.f32 %v826_v48, %v3755_v19  ;;  %v795_v37 = vadd.f32 %v763_v12, %v698_v30  ;;  %v667_v40 = vmul.f32 %v923_v49, %v3757_v20 }
  0x5d   : > { %v891_v9 = vadd.f32 %v859_v53, %v794_v61  ;;  %v987_v17 = vadd.f32 %v955_v55, %v890_v2  ;;  %509 = vst.msk [vmem:[#allocation2 + $0x189] sm:$0xff] %vm421_vm1, %v3821_v7  ;;  %v764_v41 = vmul.f32 %v1020_v58, %v3761_v21  ;;  %v1248_v43 = vmul.f32 %v3799_v51, %v1215_v28  ;;  %v3859_v2 = vld [vmem:[%s5846_s2] ss:$0 sm:$0xff] }
  0x5e   : > { %v3839_v38 = vld [vmem:[#allocation2 + $0x168] sm:$0xff]  ;;  %v1345_v44 = vmul.f32 %v3803_v57, %v3828_v29  ;;  %v1054_v45 = vmul.f32 %v1311_v60, %v3789_v39  ;;  %v892_v48 = vadd.f32 %v860_v31, %v795_v37  ;;  %v699_v53 = vadd.f32 %v667_v40, %v570_v35  ;;  %1958 = vst.msk [vmem:[#allocation3 + $0x18] sm:$0xff] %vm1953_vm3, %v3497_v1 }
  0x5f   : > { %v988_v32 = vadd.f32 %v956_v62, %v891_v9  ;;  %v1084_v36 = vadd.f32 %v1052_v59, %v987_v17  ;;  %v1216_v52 = vld [vmem:[#allocation2 + $0x169] sm:$0xff]  ;;  %v861_v54 = vmul.f32 %v3814_v4, %v3767_v24  ;;  %v1152_v49 = vmul.f32 %v3796_v46, %v3839_v38  ;;  %v3853_v59 = vld [vmem:[%s3589_s24 + $0x60] sm:$0xff]  ;;  %1959 = vst.msk [vmem:[#allocation3 + $0x20] sm:$0xff] %vm1953_vm3, %v3497_v1 }
  0x60   : > { %v958_v58 = vmul.f32 %v1215_v28, %v3784_v33  ;;  %v571_v61 = vmul.f32 %v1117_v50, %v3755_v19  ;;  %v796_v5 = vadd.f32 %v764_v41, %v699_v53  ;;  %490 = vst.msk [vmem:[#allocation2 + $0xa9] sm:$0xff] %vm421_vm1, %v3853_v59  ;;  %v668_v6 = vmul.f32 %v1214_v56, %v3757_v20  ;;  %v1313_v17 = vld [vmem:[#allocation2 + $0x16a] sm:$0xff] }
  0x61   : > { %v1085_v42 = vadd.f32 %v1053_v10, %v988_v32  ;;  %v1182_v47 = vadd.f32 %v1150_v3, %v1084_v36  ;;  %v989_v3 = vadd.f32 %v957_v34, %v892_v48  ;;  %v1249_v10 = vmul.f32 %v3799_v51, %v1216_v52  ;;  %v1120_v34 = vld [vmem:[#allocation2 + $0x170] sm:$0xff]  ;;  %v400_v53 = vld [vmem:[%s3589_s24 + $0x68] sm:$0xff]  ;;  %1954 = vst.msk [vmem:[#allocation3] sm:$0xff] %vm1953_vm3, %v3497_v1 }
  0x62   : > { %3402 = vmatmul.msk.f32.gmra.mxu1 %vm421_vm1, %v3771_v25  ;;  %v765_v50 = vmul.f32 %v1311_v60, %v3761_v21  ;;  %v893_v30 = vadd.f32 %v861_v54, %v796_v5  ;;  %v700_v31 = vadd.f32 %v668_v6, %v571_v61  ;;  %v862_v56 = vmul.f32 %v3839_v38, %v3767_v24 }
  0x63   : > { %v1183_v55 = vadd.f32 %v1151_v22, %v1085_v42  ;;  %v1279_v62 = vadd.f32 %v1247_v8, %v1182_v47  ;;  %v1086_v12 = vadd.f32 %v1054_v45, %v989_v3  ;;  %v1055_v22 = vmul.f32 %v3828_v29, %v3789_v39  ;;  %v1217_v47 = vld [vmem:[#allocation2 + $0x171] sm:$0xff]  ;;  %491 = vst.msk [vmem:[#allocation2 + $0xb1] sm:$0xff] %vm421_vm1, %v400_v53  ;;  %v1121_v5 = vld [vmem:[#allocation2 + $0x180] sm:$0xff] }
  0x64   : > { %v990_v36 = vadd.f32 %v958_v58, %v893_v30  ;;  %v797_v37 = vadd.f32 %v765_v50, %v700_v31  ;;  %v1346_v60 = vmul.f32 %v3803_v57, %v1313_v17  ;;  %v669_v40 = vmul.f32 %v1215_v28, %v3757_v20  ;;  %v1314_v3 = vld [vmem:[#allocation2 + $0x172] sm:$0xff]  ;;  %1955 = vst.msk [vmem:[#allocation3 + $0x8] sm:$0xff] %vm1953_vm3, %v3497_v1 }
  0x65   : > { %v1280_v9 = vadd.f32 %v1248_v43, %v1183_v55  ;;  %v1376_v8 = vadd.f32 %v1344_v27, %v1279_v62  ;;  %v1184_v35 = vadd.f32 %v1152_v49, %v1086_v12  ;;  %v572_v27 = vmul.f32 %v3814_v4, %v3755_v19  ;;  %1961 = vst.msk [vmem:[#allocation3 + $0x30] sm:$0xff] %vm1953_vm3, %v3497_v1 }
  0x66   : > { %v1153_v43 = vmul.f32 %v3796_v46, %v1120_v34  ;;  %v1087_v45 = vadd.f32 %v1055_v22, %v990_v36  ;;  %v894_v48 = vadd.f32 %v862_v56, %v797_v37  ;;  %v766_v55 = vmul.f32 %v3828_v29, %v3761_v21  ;;  %v1218_v22 = vld [vmem:[#allocation2 + $0x181] sm:$0xff]  ;;  %1962 = vst.msk [vmem:[#allocation3 + $0x38] sm:$0xff] %vm1953_vm3, %v3497_v1 }
  0x67   : > { %v1377_v32 = vadd.f32 %v1345_v44, %v1280_v9  ;;  %v1412_v25 = vadd.f32 %v3859_v2, %v1376_v8  ;;  %v1281_v42 = vadd.f32 %v1249_v10, %v1184_v35  ;;  %v959_v44 = vmul.f32 %v1216_v52, %v3784_v33  ;;  %1964 = vst.msk [vmem:[#allocation3 + $0x48] sm:$0xff] %vm1953_vm3, %v3497_v1 }
  0x68   : > { %v701_v54 = vadd.f32 %v669_v40, %v572_v27  ;;  %v1250_v28 = vmul.f32 %v3799_v51, %v1217_v47  ;;  %v1056_v49 = vmul.f32 %v1313_v17, %v3789_v39  ;;  %v863_v58 = vmul.f32 %v1120_v34, %v3767_v24  ;;  %v1315_v40 = vld [vmem:[#allocation2 + $0x182] sm:$0xff]  ;;  %1965 = vst.msk [vmem:[#allocation3 + $0x50] sm:$0xff] %vm1953_vm3, %v3497_v1 }
  0x69   : > { %v1444_v41 = vmax.f32 %v1412_v25, 0.0  ;;  %v1413_v4 = vadd.f32 %v3859_v2, %v1377_v32  ;;  %v1378_v61 = vadd.f32 %v1346_v60, %v1281_v42  ;;  %v1185_v62 = vadd.f32 %v1153_v43, %v1087_v45  ;;  %v401_v25 = vld [vmem:[%s3589_s24 + $0x70] sm:$0xff]  ;;  %v1122_v42 = vld [vmem:[#allocation2 + $0x188] sm:$0xff]  ;;  %1967 = vst.msk [vmem:[#allocation3 + $0x60] sm:$0xff] %vm1953_vm3, %v3497_v1 }
  0x6a   : > { %3403 = vmatmul.msk.f32.gmra.mxu1 %vm421_vm1, %v3808_v63  ;;  %v991_v29 = vadd.f32 %v959_v44, %v894_v48  ;;  %v798_v6 = vadd.f32 %v766_v55, %v701_v54  ;;  %v573_v10 = vmul.f32 %v3839_v38, %v3755_v19  ;;  %v670_v50 = vmul.f32 %v1216_v52, %v3757_v20 }
  0x6b   : > { %3383 = vmatmul.msk.f32.vlgmr.msra.gmra.mxu3 %vm421_vm1, %v1444_v41  ;;  %v1445_v9 = vmax.f32 %v1413_v4, 0.0  ;;  %v1347_v63 = vmul.f32 %v3803_v57, %v1314_v3  ;;  %v1154_v8 = vmul.f32 %v3796_v46, %v1121_v5  ;;  %v960_v12 = vmul.f32 %v1217_v47, %v3784_v33  ;;  %492 = vst.msk [vmem:[#allocation2 + $0xc1] sm:$0xff] %vm421_vm1, %v401_v25 }
  0x6c   : > { %v1414_v30 = vadd.f32 %v3859_v2, %v1378_v61  ;;  %v1282_v31 = vadd.f32 %v1250_v28, %v1185_v62  ;;  %v1088_v32 = vadd.f32 %v1056_v49, %v991_v29  ;;  %v895_v56 = vadd.f32 %v863_v58, %v798_v6  ;;  %v402_v49 = vld [vmem:[%s3589_s24 + $0x78] sm:$0xff]  ;;  %v1219_v58 = vld [vmem:[#allocation2 + $0x189] sm:$0xff]  ;;  %1968 = vst.msk [vmem:[#allocation3 + $0x68] sm:$0xff] %vm1953_vm3, %v3497_v1 }
  0x6d   : > { %v702_v38 = vadd.f32 %v670_v50, %v573_v10  ;;  %v767_v52 = vmul.f32 %v1313_v17, %v3761_v21  ;;  %v1251_v35 = vmul.f32 %v3799_v51, %v1218_v22  ;;  %v1057_v36 = vmul.f32 %v1314_v3, %v3789_v39  ;;  %493 = vst.msk [vmem:[#allocation2 + $0xc9] sm:$0xff] %vm421_vm1, %v402_v49  ;;  %v1316_v10 = vld [vmem:[#allocation2 + $0x18a] sm:$0xff]  ;;  %v1123_v50 = vld [vmem:[#allocation2 + $0x198] sm:$0xff] }
  0x6e   : > { %v1446_v37 = vmax.f32 %v1414_v30, 0.0  ;;  %v1379_v60 = vadd.f32 %v1347_v63, %v1282_v31  ;;  %v1186_v27 = vadd.f32 %v1154_v8, %v1088_v32  ;;  %v992_v41 = vadd.f32 %v960_v12, %v895_v56  ;;  %v1220_v56 = vld [vmem:[#allocation2 + $0x199] sm:$0xff]  ;;  %1970 = vst.msk [vmem:[#allocation3 + $0x78] sm:$0xff] %vm1953_vm3, %v3497_v1 }
  0x6f   : > { %v799_v43 = vadd.f32 %v767_v52, %v702_v38  ;;  %v864_v44 = vmul.f32 %v1121_v5, %v3767_v24  ;;  %v574_v45 = vmul.f32 %v1120_v34, %v3755_v19  ;;  %v671_v17 = vmul.f32 %v1217_v47, %v3757_v20  ;;  %1971 = vst.msk [vmem:[#allocation3 + $0x80] sm:$0xff] %vm1953_vm3, %v3497_v1 }
  0x70   : > { %v1155_v48 = vmul.f32 %v3796_v46, %v1122_v42  ;;  %v1415_v54 = vadd.f32 %v3859_v2, %v1379_v60  ;;  %v1283_v55 = vadd.f32 %v1251_v35, %v1186_v27  ;;  %v1089_v4 = vadd.f32 %v1057_v36, %v992_v41  ;;  %v1317_v27 = vld [vmem:[#allocation2 + $0x19a] sm:$0xff]  ;;  %1973 = vst.msk [vmem:[#allocation3 + $0x90] sm:$0xff] %vm1953_vm3, %v3497_v1 }
  0x71   : > { %v961_v28 = vmul.f32 %v1218_v22, %v3784_v33  ;;  %v896_v61 = vadd.f32 %v864_v44, %v799_v43  ;;  %v703_v34 = vadd.f32 %v671_v17, %v574_v45  ;;  %v768_v47 = vmul.f32 %v1314_v3, %v3761_v21  ;;  %1974 = vst.msk [vmem:[#allocation3 + $0x98] sm:$0xff] %vm1953_vm3, %v3497_v1  ;;  %v1221_v17 = vld [vmem:[#allocation2 + $0x1a1] sm:$0xff] }
  0x72   : > { %3404 = vmatmul.msk.f32.gmra.mxu1 %vm421_vm1, %v3853_v59  ;;  %v1348_v59 = vmul.f32 %v3803_v57, %v1315_v40  ;;  %v1447_v62 = vmax.f32 %v1415_v54, 0.0  ;;  %v1252_v5 = vmul.f32 %v3799_v51, %v1219_v58  ;;  %v1058_v6 = vmul.f32 %v1315_v40, %v3789_v39  ;;  %v1124_v40 = vld [vmem:[#allocation2 + $0x1a0] sm:$0xff]  ;;  %1976 = vst.msk [vmem:[#allocation3 + $0xa8] sm:$0xff] %vm1953_vm3, %v3497_v1 }
  0x73   : > { %3384 = vmatmul.msk.f32.gmra.mxu3 %vm421_vm1, %v1445_v9  ;;  %v1187_v9 = vadd.f32 %v1155_v48, %v1089_v4  ;;  %v993_v3 = vadd.f32 %v961_v28, %v896_v61  ;;  %v865_v63 = vmul.f32 %v1122_v42, %v3767_v24  ;;  %v1349_v12 = vmul.f32 %v3803_v57, %v1316_v10  ;;  %v1318_v28 = vld [vmem:[#allocation2 + $0x1a2] sm:$0xff] }
  0x74   : > { %v1380_v29 = vadd.f32 %v1348_v59, %v1283_v55  ;;  %v1156_v30 = vmul.f32 %v3796_v46, %v1123_v50  ;;  %v962_v31 = vmul.f32 %v1219_v58, %v3784_v33  ;;  %v1253_v52 = vmul.f32 %v3799_v51, %v1220_v56  ;;  %1977 = vst.msk [vmem:[#allocation3 + $0xb0] sm:$0xff] %vm1953_vm3, %v3497_v1  ;;  %v3972_v59 = vld [vmem:[%s5850_s6] ss:$0 sm:$0xff] }
  0x75   : > { %v1284_v32 = vadd.f32 %v1252_v5, %v1187_v9  ;;  %v1090_v22 = vadd.f32 %v1058_v6, %v993_v3  ;;  %v1059_v35 = vmul.f32 %v1316_v10, %v3789_v39  ;;  %v1350_v41 = vmul.f32 %v3803_v57, %v1317_v27  ;;  %1979 = vst.msk [vmem:[#allocation3 + $0xc0] sm:$0xff] %vm1953_vm3, %v3497_v1  ;;  %v403_v58 = vld [vmem:[%s3589_s24 + $0x80] sm:$0xff]  ;;  %v4005_v10 = vld [vmem:[%s3589_s24 + $0x88] sm:$0xff] }
  0x76   : > { %v1416_v8 = vadd.f32 %v3859_v2, %v1380_v29  ;;  %v1157_v42 = vmul.f32 %v3796_v46, %v1124_v40  ;;  %1980 = vst.msk [vmem:[#allocation3 + $0xc8] sm:$0xff] %vm1953_vm3, %v3497_v1  ;;  %v1254_v4 = vmul.f32 %v3799_v51, %v1221_v17  ;;  %v4012_v3 = vld [vmem:[%s5851_s7] sm:$0xff] }
  0x77   : > { %v1188_v60 = vadd.f32 %v1156_v30, %v1090_v22  ;;  %1982 = vst.msk [vmem:[#allocation3 + $0xd8] sm:$0xff] %vm1953_vm3, %v3497_v1  ;;  %v2042_v30 = vld [vmem:[#allocation3] sm:$0xff]  ;;  %v607_v22 = vld [vmem:[#allocation2 + $0x1] sm:$0xff]  ;;  %v4049_v40 = vperm.slane %v4012_v3, 2  ;;  %v4059_v17 = vld [vmem:[#allocation2 + $0x19] sm:$0xff] }
  0x78   : > { %v1448_v36 = vmax.f32 %v1416_v8, 0.0  ;;  %1983 = vst.msk [vmem:[#allocation3 + $0xe0] sm:$0xff] %vm1953_vm3, %v3497_v1  ;;  %v4029_v8 = vperm.slane %v4012_v3, 1 }
  0x79   : > { %v1285_v44 = vadd.f32 %v1253_v52, %v1188_v60  ;;  %1985 = vst.msk [vmem:[#allocation3 + $0xf0] sm:$0xff] %vm1953_vm3, %v3497_v1  ;;  %v640_v52 = vmul.f32 %v3757_v20, %v607_v22  ;;  %v4044_v60 = vld [vmem:[%s3589_s24 + $0x90] sm:$0xff]  ;;  %v4093_v22 = vld [vmem:[%s3589_s24 + $0x98] sm:$0xff] }
  0x7a   : > { %3405 = vmatmul.msk.f32.gmra.mxu1 %vm421_vm1, %v400_v53  ;;  %v800_v53 = vadd.f32 %v768_v47, %v703_v34  ;;  %1986 = vst.msk [vmem:[#allocation3 + $0xf8] sm:$0xff] %vm1953_vm3, %v3497_v1 }
  0x7b   : > { %3385 = vmatmul.msk.f32.gmra.mxu3 %vm421_vm1, %v1446_v37  ;;  %v1381_v37 = vadd.f32 %v1349_v12, %v1284_v32  ;;  %v1382_v54 = vadd.f32 %v1350_v41, %v1285_v44  ;;  %1988 = vst.msk [vmem:[#allocation3 + $0x108] sm:$0xff] %vm1953_vm3, %v3497_v1  ;;  %v510_v12 = vld [vmem:[#allocation2] sm:$0xff] }
  0x7c   : > { %v897_v38 = vadd.f32 %v865_v63, %v800_v53  ;;  %1989 = vst.msk [vmem:[#allocation3 + $0x110] sm:$0xff] %vm1953_vm3, %v3497_v1  ;;  %v4026_v63 = vperm.slane %v4012_v3, 0  ;;  %v543_v32 = vmul.f32 %v3755_v19, %v510_v12 }
  0x7d   : > { %v1417_v43 = vadd.f32 %v3859_v2, %v1381_v37  ;;  %v1418_v34 = vadd.f32 %v3859_v2, %v1382_v54  ;;  %1991 = vst.msk [vmem:[#allocation3 + $0x120] sm:$0xff] %vm1953_vm3, %v3497_v1 }
  0x7e   : > { %1992 = vst.msk [vmem:[#allocation3 + $0x128] sm:$0xff] %vm1953_vm3, %v3497_v1  ;;  %v2075_v27 = vmul.f32 %v4026_v63, %v2042_v30  ;;  %v672_v41 = vadd.f32 %v640_v52, %v543_v32  ;;  %v4097_v52 = vperm.slane %v4012_v3, 4 }
  0x7f   : > { %v1449_v48 = vmax.f32 %v1417_v43, 0.0  ;;  %v1450_v5 = vmax.f32 %v1418_v34, 0.0  ;;  %1994 = vst.msk [vmem:[#allocation3 + $0x138] sm:$0xff] %vm1953_vm3, %v3497_v1  ;;  %v2236_v43 = vld [vmem:[#allocation3 + $0x2] sm:$0xff] }
  0x80   : > { %1995 = vst.msk [vmem:[#allocation3 + $0x140] sm:$0xff] %vm1953_vm3, %v3497_v1 }
  0x81   : > { %1997 = vst.msk [vmem:[#allocation3 + $0x150] sm:$0xff] %vm1953_vm3, %v3497_v1 }
  0x82   : > { %3406 = vmatmul.msk.f32.gmra.mxu1 %vm421_vm1, %v401_v25  ;;  %v994_v25 = vadd.f32 %v962_v31, %v897_v38  ;;  %1998 = vst.msk [vmem:[#allocation3 + $0x158] sm:$0xff] %vm1953_vm3, %v3497_v1  ;;  %v2139_v31 = vld [vmem:[#allocation3 + $0x1] sm:$0xff] }
  0x83   : > { %3386 = vmatmul.msk.f32.gmra.mxu3 %vm421_vm1, %v1447_v62  ;;  %v1351_v62 = vmul.f32 %v3803_v57, %v1318_v28  ;;  %2000 = vst.msk [vmem:[#allocation3 + $0x168] sm:$0xff] %vm1953_vm3, %v3497_v1 }
  0x84   : > { %v1091_v45 = vadd.f32 %v1059_v35, %v994_v25  ;;  %2001 = vst.msk [vmem:[#allocation3 + $0x170] sm:$0xff] %vm1953_vm3, %v3497_v1  ;;  %v704_v35 = vld [vmem:[#allocation2 + $0x2] sm:$0xff]  ;;  %v2172_v25 = vmul.f32 %v4029_v8, %v2139_v31 }
  0x85   : > { %2003 = vst.msk [vmem:[#allocation3 + $0x180] sm:$0xff] %vm1953_vm3, %v3497_v1 }
  0x86   : > { %v1189_v55 = vadd.f32 %v1157_v42, %v1091_v45  ;;  %2004 = vst.msk [vmem:[#allocation3 + $0x188] sm:$0xff] %vm1953_vm3, %v3497_v1  ;;  %v4051_v42 = vld [vmem:[#allocation2 + $0x18] sm:$0xff]  ;;  %v2204_v54 = vadd.f32 %v2172_v25, %v2075_v27  ;;  %v4101_v27 = vld [vmem:[#allocation2 + $0x20] sm:$0xff] }
  0x87   : > { %2006 = vst.msk [vmem:[#allocation3 + $0x198] sm:$0xff] %vm1953_vm3, %v3497_v1  ;;  %v834_v44 = vmul.f32 %v3767_v24, %v4051_v42 }
  0x88   : > { %v1286_v47 = vadd.f32 %v1254_v4, %v1189_v55  ;;  %2007 = vst.msk [vmem:[#allocation3 + $0x1a0] sm:$0xff] %vm1953_vm3, %v3497_v1  ;;  %v2269_v55 = vmul.f32 %v4049_v40, %v2236_v43  ;;  %v4071_v4 = vperm.slane %v4012_v3, 3 }
  0x89   : > { %494 = vst.msk [vmem:[#allocation2 + $0xd9] sm:$0xff] %vm421_vm1, %v403_v58 }
  0x8a   : > { %3407 = vmatmul.msk.f32.gmra.mxu1 %vm421_vm1, %v402_v49  ;;  %v1383_v6 = vadd.f32 %v1351_v62, %v1286_v47  ;;  %1960 = vst.msk [vmem:[#allocation3 + $0x28] sm:$0x3] %vm1956_vm4, %v3497_v1 }
  0x8b   : > { %3387 = vmatmul.msk.f32.gmra.mxu3 %vm421_vm1, %v1448_v36  ;;  %v737_v36 = vmul.f32 %v3761_v21, %v704_v35  ;;  %1957 = vst.msk [vmem:[#allocation3 + $0x10] sm:$0x3] %vm1956_vm4, %v3497_v1 }
  0x8c   : > { %v1419_v50 = vadd.f32 %v3859_v2, %v1383_v6  ;;  %1963 = vst.msk [vmem:[#allocation3 + $0x40] sm:$0x3] %vm1956_vm4, %v3497_v1  ;;  %v4083_v6 = vld [vmem:[#allocation2 + $0x30] sm:$0xff] }
  0x8d   : > { %v769_v45 = vadd.f32 %v737_v36, %v672_v41  ;;  %1966 = vst.msk [vmem:[#allocation3 + $0x58] sm:$0x3] %vm1956_vm4, %v3497_v1  ;;  %v1126_v12 = vmul.f32 %v3796_v46, %v4083_v6  ;;  %v4099_v36 = vld [vmem:[#allocation2 + $0x31] sm:$0xff] }
  0x8e   : > { %v1823_v49 = vpop.f32.mrf.mxu1  ;;  %v1451_v56 = vmax.f32 %v1419_v50, 0.0  ;;  %1969 = vst.msk [vmem:[#allocation3 + $0x70] sm:$0x3] %vm1956_vm4, %v3497_v1  ;;  %v705_v50 = vld [vmem:[#allocation2 + $0xa] sm:$0xff]  ;;  %v1223_v25 = vmul.f32 %v3799_v51, %v4099_v36 }
  0x8f   : > { %v1824_v61 = vadd.f32 %v3972_v59, %v1823_v49  ;;  %v866_v28 = vadd.f32 %v834_v44, %v769_v45  ;;  %v4073_v49 = vld [vmem:[#allocation2 + $0x1a] sm:$0xff]  ;;  %1972 = vst.msk [vmem:[#allocation3 + $0x88] sm:$0x3] %vm1956_vm4, %v3497_v1  ;;  %v738_v31 = vmul.f32 %v3761_v21, %v705_v50  ;;  %v835_v44 = vmul.f32 %v3767_v24, %v4101_v27 }
  0x90   : > { %v1028_v47 = vmul.f32 %v3789_v39, %v4073_v49  ;;  %1975 = vst.msk [vmem:[#allocation3 + $0xa0] sm:$0x3] %vm1956_vm4, %v3497_v1  ;;  %v4117_v45 = vld [vmem:[%s5853_s9] sm:$0xff] }
  0x91   : > { %v1919_v29 = vmax.f32 %v1824_v61, 0.0  ;;  %v608_v61 = vld [vmem:[#allocation2 + $0x9] sm:$0xff]  ;;  %1978 = vst.msk [vmem:[#allocation3 + $0xb8] sm:$0x3] %vm1956_vm4, %v3497_v1  ;;  %3100 = vmatpush.msra.mxu2 %v4117_v45  ;;  %3462 = vmatpush.msra.mxu3 %v4117_v45 }
  0x92   : > { %3408 = vmatmul.msk.f32.gmra.mxu1 %vm421_vm1, %v403_v58  ;;  %v511_v58 = vld [vmem:[#allocation2 + $0x8] sm:$0xff]  ;;  %1981 = vst.msk [vmem:[#allocation3 + $0xd0] sm:$0x3] %vm1956_vm4, %v3497_v1 }
  0x93   : > { %3388 = vmatmul.msk.f32.gmra.mxu3 %vm421_vm1, %v1449_v48  ;;  %2010 = vst.msk [vmem:[#allocation3 + $0x19] sm:$0xff] %vm1953_vm3, %v1919_v29  ;;  %v931_v48 = vmul.f32 %v3784_v33, %v4059_v17  ;;  %v544_v62 = vmul.f32 %v3755_v19, %v511_v58  ;;  %v641_v29 = vmul.f32 %v3757_v20, %v608_v61  ;;  %v4132_v61 = vperm.slane %v4012_v3, 6 }
  0x94   : > { %1984 = vst.msk [vmem:[#allocation3 + $0xe8] sm:$0x3] %vm1956_vm4, %v3497_v1 }
  0x95   : > { %v673_v30 = vadd.f32 %v641_v29, %v544_v62  ;;  %v2237_v62 = vld [vmem:[#allocation3 + $0xa] sm:$0xff]  ;;  %1987 = vst.msk [vmem:[#allocation3 + $0x100] sm:$0x3] %vm1956_vm4, %v3497_v1 }
  0x96   : > { %v1826_v9 = vpop.f32.mrf.mxu1  ;;  %v4137_v29 = vld [vmem:[#allocation2 + $0x21] sm:$0xff]  ;;  %1990 = vst.msk [vmem:[#allocation3 + $0x118] sm:$0x3] %vm1956_vm4, %v3497_v1 }
  0x97   : > { %v1827_v53 = vadd.f32 %v3972_v59, %v1826_v9  ;;  %v2043_v9 = vld [vmem:[#allocation3 + $0x8] sm:$0xff]  ;;  %v770_v43 = vadd.f32 %v738_v31, %v673_v30  ;;  %v4144_v30 = vld [vmem:[#allocation2 + $0x22] sm:$0xff]  ;;  %v932_v0 = vmul.f32 %v3784_v33, %v4137_v29  ;;  %1993 = vst.msk [vmem:[#allocation3 + $0x130] sm:$0x3] %vm1956_vm4, %v3497_v1  ;;  %v643_v45 = vmul.f32 %v4137_v29, %v3757_v20 }
  0x98   : > { %v2076_v41 = vmul.f32 %v4026_v63, %v2043_v9  ;;  %1996 = vst.msk [vmem:[#allocation3 + $0x148] sm:$0x3] %vm1956_vm4, %v3497_v1 }
  0x99   : > { %v1920_v38 = vmax.f32 %v1827_v53, 0.0  ;;  %v867_v7 = vadd.f32 %v835_v44, %v770_v43  ;;  %1999 = vst.msk [vmem:[#allocation3 + $0x160] sm:$0x3] %vm1956_vm4, %v3497_v1 }
  0x9a   : > { %3409 = vmatmul.msk.f32.gmra.mxu1 %vm421_vm1, %v4005_v10  ;;  %v2333_v34 = vld [vmem:[#allocation3 + $0x18] sm:$0xff]  ;;  %2002 = vst.msk [vmem:[#allocation3 + $0x178] sm:$0x3] %vm1956_vm4, %v3497_v1 }
  0x9b   : > { %3389 = vmatmul.msk.f32.gmra.mxu3 %vm421_vm1, %v1450_v5  ;;  %2011 = vst.msk [vmem:[#allocation3 + $0x21] sm:$0xff] %vm1953_vm3, %v1920_v38  ;;  %v963_v5 = vadd.f32 %v931_v48, %v866_v28  ;;  %v2430_v53 = vld [vmem:[#allocation3 + $0x19] sm:$0xff]  ;;  %v2366_v38 = vmul.f32 %v4071_v4, %v2333_v34  ;;  %v2077_v28 = vmul.f32 %v2333_v34, %v4026_v63 }
  0x9c   : > { %v2174_v58 = vmul.f32 %v2430_v53, %v4029_v8  ;;  %v2463_v50 = vmul.f32 %v4097_v52, %v2430_v53  ;;  %v1029_v53 = vmul.f32 %v3789_v39, %v4144_v30  ;;  %v964_v43 = vadd.f32 %v932_v0, %v867_v7  ;;  %2005 = vst.msk [vmem:[#allocation3 + $0x190] sm:$0x3] %vm1956_vm4, %v3497_v1 }
  0x9d   : > { %v1060_v35 = vadd.f32 %v1028_v47, %v963_v5  ;;  %v739_v0 = vmul.f32 %v4073_v49, %v3761_v21  ;;  %v4186_v49 = vld [vmem:[#allocation2 + $0x3a] sm:$0xff]  ;;  %2008 = vst.msk [vmem:[#allocation3 + $0x1a8] sm:$0x3] %vm1956_vm4, %v3497_v1 }
  0x9e   : > { %v4041_v37 = vpop.f32.mrf.mxu1  ;;  %5950 = vst [vmem:[#allocation11_spill] sm:$0xff] %v4186_v49 }
  0x9f   : > { %v1158_v48 = vadd.f32 %v1126_v12, %v1060_v35  ;;  %v1830_v5 = vadd.f32 %v3972_v59, %v4041_v37  ;;  %v2270_v35 = vmul.f32 %v4049_v40, %v2237_v62  ;;  %495 = vst.msk [vmem:[#allocation2 + $0xe1] sm:$0xff] %vm421_vm1, %v4005_v10 }
  0xa0   : > { %496 = vst.msk [vmem:[#allocation2 + $0xf1] sm:$0xff] %vm421_vm1, %v4044_v60 }
  0xa1   : > { %v1255_v12 = vadd.f32 %v1223_v25, %v1158_v48  ;;  %v545_v25 = vmul.f32 %v4051_v42, %v3755_v19  ;;  %v642_v48 = vmul.f32 %v4059_v17, %v3757_v20  ;;  %497 = vst.msk [vmem:[#allocation2 + $0xf9] sm:$0xff] %vm421_vm1, %v4093_v22 }
  0xa2   : > { %3410 = vmatmul.msk.f32.gmra.mxu1 %vm421_vm1, %v4044_v60  ;;  %v2431_v13 = vld [vmem:[#allocation3 + $0x21] sm:$0xff]  ;;  %v4216_v60 = vld [vmem:[#allocation2 + $0x48] sm:$0xff] }
  0xa3   : > { %3390 = vmatmul.msk.f32.gmra.mxu3 %vm421_vm1, %v1451_v56  ;;  %v2301_v56 = vadd.f32 %v2269_v55, %v2204_v54  ;;  %v4119_v54 = vld [vmem:[#allocation2 + $0x32] sm:$0xff]  ;;  %v674_v23 = vadd.f32 %v642_v48, %v545_v25 }
  0xa4   : > { %v2140_v55 = vld [vmem:[#allocation3 + $0x9] sm:$0xff]  ;;  %v1320_v47 = vmul.f32 %v3803_v57, %v4119_v54  ;;  %v1030_v10 = vmul.f32 %v4119_v54, %v3789_v39 }
  0xa5   : > { %v2173_v34 = vmul.f32 %v4029_v8, %v2140_v55  ;;  %v2398_v9 = vadd.f32 %v2366_v38, %v2301_v56  ;;  %v2334_v55 = vld [vmem:[#allocation3 + $0x20] sm:$0xff]  ;;  %v4155_v56 = vld [vmem:[#allocation2 + $0x38] sm:$0xff]  ;;  %v4157_v38 = vadd.f32 %v2174_v58, %v2077_v28  ;;  %v1921_v28 = vmax.f32 %v1830_v5, 0.0 }
  0xa6   : > { %v1832_v32 = vpop.f32.mrf.mxu1  ;;  %v1352_v37 = vadd.f32 %v1320_v47, %v1255_v12  ;;  %v1127_v44 = vmul.f32 %v3796_v46, %v4155_v56  ;;  %v407_v47 = vld [vmem:[%s3589_s24 + $0xa0] sm:$0xff]  ;;  %v2367_v62 = vmul.f32 %v4071_v4, %v2334_v55  ;;  %v2078_v1 = vmul.f32 %v2334_v55, %v4026_v63 }
  0xa7   : > { %v2205_v31 = vadd.f32 %v2173_v34, %v2076_v41  ;;  %v1833_v41 = vadd.f32 %v3972_v59, %v1832_v32  ;;  %v2527_v34 = vld [vmem:[#allocation3 + $0x1a] sm:$0xff]  ;;  %v4173_v12 = vld [vmem:[#allocation2 + $0x39] sm:$0xff]  ;;  %v1061_v32 = vadd.f32 %v1029_v53, %v964_v43  ;;  %2012 = vst.msk [vmem:[#allocation3 + $0x31] sm:$0xff] %vm1953_vm3, %v1921_v28  ;;  %v546_v55 = vmul.f32 %v4101_v27, %v3755_v19 }
  0xa8   : > { %v1388_v42 = vadd.f32 %v3859_v2, %v1352_v37  ;;  %5949 = vst [vmem:[#allocation10_spill] sm:$0xff] %v4173_v12  ;;  %v1224_v5 = vmul.f32 %v3799_v51, %v4173_v12  ;;  %v2495_v37 = vadd.f32 %v2463_v50, %v2398_v9  ;;  %v771_v9 = vadd.f32 %v739_v0, %v674_v23 }
  0xa9   : > { %v2302_v17 = vadd.f32 %v2270_v35, %v2205_v31  ;;  %v1922_v31 = vmax.f32 %v1833_v41, 0.0  ;;  %v1159_v53 = vadd.f32 %v1127_v44, %v1061_v32  ;;  %v933_v50 = vmul.f32 %v4099_v36, %v3784_v33  ;;  %498 = vst.msk [vmem:[#allocation2 + $0x109] sm:$0xff] %vm421_vm1, %v407_v47 }
  0xaa   : > { %3411 = vmatmul.msk.f32.gmra.mxu1 %vm421_vm1, %v4093_v22  ;;  %v1420_v26 = vmax.f32 %v1388_v42, 0.0  ;;  %v2175_v44 = vmul.f32 %v2431_v13, %v4029_v8  ;;  %v2464_v28 = vmul.f32 %v4097_v52, %v2431_v13  ;;  %v1128_v27 = vmul.f32 %v3796_v46, %v4216_v60  ;;  %v4229_v22 = vld [vmem:[#allocation2 + $0x49] sm:$0xff] }
  0xab   : > { %3416 = vmatmul.msk.f32.vlgmr.msrb.gmra.mxu3 %vm421_vm1, %v3731_v14  ;;  %v4129_v14 = vperm.slane %v4012_v3, 5  ;;  %v2399_v41 = vadd.f32 %v2367_v62, %v2302_v17  ;;  %v1256_v43 = vadd.f32 %v1224_v5, %v1159_v53  ;;  %2013 = vst.msk [vmem:[#allocation3 + $0x39] sm:$0xff] %vm1953_vm3, %v1922_v31  ;;  %v2271_v62 = vmul.f32 %v2527_v34, %v4049_v40 }
  0xac   : > { %3359 = vmatmul.msk.f32.vlgmr.msra.gmra.mxu0 %vm421_vm1, %v1420_v26  ;;  %v2528_v26 = vld [vmem:[#allocation3 + $0x22] sm:$0xff]  ;;  %v675_v29 = vadd.f32 %v643_v45, %v546_v55  ;;  %v740_v32 = vmul.f32 %v4144_v30, %v3761_v21  ;;  %v1225_v31 = vmul.f32 %v3799_v51, %v4229_v22  ;;  %v2207_v53 = vadd.f32 %v2175_v44, %v2078_v1 }
  0xad   : > { %v2560_v35 = vmul.f32 %v4129_v14, %v2527_v34  ;;  %v2496_v34 = vadd.f32 %v2464_v28, %v2399_v41  ;;  %v2561_v5 = vmul.f32 %v4129_v14, %v2528_v26  ;;  %v837_v44 = vmul.f32 %v4155_v56, %v3767_v24 }
  0xae   : > { %v1835_v58 = vpop.f32.mrf.mxu1 }
  0xaf   : > { %v1836_v7 = vadd.f32 %v3972_v59, %v1835_v58  ;;  %v836_v58 = vmul.f32 %v4083_v6, %v3767_v24  ;;  %v2592_v48 = vadd.f32 %v2560_v35, %v2495_v37  ;;  %v4239_v35 = vld [vmem:[#allocation2 + $0x4a] sm:$0xff] }
  0xb0   : > { %v1322_v41 = vmul.f32 %v3803_v57, %v4239_v35 }
  0xb1   : > { %v1923_v25 = vmax.f32 %v1836_v7, 0.0  ;;  %v868_v23 = vadd.f32 %v836_v58, %v771_v9  ;;  %v408_v7 = vld [vmem:[%s3589_s24 + $0xa8] sm:$0xff]  ;;  %v4235_v58 = vperm.slane %v4012_v3, 7  ;;  %v2303_v3 = vadd.f32 %v2271_v62, %v4157_v38 }
  0xb2   : > { %3412 = vmatmul.msk.f32.gmra.mxu1 %vm421_vm1, %v407_v47  ;;  %499 = vst.msk [vmem:[#allocation2 + $0x111] sm:$0xff] %vm421_vm1, %v408_v7  ;;  %v2272_v9 = vmul.f32 %v2528_v26, %v4049_v40  ;;  %v2593_v38 = vadd.f32 %v2561_v5, %v2496_v34  ;;  %v4266_v55 = vld [vmem:[#allocation3 + $0x32] sm:$0xff] }
  0xb3   : > { %3417 = vmatmul.msk.f32.gmra.mxu3 %vm421_vm1, %v3734_v15  ;;  %v1321_v15 = vmul.f32 %v3803_v57, %v4186_v49  ;;  %v965_v17 = vadd.f32 %v933_v50, %v868_v23  ;;  %2014 = vst.msk [vmem:[#allocation3 + $0x49] sm:$0xff] %vm1953_vm3, %v1923_v25  ;;  %v4250_v50 = vld [vmem:[#allocation3 + $0x30] sm:$0xff]  ;;  %v4268_v45 = vld [vmem:[#allocation3 + $0x38] sm:$0xff]  ;;  %v2562_v5 = vmul.f32 %v4266_v55, %v4129_v14 }
  0xb4   : > { %v4252_v25 = vld [vmem:[#allocation3 + $0x31] sm:$0xff]  ;;  %v2658_v23 = vmul.f32 %v4132_v61, %v4250_v50  ;;  %v2368_v26 = vmul.f32 %v4250_v50, %v4071_v4  ;;  %v4270_v28 = vld [vmem:[#allocation3 + $0x39] sm:$0xff]  ;;  %v2304_v62 = vadd.f32 %v2272_v9, %v2207_v53  ;;  %v4289_v53 = vld [vmem:[%s5852_s8] ss:$0 sm:$0xff] }
  0xb5   : > { %v1353_v42 = vadd.f32 %v1321_v15, %v1256_v43  ;;  %v1062_v30 = vadd.f32 %v1030_v10, %v965_v17  ;;  %v772_v43 = vadd.f32 %v740_v32, %v675_v29  ;;  %v2755_v10 = vmul.f32 %v4235_v58, %v4252_v25 }
  0xb6   : > { %v1838_v0 = vpop.f32.mrf.mxu1  ;;  %v2465_v29 = vmul.f32 %v4252_v25, %v4097_v52  ;;  %v2400_v34 = vadd.f32 %v2368_v26, %v2303_v3  ;;  %v2756_v9 = vmul.f32 %v4235_v58, %v4270_v28 }
  0xb7   : > { %v1839_v13 = vadd.f32 %v3972_v59, %v1838_v0  ;;  %v1389_v37 = vadd.f32 %v3859_v2, %v1353_v42  ;;  %v1160_v1 = vadd.f32 %v1128_v27, %v1062_v30  ;;  %v934_v0 = vmul.f32 %v4173_v12, %v3784_v33 }
  0xb8   : > { %v2659_v27 = vmul.f32 %v4132_v61, %v4268_v45  ;;  %v2497_v3 = vadd.f32 %v2465_v29, %v2400_v34  ;;  %v2466_v29 = vmul.f32 %v4270_v28, %v4097_v52  ;;  %v4313_v34 = vld [vmem:[#allocation2 + $0x50] sm:$0xff] }
  0xb9   : > { %v1924_v15 = vmax.f32 %v1839_v13, 0.0  ;;  %v1421_v47 = vmax.f32 %v1389_v37, 0.0  ;;  %v1257_v42 = vadd.f32 %v1225_v31, %v1160_v1  ;;  %v4280_v13 = vld [vmem:[#allocation3 + $0x3a] sm:$0xff] }
  0xba   : > { %3413 = vmatmul.msk.f32.gmra.mxu1 %vm421_vm1, %v408_v7  ;;  %v2690_v7 = vadd.f32 %v2658_v23, %v2592_v48  ;;  %v4284_v37 = vld [vmem:[#allocation3 + $0x48] sm:$0xff]  ;;  %v869_v48 = vadd.f32 %v837_v44, %v772_v43  ;;  %v2369_v44 = vmul.f32 %v4268_v45, %v4071_v4 }
  0xbb   : > { %3418 = vmatmul.msk.f32.gmra.mxu3 %vm421_vm1, %v3739_v16  ;;  %v4246_v16 = vld [vmem:[%s5851_s7 + $0x8] ss:$0 sm:$0xff]  ;;  %2015 = vst.msk [vmem:[#allocation3 + $0x51] sm:$0xff] %vm1953_vm3, %v1924_v15  ;;  %3360 = vmatmul.msk.f32.gmra.mxu0 %vm421_vm1, %v1421_v47  ;;  %v1354_v30 = vadd.f32 %v1322_v41, %v1257_v42  ;;  %v2691_v47 = vadd.f32 %v2659_v27, %v2593_v38  ;;  %v4298_v41 = vld [vmem:[#allocation3 + $0x49] sm:$0xff] }
  0xbc   : > { %v2852_v17 = vmul.f32 %v4246_v16, %v4266_v55  ;;  %v2787_v31 = vadd.f32 %v2755_v10, %v2690_v7  ;;  %v2660_v1 = vmul.f32 %v4132_v61, %v4284_v37  ;;  %v2594_v10 = vadd.f32 %v2562_v5, %v2497_v3  ;;  %v4328_v3 = vld [vmem:[#allocation2 + $0x51] sm:$0xff] }
  0xbd   : > { %v1390_v43 = vadd.f32 %v3859_v2, %v1354_v30  ;;  %v2788_v38 = vadd.f32 %v2756_v9, %v2691_v47  ;;  %v2401_v27 = vadd.f32 %v2369_v44, %v2304_v62  ;;  %v2563_v5 = vmul.f32 %v4280_v13, %v4129_v14 }
  0xbe   : > { %v1841_v32 = vpop.f32.mrf.mxu1  ;;  %v2884_v23 = vadd.f32 %v2852_v17, %v2787_v31  ;;  %v1031_v62 = vmul.f32 %v4186_v49, %v3789_v39 }
  0xbf   : > { %v1842_v15 = vadd.f32 %v3972_v59, %v1841_v32  ;;  %v1422_v7 = vmax.f32 %v1390_v43, 0.0  ;;  %v2498_v47 = vadd.f32 %v2466_v29, %v2401_v27  ;;  %v5954_v29 = vld [vmem:[#allocation5_spill] sm:$0xff] }
  0xc0   : > { %v2920_v17 = vadd.f32 %v4289_v53, %v2884_v23  ;;  %v966_v23 = vadd.f32 %v934_v0, %v869_v48  ;;  %v1226_v0 = vmul.f32 %v3799_v51, %v4328_v3  ;;  %v2079_v48 = vmul.f32 %v4250_v50, %v4026_v63 }
  0xc1   : > { %v1925_v26 = vmax.f32 %v1842_v15, 0.0  ;;  %v2692_v15 = vadd.f32 %v2660_v1, %v2594_v10 }
  0xc2   : > { %3414 = vmatmul.msk.f32.gmra.mxu1 %vm421_vm1, %v3721_v11  ;;  %v4307_v42 = vld [vmem:[#allocation3 + $0x4a] sm:$0xff]  ;;  %v2757_v11 = vmul.f32 %v4235_v58, %v4298_v41  ;;  %v2952_v43 = vmax.f32 %v2920_v17, 0.0  ;;  %v1063_v27 = vadd.f32 %v1031_v62, %v966_v23 }
  0xc3   : > { %3419 = vmatmul.msk.f32.gmra.mxu3 %vm421_vm1, %v3747_v18  ;;  %v2853_v18 = vmul.f32 %v4246_v16, %v4280_v13  ;;  %v4311_v32 = vld [vmem:[#allocation3 + $0x50] sm:$0xff]  ;;  %2016 = vst.msk [vmem:[#allocation3 + $0x61] sm:$0xff] %vm1953_vm3, %v1925_v26  ;;  %3361 = vmatmul.msk.f32.gmra.mxu0 %vm421_vm1, %v1422_v7  ;;  %v2854_v44 = vmul.f32 %v4246_v16, %v4307_v42 }
  0xc4   : > { %5951 = vst [vmem:[#allocation12_spill] sm:$0xff] %v4311_v32  ;;  %v4321_v30 = vld [vmem:[#allocation3 + $0x51] sm:$0xff]  ;;  %v2661_v9 = vmul.f32 %v4132_v61, %v4311_v32  ;;  %v1129_v26 = vmul.f32 %v3796_v46, %v4313_v34  ;;  %v2789_v49 = vadd.f32 %v2757_v11, %v2692_v15  ;;  %3424 = vmatmul.msk.f32.vlgmr.msra.gmra.mxu2 %vm1953_vm3, %v2952_v43 }
  0xc5   : > { %5952 = vst [vmem:[#allocation13_spill] sm:$0xff] %v4321_v30  ;;  %v2885_v31 = vadd.f32 %v2853_v18, %v2788_v38  ;;  %v2595_v38 = vadd.f32 %v2563_v5, %v2498_v47  ;;  %v2758_v1 = vmul.f32 %v4235_v58, %v4321_v30  ;;  %v4336_v18 = vld [vmem:[#allocation2 + $0x52] sm:$0xff]  ;;  %v4340_v7 = vld [vmem:[#allocation3 + $0x52] sm:$0xff]  ;;  %v2176_v5 = vmul.f32 %v4252_v25, %v4029_v8 }
  0xc6   : > { %v1844_v12 = vpop.f32.mrf.mxu1  ;;  %5953 = vst [vmem:[#allocation14_spill] sm:$0xff] %v4340_v7  ;;  %v5955_v62 = vld [vmem:[#allocation4_spill] sm:$0xff]  ;;  %v2886_v47 = vadd.f32 %v2854_v44, %v2789_v49  ;;  %v1161_v43 = vadd.f32 %v1129_v26, %v1063_v27  ;;  %v1323_v50 = vmul.f32 %v3803_v57, %v4336_v18  ;;  %v2370_v25 = vmul.f32 %v4284_v37, %v4071_v4 }
  0xc7   : > { %v1845_v10 = vadd.f32 %v3972_v59, %v1844_v12  ;;  %v2921_v17 = vadd.f32 %v4289_v53, %v2885_v31  ;;  %v2693_v11 = vadd.f32 %v2661_v9, %v2595_v38  ;;  %v2273_v12 = vmul.f32 %v4266_v55, %v4049_v40 }
  0xc8   : > { %v2855_v31 = vmul.f32 %v4246_v16, %v4340_v7  ;;  %v2208_v9 = vadd.f32 %v2176_v5, %v2079_v48  ;;  %v1258_v55 = vadd.f32 %v1226_v0, %v1161_v43  ;;  %v547_v38 = vmul.f32 %v4083_v6, %v3755_v19  ;;  %v5956_v43 = vld [vmem:[#allocation6_spill] sm:$0xff] }
  0xc9   : > { %v1926_v15 = vmax.f32 %v1845_v10, 0.0  ;;  %v2790_v23 = vadd.f32 %v2758_v1, %v2693_v11  ;;  %v2953_v10 = vmax.f32 %v2921_v17, 0.0  ;;  %v644_v1 = vmul.f32 %v4099_v36, %v3757_v20 }
  0xca   : > { %3415 = vmatmul.msk.f32.gmra.mxu1 %vm421_vm1, %v5955_v62  ;;  %v2305_v44 = vadd.f32 %v2273_v12, %v2208_v9  ;;  %v4364_v26 = vld [vmem:[#allocation3 + $0x60] sm:$0xff]  ;;  %v2922_v27 = vadd.f32 %v4289_v53, %v2886_v47  ;;  %v1355_v48 = vadd.f32 %v1323_v50, %v1258_v55  ;;  %v741_v0 = vmul.f32 %v4119_v54, %v3761_v21  ;;  %v4393_v55 = vld [vmem:[#allocation2 + $0x60] sm:$0xff] }
  0xcb   : > { %3420 = vmatmul.msk.f32.gmra.mxu3 %vm421_vm1, %v5954_v29  ;;  %2017 = vst.msk [vmem:[#allocation3 + $0x69] sm:$0xff] %vm1953_vm3, %v1926_v15  ;;  %v2887_v49 = vadd.f32 %v2855_v31, %v2790_v23  ;;  %v2467_v29 = vmul.f32 %v4298_v41, %v4097_v52  ;;  %v2564_v6 = vmul.f32 %v4307_v42, %v4129_v14  ;;  %v4382_v47 = vld [vmem:[#allocation3 + $0x61] sm:$0xff] }
  0xcc   : > { %v2402_v5 = vadd.f32 %v2370_v25, %v2305_v44  ;;  %v676_v17 = vadd.f32 %v644_v1, %v547_v38  ;;  %v838_v12 = vmul.f32 %v4216_v60, %v3767_v24  ;;  %3425 = vmatmul.msk.f32.gmra.mxu2 %vm1953_vm3, %v2953_v10  ;;  %v1391_v15 = vadd.f32 %v3859_v2, %v1355_v48  ;;  %v4401_v1 = vld [vmem:[#allocation2 + $0x61] sm:$0xff] }
  0xcd   : > { %v2662_v62 = vmul.f32 %v4132_v61, %v4364_v26  ;;  %v2080_v54 = vmul.f32 %v4268_v45, %v4026_v63  ;;  %v4389_v50 = vadd.f32 %v4289_v53, %v2887_v49  ;;  %v935_v9 = vmul.f32 %v4229_v22, %v3784_v33  ;;  %5957 = vst [vmem:[#allocation5_spill] sm:$0xff] %v4393_v55  ;;  %v4403_v48 = vld [vmem:[#allocation2 + $0x62] sm:$0xff] }
  0xce   : > { %v1847_v11 = vpop.f32.mrf.mxu1  ;;  %v2499_v23 = vadd.f32 %v2467_v29, %v2402_v5  ;;  %v773_v31 = vadd.f32 %v741_v0, %v676_v17  ;;  %v1423_v25 = vmax.f32 %v1391_v15, 0.0  ;;  %v2177_v38 = vmul.f32 %v4270_v28, %v4029_v8  ;;  %5958 = vst [vmem:[#allocation4_spill] sm:$0xff] %v4403_v48 }
  0xcf   : > { %v1848_v36 = vadd.f32 %v3972_v59, %v1847_v11  ;;  %v2759_v45 = vmul.f32 %v4235_v58, %v4382_v47  ;;  %v1032_v49 = vmul.f32 %v4239_v35, %v3789_v39  ;;  %v2954_v29 = vmax.f32 %v2922_v27, 0.0 }
  0xd0   : > { %v2596_v10 = vadd.f32 %v2564_v6, %v2499_v23  ;;  %v870_v44 = vadd.f32 %v838_v12, %v773_v31  ;;  %3362 = vmatmul.msk.f32.gmra.mxu0 %vm421_vm1, %v1423_v25  ;;  %v2209_v28 = vadd.f32 %v2177_v38, %v2080_v54  ;;  %v2274_v11 = vmul.f32 %v4280_v13, %v4049_v40  ;;  %v5960_v25 = vld [vmem:[#allocation11_spill] sm:$0xff] }
  0xd1   : > { %v1927_v2 = vmax.f32 %v1848_v36, 0.0  ;;  %v2371_v5 = vmul.f32 %v4311_v32, %v4071_v4  ;;  %v2955_v6 = vmax.f32 %v4389_v50, 0.0  ;;  %v1130_v27 = vmul.f32 %v3796_v46, %v4393_v55 }
  0xd2   : > { %v4407_v0 = vld [vmem:[#allocation3 + $0x62] sm:$0xff]  ;;  %v2694_v17 = vadd.f32 %v2662_v62, %v2596_v10  ;;  %v967_v12 = vadd.f32 %v935_v9, %v870_v44  ;;  %v1227_v36 = vmul.f32 %v3799_v51, %v4401_v1  ;;  %v1324_v15 = vmul.f32 %v3803_v57, %v4403_v48 }
  0xd3   : > { %3421 = vmatmul.msk.f32.gmra.mxu3 %vm421_vm1, %v5956_v43  ;;  %2018 = vst.msk [vmem:[#allocation3 + $0x79] sm:$0xff] %vm1953_vm3, %v1927_v2  ;;  %v2306_v54 = vadd.f32 %v2274_v11, %v2209_v28  ;;  %v548_v13 = vmul.f32 %v4155_v56, %v3755_v19  ;;  %v2856_v23 = vmul.f32 %v4246_v16, %v4407_v0  ;;  %v4424_v62 = vld [vmem:[#allocation3 + $0x68] sm:$0xff]  ;;  %v5959_v9 = vld [vmem:[#allocation10_spill] sm:$0xff]  ;;  %v5961_v28 = vld [vmem:[#allocation8_spill] sm:$0xff] }
  0xd4   : > { %v1064_v50 = vadd.f32 %v1032_v49, %v967_v12  ;;  %v4426_v31 = vld [vmem:[#allocation3 + $0x69] sm:$0xff]  ;;  %v645_v2 = vmul.f32 %v5959_v9, %v3757_v20  ;;  %v742_v38 = vmul.f32 %v5960_v25, %v3761_v21  ;;  %3426 = vmatmul.msk.f32.gmra.mxu2 %vm1953_vm3, %v2954_v29  ;;  %v2468_v44 = vmul.f32 %v4321_v30, %v4097_v52 }
  0xd5   : > { %v2403_v56 = vadd.f32 %v2371_v5, %v2306_v54  ;;  %v2565_v49 = vmul.f32 %v4340_v7, %v4129_v14  ;;  %v2791_v11 = vadd.f32 %v2759_v45, %v2694_v17  ;;  %v839_v25 = vmul.f32 %v4313_v34, %v3767_v24  ;;  %v4450_v17 = vld [vmem:[#allocation2 + $0x68] sm:$0xff] }
  0xd6   : > { %v1162_v12 = vadd.f32 %v1130_v27, %v1064_v50  ;;  %v677_v9 = vadd.f32 %v645_v2, %v548_v13  ;;  %v2663_v5 = vmul.f32 %v4132_v61, %v4424_v62  ;;  %v2760_v54 = vmul.f32 %v4235_v58, %v4426_v31  ;;  %v4453_v13 = vld [vmem:[#allocation2 + $0x69] sm:$0xff] }
  0xd7   : > { %v1850_v43 = vpop.f32.mrf.mxu1  ;;  %v2500_v29 = vadd.f32 %v2468_v44, %v2403_v56  ;;  %v2888_v7 = vadd.f32 %v2856_v23, %v2791_v11  ;;  %v936_v45 = vmul.f32 %v4328_v3, %v3784_v33  ;;  %v2081_v50 = vmul.f32 %v4284_v37, %v4026_v63 }
  0xd8   : > { %v1851_v10 = vadd.f32 %v3972_v59, %v1850_v43  ;;  %v4446_v43 = vld [vmem:[#allocation3 + $0x6a] sm:$0xff]  ;;  %v1259_v30 = vadd.f32 %v1227_v36, %v1162_v12  ;;  %v774_v48 = vadd.f32 %v742_v38, %v677_v9  ;;  %v2178_v2 = vmul.f32 %v4298_v41, %v4029_v8  ;;  %v4480_v9 = vld [vmem:[#allocation2 + $0x6a] sm:$0xff] }
  0xd9   : > { %v2597_v27 = vadd.f32 %v2565_v49, %v2500_v29  ;;  %v2275_v36 = vmul.f32 %v4307_v42, %v4049_v40  ;;  %v2857_v38 = vmul.f32 %v4246_v16, %v4446_v43  ;;  %v1131_v44 = vmul.f32 %v3796_v46, %v4450_v17  ;;  %v4473_v42 = vld [vmem:[%s5846_s2] ss:$0 sm:$0xff]  ;;  %v5962_v29 = vld [vmem:[#allocation9_spill] sm:$0xff] }
  0xda   : > { %v1928_v32 = vmax.f32 %v1851_v10, 0.0  ;;  %v1356_v23 = vadd.f32 %v1324_v15, %v1259_v30  ;;  %v871_v10 = vadd.f32 %v839_v25, %v774_v48  ;;  %v2210_v49 = vadd.f32 %v2178_v2, %v2081_v50  ;;  %v4488_v50 = vld [vmem:[#allocation3 + $0x79] sm:$0xff] }
  0xdb   : > { %3422 = vmatmul.msk.f32.gmra.mxu3 %vm421_vm1, %v5961_v28  ;;  %v2695_v56 = vadd.f32 %v2663_v5, %v2597_v27  ;;  %v2372_v37 = vmul.f32 %v4364_v26, %v4071_v4  ;;  %v2924_v41 = vadd.f32 %v4289_v53, %v2888_v7  ;;  %v1228_v15 = vmul.f32 %v3799_v51, %v4453_v13 }
  0xdc   : > { %2019 = vst.msk [vmem:[#allocation3 + $0x81] sm:$0xff] %vm1953_vm3, %v1928_v32  ;;  %v1033_v32 = vmul.f32 %v4336_v18, %v3789_v39  ;;  %v1392_v30 = vadd.f32 %v4473_v42, %v1356_v23  ;;  %v968_v48 = vadd.f32 %v936_v45, %v871_v10  ;;  %3427 = vmatmul.msk.f32.gmra.mxu2 %vm1953_vm3, %v2955_v6  ;;  %v4486_v45 = vld [vmem:[#allocation3 + $0x78] sm:$0xff] }
  0xdd   : > { %v2792_v12 = vadd.f32 %v2760_v54, %v2695_v56  ;;  %v2307_v7 = vadd.f32 %v2275_v36, %v2210_v49  ;;  %v549_v25 = vmul.f32 %v4216_v60, %v3755_v19  ;;  %v646_v6 = vmul.f32 %v4229_v22, %v3757_v20 }
  0xde   : > { %v1424_v5 = vmax.f32 %v1392_v30, 0.0  ;;  %v1065_v27 = vadd.f32 %v1033_v32, %v968_v48  ;;  %v743_v54 = vmul.f32 %v4239_v35, %v3761_v21  ;;  %v2469_v60 = vmul.f32 %v4382_v47, %v4097_v52 }
  0xdf   : > { %v1853_v28 = vpop.f32.mrf.mxu1  ;;  %v2404_v36 = vadd.f32 %v2372_v37, %v2307_v7  ;;  %v2566_v23 = vmul.f32 %v4407_v0, %v4129_v14  ;;  %v1325_v32 = vmul.f32 %v3803_v57, %v4480_v9  ;;  %v678_v56 = vadd.f32 %v646_v6, %v549_v25 }
  0xe0   : > { %v1854_v11 = vadd.f32 %v3972_v59, %v1853_v28  ;;  %3363 = vmatmul.msk.f32.gmra.mxu0 %vm421_vm1, %v1424_v5  ;;  %v1163_v10 = vadd.f32 %v1131_v44, %v1065_v27  ;;  %v840_v22 = vmul.f32 %v4393_v55, %v3767_v24  ;;  %v2956_v49 = vmax.f32 %v2924_v41, 0.0  ;;  %v5963_v41 = vld [vmem:[#allocation4_spill] sm:$0xff]  ;;  %v4514_v5 = vld [vmem:[#allocation2 + $0x78] sm:$0xff] }
  0xe1   : > { %v2501_v35 = vadd.f32 %v2469_v60, %v2404_v36  ;;  %v2664_v37 = vmul.f32 %v4132_v61, %v4486_v45  ;;  %v2761_v28 = vmul.f32 %v4235_v58, %v4488_v50  ;;  %v2889_v44 = vadd.f32 %v2857_v38, %v2792_v12  ;;  %v5964_v27 = vld [vmem:[#allocation12_spill] sm:$0xff] }
  0xe2   : > { %v1929_v2 = vmax.f32 %v1854_v11, 0.0  ;;  %v1260_v48 = vadd.f32 %v1228_v15, %v1163_v10  ;;  %v775_v11 = vadd.f32 %v743_v54, %v678_v56  ;;  %v937_v7 = vmul.f32 %v4401_v1, %v3784_v33  ;;  %v4522_v12 = vld [vmem:[#allocation2 + $0x79] sm:$0xff]  ;;  %v5966_v54 = vld [vmem:[#allocation14_spill] sm:$0xff] }
  0xe3   : > { %3423 = vmatmul.msk.f32.gmra.mxu3 %vm421_vm1, %v5962_v29  ;;  %v4508_v30 = vld [vmem:[#allocation3 + $0x7a] sm:$0xff]  ;;  %v2598_v25 = vadd.f32 %v2566_v23, %v2501_v35  ;;  %v1034_v29 = vmul.f32 %v5963_v41, %v3789_v39  ;;  %v2082_v6 = vmul.f32 %v5964_v27, %v4026_v63  ;;  %v2276_v23 = vmul.f32 %v5966_v54, %v4049_v40  ;;  %v4536_v54 = vld [vmem:[#allocation2 + $0x7a] sm:$0xff] }
  0xe4   : > { %2020 = vst.msk [vmem:[#allocation3 + $0x91] sm:$0xff] %vm1953_vm3, %v1929_v2  ;;  %v5965_v2 = vld [vmem:[#allocation13_spill] sm:$0xff]  ;;  %v1357_v55 = vadd.f32 %v1325_v32, %v1260_v48  ;;  %v2858_v38 = vmul.f32 %v4246_v16, %v4508_v30  ;;  %v872_v15 = vadd.f32 %v840_v22, %v775_v11  ;;  %3428 = vmatmul.msk.f32.gmra.mxu2 %vm1953_vm3, %v2956_v49 }
  0xe5   : > { %v2179_v36 = vmul.f32 %v5965_v2, %v4029_v8  ;;  %v2696_v56 = vadd.f32 %v2664_v37, %v2598_v25  ;;  %v2373_v27 = vmul.f32 %v4424_v62, %v4071_v4  ;;  %v2925_v32 = vadd.f32 %v4289_v53, %v2889_v44  ;;  %v4540_v44 = vld [vmem:[#allocation3 + $0x80] sm:$0xff] }
  0xe6   : > { %v1393_v48 = vadd.f32 %v4473_v42, %v1357_v55  ;;  %v969_v2 = vadd.f32 %v937_v7, %v872_v15  ;;  %v1132_v22 = vmul.f32 %v3796_v46, %v4514_v5  ;;  %v1229_v49 = vmul.f32 %v3799_v51, %v4522_v12  ;;  %v4547_v15 = vld [vmem:[#allocation3 + $0x81] sm:$0xff] }
  0xe7   : > { %v1856_v60 = vpop.f32.mrf.mxu1  ;;  %v2211_v35 = vadd.f32 %v2179_v36, %v2082_v6  ;;  %v2793_v41 = vadd.f32 %v2761_v28, %v2696_v56  ;;  %v2470_v36 = vmul.f32 %v4426_v31, %v4097_v52  ;;  %v550_v55 = vmul.f32 %v4313_v34, %v3755_v19 }
  0xe8   : > { %v1857_v10 = vadd.f32 %v3972_v59, %v1856_v60  ;;  %v1425_v25 = vmax.f32 %v1393_v48, 0.0  ;;  %v1066_v6 = vadd.f32 %v1034_v29, %v969_v2  ;;  %v744_v29 = vmul.f32 %v4336_v18, %v3761_v21 }
  0xe9   : > { %v2308_v37 = vadd.f32 %v2276_v23, %v2211_v35  ;;  %v2890_v28 = vadd.f32 %v2858_v38, %v2793_v41  ;;  %v647_v23 = vmul.f32 %v4328_v3, %v3757_v20  ;;  %v1326_v34 = vmul.f32 %v3803_v57, %v4536_v54 }
  0xea   : > { %v1930_v11 = vmax.f32 %v1857_v10, 0.0  ;;  %v2957_v10 = vmax.f32 %v2925_v32, 0.0  ;;  %3364 = vmatmul.msk.f32.gmra.mxu0 %vm421_vm1, %v1425_v25  ;;  %v1164_v56 = vadd.f32 %v1132_v22, %v1066_v6  ;;  %v2567_v35 = vmul.f32 %v4446_v43, %v4129_v14  ;;  %v4569_v25 = vld [vmem:[#allocation3 + $0x82] sm:$0xff] }
  0xeb   : > { %v2405_v60 = vadd.f32 %v2373_v27, %v2308_v37  ;;  %v2665_v38 = vmul.f32 %v4132_v61, %v4540_v44  ;;  %v679_v27 = vadd.f32 %v647_v23, %v550_v55  ;;  %v841_v3 = vmul.f32 %v4450_v17, %v3767_v24  ;;  %v4573_v55 = vld [vmem:[#allocation2 + $0x80] sm:$0xff] }
  0xec   : > { %2021 = vst.msk [vmem:[#allocation3 + $0x99] sm:$0xff] %vm1953_vm3, %v1930_v11  ;;  %v1261_v18 = vadd.f32 %v1229_v49, %v1164_v56  ;;  %v2762_v32 = vmul.f32 %v4235_v58, %v4547_v15  ;;  %v938_v2 = vmul.f32 %v4453_v13, %v3784_v33  ;;  %3429 = vmatmul.msk.f32.gmra.mxu2 %vm1953_vm3, %v2957_v10 }
  0xed   : > { %v2502_v41 = vadd.f32 %v2470_v36, %v2405_v60  ;;  %v2926_v22 = vadd.f32 %v4289_v53, %v2890_v28  ;;  %v776_v6 = vadd.f32 %v744_v29, %v679_v27  ;;  %v1035_v49 = vmul.f32 %v4480_v9, %v3789_v39 }
  0xee   : > { %v4544_v7 = vpop.f32.mrf.mxu3  ;;  %v1358_v36 = vadd.f32 %v1326_v34, %v1261_v18  ;;  %v2083_v60 = vmul.f32 %v4364_v26, %v4026_v63  ;;  %v2180_v23 = vmul.f32 %v4382_v47, %v4029_v8  ;;  %v2277_v29 = vmul.f32 %v4407_v0, %v4049_v40 }
  0xef   : > { %5967 = vst [vmem:[#allocation6_spill] sm:$0xff] %v4544_v7  ;;  %v1859_v48 = vpop.f32.mrf.mxu1  ;;  %v2599_v37 = vadd.f32 %v2567_v35, %v2502_v41  ;;  %v873_v56 = vadd.f32 %v841_v3, %v776_v6  ;;  %v2859_v35 = vmul.f32 %v4246_v16, %v4569_v25  ;;  %v2374_v26 = vmul.f32 %v4486_v45, %v4071_v4  ;;  %v4597_v6 = vld [vmem:[#allocation3 + $0x90] sm:$0xff] }
  0xf0   : > { %v1860_v11 = vadd.f32 %v3972_v59, %v1859_v48  ;;  %v4579_v59 = vld [vmem:[#allocation2 + $0x81] sm:$0xff]  ;;  %v1394_v34 = vadd.f32 %v4473_v42, %v1358_v36  ;;  %v2212_v41 = vadd.f32 %v2180_v23, %v2083_v60  ;;  %v2958_v47 = vmax.f32 %v2926_v22, 0.0  ;;  %5969 = vst [vmem:[#allocation11_spill] sm:$0xff] %v4597_v6 }
  0xf1   : > { %v2697_v28 = vadd.f32 %v2665_v38, %v2599_v37  ;;  %v970_v3 = vadd.f32 %v938_v2, %v873_v56  ;;  %v1133_v48 = vmul.f32 %v3796_v46, %v4573_v55  ;;  %v1230_v18 = vmul.f32 %v3799_v51, %v4579_v59 }
  0xf2   : > { %v1931_v10 = vmax.f32 %v1860_v11, 0.0  ;;  %v1426_v0 = vmax.f32 %v1394_v34, 0.0  ;;  %v4595_v11 = vld [vmem:[#allocation2 + $0x82] sm:$0xff]  ;;  %v2309_v37 = vadd.f32 %v2277_v29, %v2212_v41  ;;  %v2471_v22 = vmul.f32 %v4488_v50, %v4097_v52 }
  0xf3   : > { %v2794_v38 = vadd.f32 %v2762_v32, %v2697_v28  ;;  %v1067_v60 = vadd.f32 %v1035_v49, %v970_v3  ;;  %v5970_v32 = vld [vmem:[#allocation5_spill] sm:$0xff]  ;;  %v2568_v28 = vmul.f32 %v4508_v30, %v4129_v14  ;;  %v648_v56 = vmul.f32 %v4401_v1, %v3757_v20  ;;  %v5971_v29 = vld [vmem:[#allocation4_spill] sm:$0xff] }
  0xf4   : > { %2022 = vst.msk [vmem:[#allocation3 + $0xa9] sm:$0xff] %vm1953_vm3, %v1931_v10  ;;  %v551_v2 = vmul.f32 %v5970_v32, %v3755_v19  ;;  %3365 = vmatmul.msk.f32.gmra.mxu0 %vm421_vm1, %v1426_v0  ;;  %v2406_v10 = vadd.f32 %v2374_v26, %v2309_v37  ;;  %v745_v34 = vmul.f32 %v5971_v29, %v3761_v21  ;;  %v4614_v49 = vld [vmem:[%s5850_s6] ss:$0 sm:$0xff]  ;;  %v4621_v1 = vld [vmem:[#allocation3 + $0x91] sm:$0xff] }
  0xf5   : > { %v2891_v36 = vadd.f32 %v2859_v35, %v2794_v38  ;;  %3430 = vmatmul.msk.f32.gmra.mxu2 %vm1953_vm3, %v2958_v47  ;;  %v1165_v41 = vadd.f32 %v1133_v48, %v1067_v60  ;;  %v1327_v26 = vmul.f32 %v3803_v57, %v4595_v11  ;;  %v2666_v38 = vmul.f32 %v4132_v61, %v4597_v6  ;;  %v4624_v47 = vld [vmem:[#allocation3 + $0x92] sm:$0xff] }
  0xf6   : > { %v4588_v27 = vpop.f32.mrf.mxu3  ;;  %v2503_v0 = vadd.f32 %v2471_v22, %v2406_v10  ;;  %v680_v37 = vadd.f32 %v648_v56, %v551_v2  ;;  %v842_v32 = vmul.f32 %v4514_v5, %v3767_v24  ;;  %v2763_v60 = vmul.f32 %v4235_v58, %v4621_v1  ;;  %v4637_v2 = vld [vmem:[#allocation2 + $0x90] sm:$0xff] }
  0xf7   : > { %5968 = vst [vmem:[#allocation10_spill] sm:$0xff] %v4588_v27  ;;  %v1862_v23 = vpop.f32.mrf.mxu1  ;;  %v2927_v3 = vadd.f32 %v4289_v53, %v2891_v36  ;;  %v939_v7 = vmul.f32 %v4522_v12, %v3784_v33  ;;  %v2860_v22 = vmul.f32 %v4246_v16, %v4624_v47  ;;  %v2181_v10 = vmul.f32 %v4426_v31, %v4029_v8 }
  0xf8   : > { %v1863_v35 = vadd.f32 %v4614_v49, %v1862_v23  ;;  %v1262_v23 = vadd.f32 %v1230_v18, %v1165_v41  ;;  %v2600_v48 = vadd.f32 %v2568_v28, %v2503_v0  ;;  %v777_v27 = vadd.f32 %v745_v34, %v680_v37  ;;  %v4645_v41 = vld [vmem:[#allocation2 + $0x91] sm:$0xff] }
  0xf9   : > { %v2084_v18 = vmul.f32 %v4424_v62, %v4026_v63  ;;  %v2959_v28 = vmax.f32 %v2927_v3, 0.0  ;;  %v2278_v37 = vmul.f32 %v4446_v43, %v4049_v40  ;;  %v2375_v62 = vmul.f32 %v4540_v44, %v4071_v4 }
  0xfa   : > { %v1932_v29 = vmax.f32 %v1863_v35, 0.0  ;;  %v1359_v36 = vadd.f32 %v1327_v26, %v1262_v23  ;;  %v2698_v56 = vadd.f32 %v2666_v38, %v2600_v48  ;;  %v874_v34 = vadd.f32 %v842_v32, %v777_v27  ;;  %v4658_v48 = vld [vmem:[#allocation2 + $0x92] sm:$0xff] }
  0xfb   : > { %v1036_v35 = vmul.f32 %v4536_v54, %v3789_v39  ;;  %v2213_v0 = vadd.f32 %v2181_v10, %v2084_v18  ;;  %v1134_v27 = vmul.f32 %v3796_v46, %v4637_v2  ;;  %v1231_v32 = vmul.f32 %v3799_v51, %v4645_v41 }
  0xfc   : > { %2023 = vst.msk [vmem:[#allocation3 + $0xb1] sm:$0xff] %vm1953_vm3, %v1932_v29  ;;  %v1395_v26 = vadd.f32 %v4473_v42, %v1359_v36  ;;  %v2795_v29 = vadd.f32 %v2763_v60, %v2698_v56  ;;  %v971_v31 = vadd.f32 %v939_v7, %v874_v34  ;;  %v2472_v60 = vmul.f32 %v4547_v15, %v4097_v52  ;;  %v4662_v7 = vld [vmem:[#allocation3 + $0x98] sm:$0xff] }
  0xfd   : > { %3431 = vmatmul.msk.f32.gmra.mxu2 %vm1953_vm3, %v2959_v28  ;;  %v2310_v43 = vadd.f32 %v2278_v37, %v2213_v0  ;;  %v552_v10 = vmul.f32 %v4450_v17, %v3755_v19  ;;  %v649_v34 = vmul.f32 %v4453_v13, %v3757_v20  ;;  %v1328_v0 = vmul.f32 %v3803_v57, %v4658_v48 }
  0xfe   : > { %v4632_v6 = vpop.f32.mrf.mxu3  ;;  %v1427_v38 = vmax.f32 %v1395_v26, 0.0  ;;  %v2892_v36 = vadd.f32 %v2860_v22, %v2795_v29  ;;  %v1068_v18 = vadd.f32 %v1036_v35, %v971_v31  ;;  %v746_v26 = vmul.f32 %v4480_v9, %v3761_v21  ;;  %v4681_v29 = vld [vmem:[#allocation3 + $0x99] sm:$0xff] }
  0xff   : > { %5972 = vst [vmem:[#allocation8_spill] sm:$0xff] %v4632_v6  ;;  %v1865_v23 = vpop.f32.mrf.mxu1  ;;  %v2407_v56 = vadd.f32 %v2375_v62, %v2310_v43  ;;  %v2569_v37 = vmul.f32 %v4569_v25, %v4129_v14  ;;  %v2667_v13 = vmul.f32 %v4132_v61, %v4662_v7  ;;  %v681_v9 = vadd.f32 %v649_v34, %v552_v10 }
 0x100   : > { %v1866_v3 = vadd.f32 %v4614_v49, %v1865_v23  ;;  %3366 = vmatmul.msk.f32.gmra.mxu0 %vm421_vm1, %v1427_v38  ;;  %v2928_v22 = vadd.f32 %v4289_v53, %v2892_v36  ;;  %v1166_v35 = vadd.f32 %v1134_v27, %v1068_v18  ;;  %v843_v23 = vmul.f32 %v4573_v55, %v3767_v24 }
 0x101   : > { %v2504_v62 = vadd.f32 %v2472_v60, %v2407_v56  ;;  %v778_v43 = vadd.f32 %v746_v26, %v681_v9  ;;  %v940_v36 = vmul.f32 %v4579_v59, %v3784_v33  ;;  %v2085_v18 = vmul.f32 %v4486_v45, %v4026_v63  ;;  %v4693_v56 = vld [vmem:[#allocation2 + $0x98] sm:$0xff] }
 0x102   : > { %v1933_v28 = vmax.f32 %v1866_v3, 0.0  ;;  %v2960_v31 = vmax.f32 %v2928_v22, 0.0  ;;  %v1263_v27 = vadd.f32 %v1231_v32, %v1166_v35  ;;  %v4685_v3 = vld [vmem:[#allocation3 + $0x9a] sm:$0xff]  ;;  %v2182_v32 = vmul.f32 %v4488_v50, %v4029_v8 }
 0x103   : > { %v2601_v38 = vadd.f32 %v2569_v37, %v2504_v62  ;;  %v2279_v34 = vmul.f32 %v4508_v30, %v4049_v40  ;;  %v875_v35 = vadd.f32 %v843_v23, %v778_v43  ;;  %v1037_v45 = vmul.f32 %v4595_v11, %v3789_v39  ;;  %v4705_v37 = vld [vmem:[#allocation2 + $0x9a] sm:$0xff] }
 0x104   : > { %2024 = vst.msk [vmem:[#allocation3 + $0xc1] sm:$0xff] %vm1953_vm3, %v1933_v28  ;;  %v1360_v60 = vadd.f32 %v1328_v0, %v1263_v27  ;;  %v2764_v28 = vmul.f32 %v4235_v58, %v4681_v29  ;;  %v4703_v0 = vld [vmem:[#allocation2 + $0x99] sm:$0xff]  ;;  %v2861_v50 = vmul.f32 %v4246_v16, %v4685_v3  ;;  %v2214_v9 = vadd.f32 %v2182_v32, %v2085_v18 }
 0x105   : > { %3432 = vmatmul.msk.f32.gmra.mxu2 %vm1953_vm3, %v2960_v31  ;;  %v2699_v26 = vadd.f32 %v2667_v13, %v2601_v38  ;;  %v5974_v30 = vld [vmem:[#allocation11_spill] sm:$0xff]  ;;  %v972_v38 = vadd.f32 %v940_v36, %v875_v35  ;;  %v1135_v23 = vmul.f32 %v3796_v46, %v4693_v56  ;;  %v553_v36 = vmul.f32 %v4514_v5, %v3755_v19 }
 0x106   : > { %v4676_v17 = vpop.f32.mrf.mxu3  ;;  %v1396_v62 = vadd.f32 %v4473_v42, %v1360_v60  ;;  %v2376_v31 = vmul.f32 %v5974_v30, %v4071_v4  ;;  %v1329_v60 = vmul.f32 %v3803_v57, %v4705_v37  ;;  %v2570_v35 = vmul.f32 %v4624_v47, %v4129_v14 }
 0x107   : > { %5973 = vst [vmem:[#allocation9_spill] sm:$0xff] %v4676_v17  ;;  %v1868_v10 = vpop.f32.mrf.mxu1  ;;  %v2796_v13 = vadd.f32 %v2764_v28, %v2699_v26  ;;  %v2311_v17 = vadd.f32 %v2279_v34, %v2214_v9  ;;  %v1069_v32 = vadd.f32 %v1037_v45, %v972_v38  ;;  %v4721_v28 = vld [vmem:[#allocation3 + $0xa8] sm:$0xff]  ;;  %v650_v26 = vmul.f32 %v4522_v12, %v3757_v20 }
 0x108   : > { %v1869_v22 = vadd.f32 %v4614_v49, %v1868_v10  ;;  %v1428_v43 = vmax.f32 %v1396_v62, 0.0  ;;  %v1232_v10 = vmul.f32 %v3799_v51, %v4703_v0  ;;  %v2473_v34 = vmul.f32 %v4621_v1, %v4097_v52  ;;  %v4735_v9 = vld [vmem:[#allocation3 + $0xa9] sm:$0xff] }
 0x109   : > { %v2893_v18 = vadd.f32 %v2861_v50, %v2796_v13  ;;  %v747_v45 = vmul.f32 %v4536_v54, %v3761_v21  ;;  %v1167_v50 = vadd.f32 %v1135_v23, %v1069_v32  ;;  %v682_v5 = vadd.f32 %v650_v26, %v553_v36  ;;  %v4743_v54 = vld [vmem:[#allocation3 + $0xaa] sm:$0xff]  ;;  %v4746_v32 = vld [vmem:[#allocation2 + $0xa8] sm:$0xff] }
 0x10a   : > { %v1934_v27 = vmax.f32 %v1869_v22, 0.0  ;;  %3367 = vmatmul.msk.f32.gmra.mxu0 %vm421_vm1, %v1428_v43  ;;  %v2408_v22 = vadd.f32 %v2376_v31, %v2311_v17  ;;  %v844_v12 = vmul.f32 %v4637_v2, %v3767_v24  ;;  %v2668_v17 = vmul.f32 %v4132_v61, %v4721_v28  ;;  %5976 = vst [vmem:[#allocation13_spill] sm:$0xff] %v4746_v32 }
 0x10b   : > { %v2929_v62 = vadd.f32 %v4289_v53, %v2893_v18  ;;  %v1264_v43 = vadd.f32 %v1232_v10, %v1167_v50  ;;  %v779_v18 = vadd.f32 %v747_v45, %v682_v5  ;;  %v2765_v26 = vmul.f32 %v4235_v58, %v4735_v9 }
 0x10c   : > { %2025 = vst.msk [vmem:[#allocation3 + $0xc9] sm:$0xff] %vm1953_vm3, %v1934_v27  ;;  %v2505_v13 = vadd.f32 %v2473_v34, %v2408_v22  ;;  %v941_v27 = vmul.f32 %v4645_v41, %v3784_v33  ;;  %v1038_v22 = vmul.f32 %v4658_v48, %v3789_v39  ;;  %v2086_v34 = vmul.f32 %v4540_v44, %v4026_v63 }
 0x10d   : > { %v2961_v38 = vmax.f32 %v2929_v62, 0.0  ;;  %v1361_v10 = vadd.f32 %v1329_v60, %v1264_v43  ;;  %v876_v50 = vadd.f32 %v844_v12, %v779_v18  ;;  %v2183_v45 = vmul.f32 %v4547_v15, %v4029_v8 }
 0x10e   : > { %v4718_v6 = vpop.f32.mrf.mxu3  ;;  %v2602_v36 = vadd.f32 %v2570_v35, %v2505_v13  ;;  %v2862_v5 = vmul.f32 %v4246_v16, %v4743_v54  ;;  %v1136_v13 = vmul.f32 %v3796_v46, %v4746_v32  ;;  %v2280_v44 = vmul.f32 %v4569_v25, %v4049_v40 }
 0x10f   : > { %5975 = vst [vmem:[#allocation12_spill] sm:$0xff] %v4718_v6  ;;  %v1871_v31 = vpop.f32.mrf.mxu1  ;;  %3433 = vmatmul.msk.f32.gmra.mxu2 %vm1953_vm3, %v2961_v38  ;;  %v4755_v6 = vld [vmem:[#allocation2 + $0xa9] sm:$0xff]  ;;  %v1397_v12 = vadd.f32 %v4473_v42, %v1361_v10  ;;  %v973_v38 = vadd.f32 %v941_v27, %v876_v50  ;;  %v2215_v15 = vadd.f32 %v2183_v45, %v2086_v34 }
 0x110   : > { %v1872_v23 = vadd.f32 %v4614_v49, %v1871_v31  ;;  %5977 = vst [vmem:[#allocation14_spill] sm:$0xff] %v4755_v6  ;;  %v2700_v35 = vadd.f32 %v2668_v17, %v2602_v36  ;;  %v4763_v31 = vld [vmem:[#allocation2 + $0xaa] sm:$0xff]  ;;  %v2377_v17 = vmul.f32 %v4662_v7, %v4071_v4  ;;  %v2474_v10 = vmul.f32 %v4681_v29, %v4097_v52 }
 0x111   : > { %5978 = vst [vmem:[#allocation5_spill] sm:$0xff] %v4763_v31  ;;  %v1429_v18 = vmax.f32 %v1397_v12, 0.0  ;;  %v1070_v36 = vadd.f32 %v1038_v22, %v973_v38  ;;  %v1330_v25 = vmul.f32 %v3803_v57, %v4763_v31  ;;  %v2312_v32 = vadd.f32 %v2280_v44, %v2215_v15 }
 0x112   : > { %v1935_v62 = vmax.f32 %v1872_v23, 0.0  ;;  %v2797_v43 = vadd.f32 %v2765_v26, %v2700_v35  ;;  %v1233_v23 = vmul.f32 %v3799_v51, %v4755_v6  ;;  %v554_v34 = vmul.f32 %v4573_v55, %v3755_v19 }
 0x113   : > { %v651_v26 = vmul.f32 %v4579_v59, %v3757_v20  ;;  %3368 = vmatmul.msk.f32.gmra.mxu0 %vm421_vm1, %v1429_v18  ;;  %v1168_v22 = vadd.f32 %v1136_v13, %v1070_v36  ;;  %v2409_v50 = vadd.f32 %v2377_v17, %v2312_v32  ;;  %v748_v35 = vmul.f32 %v4595_v11, %v3761_v21  ;;  %v4796_v17 = vld [vmem:[#allocation3 + $0xb1] sm:$0xff] }
 0x114   : > { %2026 = vst.msk [vmem:[#allocation3 + $0xd9] sm:$0xff] %vm1953_vm3, %v1935_v62  ;;  %v4779_v62 = vld [vmem:[#allocation3 + $0xb0] sm:$0xff]  ;;  %v2571_v44 = vmul.f32 %v4685_v3, %v4129_v14  ;;  %v845_v55 = vmul.f32 %v4693_v56, %v3767_v24 }
 0x115   : > { %v683_v12 = vadd.f32 %v651_v26, %v554_v34  ;;  %v1265_v38 = vadd.f32 %v1233_v23, %v1168_v22  ;;  %v2506_v59 = vadd.f32 %v2474_v10, %v2409_v50  ;;  %v2669_v13 = vmul.f32 %v4132_v61, %v4779_v62  ;;  %v4805_v23 = vld [vmem:[#allocation2 + $0xb0] sm:$0xff] }
 0x116   : > { %v4767_v60 = vpop.f32.mrf.mxu3  ;;  %v2087_v10 = vmul.f32 %v5974_v30, %v4026_v63  ;;  %v1039_v26 = vmul.f32 %v4705_v37, %v3789_v39  ;;  %v4812_v22 = vld [vmem:[#allocation2 + $0xb1] sm:$0xff]  ;;  %v2766_v30 = vmul.f32 %v4235_v58, %v4796_v17 }
 0x117   : > { %5979 = vst [vmem:[#allocation4_spill] sm:$0xff] %v4767_v60  ;;  %v2894_v60 = vadd.f32 %v2862_v5, %v2797_v43  ;;  %v1874_v27 = vpop.f32.mrf.mxu1  ;;  %v4798_v43 = vld [vmem:[#allocation3 + $0xb2] sm:$0xff]  ;;  %v780_v11 = vadd.f32 %v748_v35, %v683_v12  ;;  %v1362_v36 = vadd.f32 %v1330_v25, %v1265_v38  ;;  %v4814_v50 = vld [vmem:[#allocation2 + $0xb2] sm:$0xff]  ;;  %v2184_v25 = vmul.f32 %v4621_v1, %v4029_v8 }
 0x118   : > { %v1875_v45 = vadd.f32 %v4614_v49, %v1874_v27  ;;  %v2603_v27 = vadd.f32 %v2571_v44, %v2506_v59  ;;  %v2863_v44 = vmul.f32 %v4246_v16, %v4798_v43  ;;  %v2378_v1 = vmul.f32 %v4721_v28, %v4071_v4 }
 0x119   : > { %v2930_v5 = vadd.f32 %v4289_v53, %v2894_v60  ;;  %v942_v60 = vmul.f32 %v4703_v0, %v3784_v33  ;;  %v877_v34 = vadd.f32 %v845_v55, %v780_v11  ;;  %v1398_v35 = vadd.f32 %v4473_v42, %v1362_v36 }
 0x11a   : > { %v1936_v32 = vmax.f32 %v1875_v45, 0.0  ;;  %v2281_v45 = vmul.f32 %v4624_v47, %v4049_v40  ;;  %v1137_v55 = vmul.f32 %v3796_v46, %v4805_v23  ;;  %v2216_v38 = vadd.f32 %v2184_v25, %v2087_v10  ;;  %v4841_v25 = vld [vmem:[#allocation3 + $0xc2] sm:$0xff] }
 0x11b   : > { %v2962_v15 = vmax.f32 %v2930_v5, 0.0  ;;  %v2701_v5 = vadd.f32 %v2669_v13, %v2603_v27  ;;  %v974_v12 = vadd.f32 %v942_v60, %v877_v34  ;;  %v1234_v13 = vmul.f32 %v3799_v51, %v4812_v22  ;;  %v4835_v60 = vld [vmem:[#allocation3 + $0xc0] sm:$0xff] }
 0x11c   : > { %2027 = vst.msk [vmem:[#allocation3 + $0xe1] sm:$0xff] %vm1953_vm3, %v1936_v32  ;;  %v1430_v32 = vmax.f32 %v1398_v35, 0.0  ;;  %v2313_v36 = vadd.f32 %v2281_v45, %v2216_v38  ;;  %v2475_v16 = vmul.f32 %v4735_v9, %v4097_v52  ;;  %v4839_v34 = vld [vmem:[#allocation3 + $0xc1] sm:$0xff]  ;;  %v555_v35 = vmul.f32 %v4637_v2, %v3755_v19 }
 0x11d   : > { %3434 = vmatmul.msk.f32.gmra.mxu2 %vm1953_vm3, %v2962_v15  ;;  %v2798_v47 = vadd.f32 %v2766_v30, %v2701_v5  ;;  %v1331_v15 = vmul.f32 %v3803_v57, %v4814_v50  ;;  %v1071_v11 = vadd.f32 %v1039_v26, %v974_v12  ;;  %5981 = vst [vmem:[#allocation15_spill] sm:$0xff] %v4835_v60 }
 0x11e   : > { %v4802_v18 = vpop.f32.mrf.mxu3  ;;  %3369 = vmatmul.msk.f32.gmra.mxu0 %vm421_vm1, %v1430_v32  ;;  %v652_v26 = vmul.f32 %v4645_v41, %v3757_v20  ;;  %v749_v45 = vmul.f32 %v4658_v48, %v3761_v21  ;;  %v2410_v30 = vadd.f32 %v2378_v1, %v2313_v36  ;;  %v2572_v12 = vmul.f32 %v4743_v54, %v4129_v14  ;;  %v4870_v36 = vld [vmem:[#allocation2 + $0xc1] sm:$0xff] }
 0x11f   : > { %5980 = vst [vmem:[#allocation11_spill] sm:$0xff] %v4802_v18  ;;  %v1877_v59 = vpop.f32.mrf.mxu1  ;;  %v2895_v10 = vadd.f32 %v2863_v44, %v2798_v47  ;;  %v1169_v5 = vadd.f32 %v1137_v55, %v1071_v11  ;;  %v2670_v32 = vmul.f32 %v4132_v61, %v4835_v60  ;;  %v5983_v47 = vld [vmem:[#allocation13_spill] sm:$0xff]  ;;  %v4858_v18 = vld [vmem:[#allocation2 + $0xc0] sm:$0xff]  ;;  %v2767_v1 = vmul.f32 %v4235_v58, %v4839_v34 }
 0x120   : > { %v1878_v27 = vadd.f32 %v4614_v49, %v1877_v59  ;;  %v684_v2 = vadd.f32 %v652_v26, %v555_v35  ;;  %v846_v41 = vmul.f32 %v5983_v47, %v3767_v24  ;;  %5984 = vst [vmem:[#allocation13_spill] sm:$0xff] %v4858_v18  ;;  %v2507_v55 = vadd.f32 %v2475_v16, %v2410_v30 }
 0x121   : > { %v2931_v44 = vadd.f32 %v4289_v53, %v2895_v10  ;;  %v1266_v48 = vadd.f32 %v1234_v13, %v1169_v5  ;;  %v4865_v53 = vld [vmem:[%s5851_s7 + $0x8] ss:$0 sm:$0xff]  ;;  %5985 = vst [vmem:[#allocation17_spill] sm:$0xff] %v4870_v36  ;;  %v943_v16 = vmul.f32 %v4755_v6, %v3784_v33  ;;  %v1040_v35 = vmul.f32 %v4763_v31, %v3789_v39  ;;  %v4903_v6 = vld [vmem:[#allocation3 + $0xc9] sm:$0xff] }
 0x122   : > { %v1937_v38 = vmax.f32 %v1878_v27, 0.0  ;;  %v2864_v11 = vmul.f32 %v4865_v53, %v4841_v25  ;;  %v4872_v27 = vld [vmem:[#allocation2 + $0xc2] sm:$0xff]  ;;  %v781_v13 = vadd.f32 %v749_v45, %v684_v2  ;;  %v2604_v5 = vadd.f32 %v2572_v12, %v2507_v55 }
 0x123   : > { %5986 = vst [vmem:[#allocation18_spill] sm:$0xff] %v4872_v27  ;;  %v2963_v10 = vmax.f32 %v2931_v44, 0.0  ;;  %v1363_v26 = vadd.f32 %v1331_v15, %v1266_v48  ;;  %v1138_v30 = vmul.f32 %v3796_v46, %v4858_v18  ;;  %v1235_v45 = vmul.f32 %v3799_v51, %v4870_v36  ;;  %v4889_v15 = vld [vmem:[#allocation3 + $0xc8] sm:$0xff] }
 0x124   : > { %2028 = vst.msk [vmem:[#allocation3 + $0xf1] sm:$0xff] %vm1953_vm3, %v1937_v38  ;;  %v2088_v38 = vmul.f32 %v4662_v7, %v4026_v63  ;;  %v1332_v44 = vmul.f32 %v3803_v57, %v4872_v27  ;;  %v2185_v2 = vmul.f32 %v4681_v29, %v4029_v8  ;;  %v2702_v55 = vadd.f32 %v2670_v32, %v2604_v5 }
 0x125   : > { %3435 = vmatmul.msk.f32.gmra.mxu2 %vm1953_vm3, %v2963_v10  ;;  %v1399_v48 = vadd.f32 %v4473_v42, %v1363_v26  ;;  %v2282_v7 = vmul.f32 %v4685_v3, %v4049_v40  ;;  %v2476_v27 = vmul.f32 %v4796_v17, %v4097_v52  ;;  %v2573_v29 = vmul.f32 %v4798_v43, %v4129_v14 }
 0x126   : > { %v4852_v59 = vpop.f32.mrf.mxu3  ;;  %v2799_v18 = vadd.f32 %v2767_v1, %v2702_v55  ;;  %v2671_v26 = vmul.f32 %v4132_v61, %v4889_v15 }
 0x127   : > { %5982 = vst [vmem:[#allocation16_spill] sm:$0xff] %v4852_v59  ;;  %v878_v59 = vadd.f32 %v846_v41, %v781_v13  ;;  %v1880_v12 = vpop.f32.mrf.mxu1  ;;  %v2379_v41 = vmul.f32 %v4779_v62, %v4071_v4  ;;  %v2217_v13 = vadd.f32 %v2185_v2, %v2088_v38  ;;  %v1431_v36 = vmax.f32 %v1399_v48, 0.0 }
 0x128   : > { %v1881_v32 = vadd.f32 %v4614_v49, %v1880_v12  ;;  %v653_v38 = vmul.f32 %v4703_v0, %v3757_v20  ;;  %v2896_v1 = vadd.f32 %v2864_v11, %v2799_v18  ;;  %v2768_v11 = vmul.f32 %v4235_v58, %v4903_v6 }
 0x129   : > { %v975_v10 = vadd.f32 %v943_v16, %v878_v59  ;;  %v2314_v31 = vadd.f32 %v2282_v7, %v2217_v13  ;;  %v4905_v59 = vld [vmem:[#allocation3 + $0xca] sm:$0xff]  ;;  %v556_v16 = vmul.f32 %v4693_v56, %v3755_v19  ;;  %3370 = vmatmul.msk.f32.gmra.mxu0 %vm421_vm1, %v1431_v36  ;;  %v4917_v13 = vld [vmem:[#allocation2 + $0xc8] sm:$0xff] }
 0x12a   : > { %v1938_v48 = vmax.f32 %v1881_v32, 0.0  ;;  %5987 = vst [vmem:[#allocation19_spill] sm:$0xff] %v4917_v13  ;;  %v4922_v56 = vld [vmem:[%s5852_s8] ss:$0 sm:$0xff]  ;;  %v4932_v32 = vld [vmem:[#allocation2 + $0xc9] sm:$0xff] }
 0x12b   : > { %v1072_v3 = vadd.f32 %v1040_v35, %v975_v10  ;;  %v750_v35 = vmul.f32 %v4705_v37, %v3761_v21  ;;  %v2411_v55 = vadd.f32 %v2379_v41, %v2314_v31  ;;  %v685_v7 = vadd.f32 %v653_v38, %v556_v16  ;;  %5988 = vst [vmem:[#allocation20_spill] sm:$0xff] %v4932_v32 }
 0x12c   : > { %v847_v10 = vmul.f32 %v4805_v23, %v3767_v24  ;;  %v2932_v0 = vadd.f32 %v4922_v56, %v2896_v1  ;;  %v2865_v37 = vmul.f32 %v4865_v53, %v4905_v59  ;;  %2029 = vst.msk [vmem:[#allocation3 + $0xf9] sm:$0xff] %vm1953_vm3, %v1938_v48  ;;  %v944_v41 = vmul.f32 %v4812_v22, %v3784_v33 }
 0x12d   : > { %v1170_v12 = vadd.f32 %v1138_v30, %v1072_v3  ;;  %v2508_v36 = vadd.f32 %v2476_v27, %v2411_v55  ;;  %v782_v30 = vadd.f32 %v750_v35, %v685_v7  ;;  %v1041_v16 = vmul.f32 %v4814_v50, %v3789_v39  ;;  %v4945_v35 = vld [vmem:[#allocation3 + $0xd8] sm:$0xff] }
 0x12e   : > { %v1895_v5 = vpop.f32.mrf.mxu3  ;;  %v2964_v3 = vmax.f32 %v2932_v0, 0.0  ;;  %v1139_v38 = vmul.f32 %v3796_v46, %v4917_v13  ;;  %v2089_v27 = vmul.f32 %v4721_v28, %v4026_v63  ;;  %v2186_v48 = vmul.f32 %v4735_v9, %v4029_v8  ;;  %5990 = vst [vmem:[#allocation22_spill] sm:$0xff] %v4945_v35 }
 0x12f   : > { %v1896_v2 = vadd.f32 %v4614_v49, %v1895_v5  ;;  %v1267_v31 = vadd.f32 %v1235_v45, %v1170_v12  ;;  %v4934_v5 = vld [vmem:[#allocation2 + $0xca] sm:$0xff]  ;;  %v2605_v1 = vadd.f32 %v2573_v29, %v2508_v36  ;;  %v1236_v12 = vmul.f32 %v3799_v51, %v4932_v32 }
 0x130   : > { %5989 = vst [vmem:[#allocation21_spill] sm:$0xff] %v4934_v5  ;;  %3436 = vmatmul.msk.f32.gmra.mxu2 %vm1953_vm3, %v2964_v3  ;;  %v1333_v55 = vmul.f32 %v3803_v57, %v4934_v5  ;;  %v2283_v7 = vmul.f32 %v4743_v54, %v4049_v40  ;;  %v2380_v28 = vmul.f32 %v4835_v60, %v4071_v4 }
 0x131   : > { %v1943_v18 = vmax.f32 %v1896_v2, 0.0  ;;  %v1364_v45 = vadd.f32 %v1332_v44, %v1267_v31  ;;  %v879_v2 = vadd.f32 %v847_v10, %v782_v30  ;;  %v2703_v29 = vadd.f32 %v2671_v26, %v2605_v1  ;;  %v4964_v26 = vld [vmem:[#allocation3 + $0xd9] sm:$0xff] }
 0x132   : > { %v2218_v0 = vadd.f32 %v2186_v48, %v2089_v27  ;;  %v2477_v36 = vmul.f32 %v4839_v34, %v4097_v52  ;;  %v2574_v30 = vmul.f32 %v4841_v25, %v4129_v14  ;;  %v2672_v54 = vmul.f32 %v4132_v61, %v4945_v35  ;;  %v4966_v27 = vld [vmem:[#allocation3 + $0xda] sm:$0xff] }
 0x133   : > { %2034 = vst.msk [vmem:[#allocation3 + $0x139] sm:$0xff] %vm1953_vm3, %v1943_v18  ;;  %v1400_v44 = vadd.f32 %v4473_v42, %v1364_v45  ;;  %v976_v10 = vadd.f32 %v944_v41, %v879_v2  ;;  %v1883_v18 = vpop.f32.mrf.mxu1  ;;  %v2800_v60 = vadd.f32 %v2768_v11, %v2703_v29  ;;  %v557_v2 = vmul.f32 %v5983_v47, %v3755_v19  ;;  %v5991_v48 = vld [vmem:[#allocation14_spill] sm:$0xff]  ;;  %v4976_v29 = vld [vmem:[#allocation2 + $0xd8] sm:$0xff] }
 0x134   : > { %v2315_v45 = vadd.f32 %v2283_v7, %v2218_v0  ;;  %v1884_v1 = vadd.f32 %v4614_v49, %v1883_v18  ;;  %5993 = vst [vmem:[#allocation14_spill] sm:$0xff] %v4976_v29  ;;  %v5994_v18 = vld [vmem:[#allocation13_spill] sm:$0xff] }
 0x135   : > { %v1432_v3 = vmax.f32 %v1400_v44, 0.0  ;;  %v1073_v5 = vadd.f32 %v1041_v16, %v976_v10  ;;  %v2897_v35 = vadd.f32 %v2865_v37, %v2800_v60  ;;  %v5992_v16 = vld [vmem:[#allocation5_spill] sm:$0xff]  ;;  %v2769_v10 = vmul.f32 %v4235_v58, %v4964_v26 }
 0x136   : > { %v1898_v9 = vpop.f32.mrf.mxu3  ;;  %v2412_v11 = vadd.f32 %v2380_v28, %v2315_v45  ;;  %v751_v7 = vmul.f32 %v5992_v16, %v3761_v21  ;;  %v1939_v0 = vmax.f32 %v1884_v1, 0.0  ;;  %v5995_v45 = vld [vmem:[#allocation17_spill] sm:$0xff]  ;;  %v5996_v1 = vld [vmem:[#allocation18_spill] sm:$0xff] }
 0x137   : > { %v1899_v31 = vadd.f32 %v4614_v49, %v1898_v9  ;;  %v654_v9 = vmul.f32 %v5991_v48, %v3757_v20  ;;  %3371 = vmatmul.msk.f32.gmra.mxu0 %vm421_vm1, %v1432_v3  ;;  %v1171_v44 = vadd.f32 %v1139_v38, %v1073_v5  ;;  %v2933_v3 = vadd.f32 %v4922_v56, %v2897_v35  ;;  %v4986_v38 = vld [vmem:[#allocation2 + $0xd9] sm:$0xff] }
 0x138   : > { %v2509_v37 = vadd.f32 %v2477_v36, %v2412_v11  ;;  %v2866_v5 = vmul.f32 %v4865_v53, %v4966_v27  ;;  %2030 = vst.msk [vmem:[#allocation3 + $0x109] sm:$0xff] %vm1953_vm3, %v1939_v0  ;;  %v1140_v48 = vmul.f32 %v3796_v46, %v4976_v29  ;;  %v4995_v35 = vld [vmem:[#allocation2 + $0xda] sm:$0xff]  ;;  %v2090_v11 = vmul.f32 %v4779_v62, %v4026_v63 }
 0x139   : > { %v1944_v41 = vmax.f32 %v1899_v31, 0.0  ;;  %v686_v47 = vadd.f32 %v654_v9, %v557_v2  ;;  %v848_v31 = vmul.f32 %v5994_v18, %v3767_v24  ;;  %v1268_v60 = vadd.f32 %v1236_v12, %v1171_v44 }
 0x13a   : > { %v1042_v2 = vmul.f32 %v5996_v1, %v3789_v39  ;;  %v2965_v12 = vmax.f32 %v2933_v3, 0.0  ;;  %v2606_v9 = vadd.f32 %v2574_v30, %v2509_v37  ;;  %v1237_v0 = vmul.f32 %v3799_v51, %v4986_v38  ;;  %v5010_v30 = vld [vmem:[#allocation3 + $0xe0] sm:$0xff] }
 0x13b   : > { %2035 = vst.msk [vmem:[#allocation3 + $0x141] sm:$0xff] %vm1953_vm3, %v1944_v41  ;;  %v783_v28 = vadd.f32 %v751_v7, %v686_v47  ;;  %v945_v41 = vmul.f32 %v5995_v45, %v3784_v33  ;;  %v1365_v36 = vadd.f32 %v1333_v55, %v1268_v60  ;;  %v2187_v47 = vmul.f32 %v4796_v17, %v4029_v8 }
 0x13c   : > { %3437 = vmatmul.msk.f32.gmra.mxu2 %vm1953_vm3, %v2965_v12  ;;  %v2704_v3 = vadd.f32 %v2672_v54, %v2606_v9  ;;  %v1334_v55 = vmul.f32 %v3803_v57, %v4995_v35  ;;  %v2284_v62 = vmul.f32 %v4798_v43, %v4049_v40  ;;  %v2381_v17 = vmul.f32 %v4889_v15, %v4071_v4 }
 0x13d   : > { %v880_v7 = vadd.f32 %v848_v31, %v783_v28  ;;  %v1401_v29 = vadd.f32 %v4473_v42, %v1365_v36  ;;  %v1886_v31 = vpop.f32.mrf.mxu1  ;;  %v2219_v28 = vadd.f32 %v2187_v47, %v2090_v11  ;;  %v2478_v42 = vmul.f32 %v4903_v6, %v4097_v52  ;;  %v5018_v36 = vld [vmem:[#allocation3 + $0xe1] sm:$0xff] }
 0x13e   : > { %v1901_v44 = vpop.f32.mrf.mxu3  ;;  %v2801_v12 = vadd.f32 %v2769_v10, %v2704_v3  ;;  %v2575_v54 = vmul.f32 %v4905_v59, %v4129_v14  ;;  %5997 = vst [vmem:[#allocation5_spill] sm:$0xff] %v5018_v36  ;;  %v5023_v11 = vld [vmem:[#allocation3 + $0xe2] sm:$0xff] }
 0x13f   : > { %v1902_v16 = vadd.f32 %v4614_v49, %v1901_v44  ;;  %v977_v37 = vadd.f32 %v945_v41, %v880_v7  ;;  %v1433_v44 = vmax.f32 %v1401_v29, 0.0  ;;  %v2316_v9 = vadd.f32 %v2284_v62, %v2219_v28  ;;  %5998 = vst [vmem:[#allocation13_spill] sm:$0xff] %v5023_v11 }
 0x140   : > { %v2673_v41 = vmul.f32 %v4132_v61, %v5010_v30  ;;  %v1887_v29 = vadd.f32 %v4614_v49, %v1886_v31  ;;  %v2898_v10 = vadd.f32 %v2866_v5, %v2801_v12  ;;  %v655_v7 = vmul.f32 %v4812_v22, %v3757_v20  ;;  %v5046_v12 = vld [vmem:[#allocation2 + $0xe1] sm:$0xff] }
 0x141   : > { %v1945_v60 = vmax.f32 %v1902_v16, 0.0  ;;  %v1074_v43 = vadd.f32 %v1042_v2, %v977_v37  ;;  %3372 = vmatmul.msk.f32.gmra.mxu0 %vm421_vm1, %v1433_v44  ;;  %v558_v16 = vmul.f32 %v4805_v23, %v3755_v19  ;;  %v752_v2 = vmul.f32 %v4814_v50, %v3761_v21  ;;  %v5035_v37 = vld [vmem:[#allocation2 + $0xe0] sm:$0xff]  ;;  %6000 = vst [vmem:[#allocation18_spill] sm:$0xff] %v5046_v12 }
 0x142   : > { %v2413_v3 = vadd.f32 %v2381_v17, %v2316_v9  ;;  %v2770_v62 = vmul.f32 %v4235_v58, %v5018_v36  ;;  %5999 = vst [vmem:[#allocation17_spill] sm:$0xff] %v5035_v37  ;;  %v2934_v31 = vadd.f32 %v4922_v56, %v2898_v10  ;;  %v2867_v5 = vmul.f32 %v4865_v53, %v5023_v11 }
 0x143   : > { %2036 = vst.msk [vmem:[#allocation3 + $0x151] sm:$0xff] %vm1953_vm3, %v1945_v60  ;;  %v1172_v47 = vadd.f32 %v1140_v48, %v1074_v43  ;;  %v1940_v60 = vmax.f32 %v1887_v29, 0.0  ;;  %v687_v28 = vadd.f32 %v655_v7, %v558_v16  ;;  %v849_v22 = vmul.f32 %v4917_v13, %v3767_v24  ;;  %v6001_v29 = vld [vmem:[#allocation21_spill] sm:$0xff] }
 0x144   : > { %v2510_v50 = vadd.f32 %v2478_v42, %v2413_v3  ;;  %v946_v17 = vmul.f32 %v4932_v32, %v3784_v33  ;;  %v2966_v43 = vmax.f32 %v2934_v31, 0.0  ;;  %v1043_v10 = vmul.f32 %v6001_v29, %v3789_v39  ;;  %v5052_v7 = vld [vmem:[#allocation2 + $0xe2] sm:$0xff]  ;;  %v6003_v3 = vld [vmem:[#allocation15_spill] sm:$0xff] }
 0x145   : > { %v1269_v44 = vadd.f32 %v1237_v0, %v1172_v47  ;;  %2031 = vst.msk [vmem:[#allocation3 + $0x111] sm:$0xff] %vm1953_vm3, %v1940_v60  ;;  %v784_v9 = vadd.f32 %v752_v2, %v687_v28  ;;  %v1141_v16 = vmul.f32 %v3796_v46, %v5035_v37  ;;  %v2091_v60 = vmul.f32 %v6003_v3, %v4026_v63  ;;  %v5063_v37 = vld [vmem:[#allocation3 + $0xf0] sm:$0xff] }
 0x146   : > { %v1904_v23 = vpop.f32.mrf.mxu3  ;;  %6002 = vst [vmem:[#allocation23_spill] sm:$0xff] %v5052_v7  ;;  %v2607_v42 = vadd.f32 %v2575_v54, %v2510_v50  ;;  %3438 = vmatmul.msk.f32.gmra.mxu2 %vm1953_vm3, %v2966_v43  ;;  %v1238_v2 = vmul.f32 %v3799_v51, %v5046_v12  ;;  %v2188_v31 = vmul.f32 %v4839_v34, %v4029_v8  ;;  %v5068_v54 = vld [vmem:[%s5854_s10] ss:$0 sm:$0xff] }
 0x147   : > { %v1905_v48 = vadd.f32 %v4614_v49, %v1904_v23  ;;  %v1366_v0 = vadd.f32 %v1334_v55, %v1269_v44  ;;  %v881_v23 = vadd.f32 %v849_v22, %v784_v9  ;;  %v2285_v28 = vmul.f32 %v4841_v25, %v4049_v40  ;;  %v1574_v55 = vpop.f32.mrf.mxu0  ;;  %v5073_v22 = vld [vmem:[%s5848_s4] ss:$0 sm:$0xff]  ;;  %v1889_v9 = vpop.f32.mrf.mxu1 }
 0x148   : > { %v5078_v34 = vld [vmem:[%s5846_s2] ss:$0 sm:$0xff]  ;;  %v2705_v44 = vadd.f32 %v2673_v41, %v2607_v42  ;;  %v1335_v50 = vmul.f32 %v3803_v57, %v5052_v7  ;;  %v2220_v12 = vadd.f32 %v2188_v31, %v2091_v60  ;;  %v2479_v29 = vmul.f32 %v4964_v26, %v4097_v52  ;;  %v5096_v31 = vld [vmem:[#allocation3 + $0xf1] sm:$0xff] }
 0x149   : > { %v1946_v47 = vmax.f32 %v1905_v48, 0.0  ;;  %v1402_v25 = vadd.f32 %v5078_v34, %v1366_v0  ;;  %v6004_v48 = vld [vmem:[#allocation22_spill] sm:$0xff]  ;;  %v978_v3 = vadd.f32 %v946_v17, %v881_v23  ;;  %v2576_v32 = vmul.f32 %v4966_v27, %v4129_v14 }
 0x14a   : > { %v2382_v43 = vmul.f32 %v6004_v48, %v4071_v4  ;;  %v2802_v0 = vadd.f32 %v2770_v62, %v2705_v44  ;;  %v2674_v41 = vmul.f32 %v4132_v61, %v5063_v37  ;;  %v1575_v42 = vadd.f32 %v5073_v22, %v1574_v55 }
 0x14b   : > { %2037 = vst.msk [vmem:[#allocation3 + $0x159] sm:$0xff] %vm1953_vm3, %v1946_v47  ;;  %v1434_v13 = vmax.f32 %v1402_v25, 0.0  ;;  %v3102_v47 = vpop.f32.mrf.mxu2  ;;  %v1075_v7 = vadd.f32 %v1043_v10, %v978_v3  ;;  %v2317_v11 = vadd.f32 %v2285_v28, %v2220_v12  ;;  %v1890_v17 = vadd.f32 %v4614_v49, %v1889_v9  ;;  %v5101_v12 = vld [vmem:[#allocation3 + $0xf2] sm:$0xff] }
 0x14c   : > { %v3103_v60 = vadd.f32 %v5068_v54, %v3102_v47  ;;  %v2899_v23 = vadd.f32 %v2867_v5, %v2802_v0  ;;  %v1670_v25 = vmax.f32 %v1575_v42, 0.0  ;;  %v559_v55 = vmul.f32 %v5994_v18, %v3755_v19 }
 0x14d   : > { %3373 = vmatmul.msk.f32.gmra.mxu0 %vm421_vm1, %v1434_v13  ;;  %v1173_v44 = vadd.f32 %v1141_v16, %v1075_v7  ;;  %v2414_v10 = vadd.f32 %v2382_v43, %v2317_v11  ;;  %v1941_v28 = vmax.f32 %v1890_v17, 0.0  ;;  %v656_v13 = vmul.f32 %v5995_v45, %v3757_v20 }
 0x14e   : > { %v1907_v48 = vpop.f32.mrf.mxu3  ;;  %v3198_v3 = vmax.f32 %v3103_v60, 0.0  ;;  %v2935_v9 = vadd.f32 %v4922_v56, %v2899_v23  ;;  %v753_v18 = vmul.f32 %v5996_v1, %v3761_v21  ;;  %v2771_v16 = vmul.f32 %v4235_v58, %v5096_v31  ;;  %v6005_v1 = vld [vmem:[#allocation14_spill] sm:$0xff] }
 0x14f   : > { %v1908_v62 = vadd.f32 %v4614_v49, %v1907_v48  ;;  %v1270_v11 = vadd.f32 %v1238_v2, %v1173_v44  ;;  %v2511_v5 = vadd.f32 %v2479_v29, %v2414_v10  ;;  %2032 = vst.msk [vmem:[#allocation3 + $0x121] sm:$0xff] %vm1953_vm3, %v1941_v28  ;;  %v5118_v48 = vld [vmem:[#allocation2 + $0xf0] sm:$0xff]  ;;  %v2868_v0 = vmul.f32 %v4865_v53, %v5101_v12 }
 0x150   : > { %v3230_v7 = vadd.f32 %v3198_v3, %v1670_v25  ;;  %v2967_v43 = vmax.f32 %v2935_v9, 0.0  ;;  %v688_v45 = vadd.f32 %v656_v13, %v559_v55  ;;  %v850_v42 = vmul.f32 %v6005_v1, %v3767_v24  ;;  %v5125_v2 = vld [vmem:[#allocation2 + $0xf1] sm:$0xff]  ;;  %v5147_v9 = vld [vmem:[#allocation3 + $0xf8] sm:$0xff]  ;;  %v1577_v13 = vpop.f32.mrf.mxu0 }
 0x151   : > { %v1947_v47 = vmax.f32 %v1908_v62, 0.0  ;;  %6006 = vst [vmem:[#allocation15_spill] sm:$0xff] %v5125_v2  ;;  %v5127_v29 = vld [vmem:[#allocation2 + $0xf2] sm:$0xff]  ;;  %v1367_v17 = vadd.f32 %v1335_v50, %v1270_v11  ;;  %v2608_v60 = vadd.f32 %v2576_v32, %v2511_v5  ;;  %v947_v23 = vmul.f32 %v4986_v38, %v3784_v33  ;;  %v1892_v5 = vpop.f32.mrf.mxu1 }
 0x152   : > { %6007 = vst [vmem:[#allocation14_spill] sm:$0xff] %v5127_v29  ;;  %v1044_v62 = vmul.f32 %v4995_v35, %v3789_v39  ;;  %3439 = vmatmul.msk.f32.gmra.mxu2 %vm1953_vm3, %v2967_v43  ;;  %v785_v25 = vadd.f32 %v753_v18, %v688_v45  ;;  %v1142_v55 = vmul.f32 %v3796_v46, %v5118_v48 }
 0x153   : > { %2038 = vst.msk [vmem:[#allocation3 + $0x169] sm:$0xff] %vm1953_vm3, %v1947_v47  ;;  %v2092_v44 = vmul.f32 %v4889_v15, %v4026_v63  ;;  %v2189_v32 = vmul.f32 %v4903_v6, %v4029_v8  ;;  %v1403_v50 = vadd.f32 %v5078_v34, %v1367_v17  ;;  %v2706_v10 = vadd.f32 %v2674_v41, %v2608_v60  ;;  %v3105_v41 = vpop.f32.mrf.mxu2  ;;  %v6009_v17 = vld [vmem:[#allocation13_spill] sm:$0xff] }
 0x154   : > { %3262 = vst.msk [vmem:[%s5109_s27] sm:$0xff] %vm1953_vm3, %v3230_v7  ;;  %v1239_v28 = vmul.f32 %v3799_v51, %v5125_v2  ;;  %v1336_v3 = vmul.f32 %v3803_v57, %v5127_v29  ;;  %v882_v18 = vadd.f32 %v850_v42, %v785_v25  ;;  %v2286_v15 = vmul.f32 %v4905_v59, %v4049_v40 }
 0x155   : > { %6008 = vst [vmem:[#allocation24_spill] sm:$0xff] %v5147_v9  ;;  %v2221_v11 = vadd.f32 %v2189_v32, %v2092_v44  ;;  %v2383_v6 = vmul.f32 %v5010_v30, %v4071_v4  ;;  %v1435_v7 = vmax.f32 %v1403_v50, 0.0  ;;  %v2803_v43 = vadd.f32 %v2771_v16, %v2706_v10 }
 0x156   : > { %v1910_v47 = vpop.f32.mrf.mxu3  ;;  %v2480_v45 = vmul.f32 %v5018_v36, %v4097_v52  ;;  %v2577_v60 = vmul.f32 %v6009_v17, %v4129_v14  ;;  %v979_v29 = vadd.f32 %v947_v23, %v882_v18  ;;  %v2675_v42 = vmul.f32 %v4132_v61, %v5147_v9  ;;  %v5164_v36 = vld [vmem:[#allocation3 + $0xf9] sm:$0xff] }
 0x157   : > { %v2318_v2 = vadd.f32 %v2286_v15, %v2221_v11  ;;  %v1911_v59 = vadd.f32 %v4614_v49, %v1910_v47  ;;  %3374 = vmatmul.msk.f32.gmra.mxu0 %vm421_vm1, %v1435_v7  ;;  %v2900_v25 = vadd.f32 %v2868_v0, %v2803_v43  ;;  %v1578_v44 = vadd.f32 %v5073_v22, %v1577_v13  ;;  %v5166_v23 = vld [vmem:[#allocation3 + $0xfa] sm:$0xff]  ;;  %v6012_v11 = vld [vmem:[#allocation19_spill] sm:$0xff] }
 0x158   : > { %v1893_v16 = vadd.f32 %v4614_v49, %v1892_v5  ;;  %v3106_v32 = vadd.f32 %v5068_v54, %v3105_v41  ;;  %v1076_v50 = vadd.f32 %v1044_v62, %v979_v29  ;;  %6010 = vst [vmem:[#allocation13_spill] sm:$0xff] %v5164_v36  ;;  %v560_v15 = vmul.f32 %v6012_v11, %v3755_v19  ;;  %v6013_v49 = vld [vmem:[#allocation20_spill] sm:$0xff]  ;;  %v6014_v29 = vld [vmem:[#allocation21_spill] sm:$0xff] }
 0x159   : > { %v2415_v10 = vadd.f32 %v2383_v6, %v2318_v2  ;;  %6011 = vst [vmem:[#allocation25_spill] sm:$0xff] %v5166_v23  ;;  %v1948_v18 = vmax.f32 %v1911_v59, 0.0  ;;  %v2936_v47 = vadd.f32 %v4922_v56, %v2900_v25  ;;  %v1671_v7 = vmax.f32 %v1578_v44, 0.0  ;;  %v5176_v6 = vld [vmem:[#allocation2 + $0xf8] sm:$0xff] }
 0x15a   : > { %v1942_v0 = vmax.f32 %v1893_v16, 0.0  ;;  %v3199_v43 = vmax.f32 %v3106_v32, 0.0  ;;  %v1174_v13 = vadd.f32 %v1142_v55, %v1076_v50  ;;  %v657_v2 = vmul.f32 %v6013_v49, %v3757_v20  ;;  %6015 = vst [vmem:[#allocation19_spill] sm:$0xff] %v5176_v6  ;;  %v6016_v16 = vld [vmem:[#allocation17_spill] sm:$0xff]  ;;  %v5185_v50 = vld [vmem:[#allocation2 + $0xf9] sm:$0xff] }
 0x15b   : > { %v2512_v9 = vadd.f32 %v2480_v45, %v2415_v10  ;;  %2039 = vst.msk [vmem:[#allocation3 + $0x171] sm:$0xff] %vm1953_vm3, %v1948_v18  ;;  %v754_v62 = vmul.f32 %v6014_v29, %v3761_v21  ;;  %v2968_v5 = vmax.f32 %v2936_v47, 0.0  ;;  %v2772_v41 = vmul.f32 %v4235_v58, %v5164_v36  ;;  %v5187_v10 = vld [vmem:[#allocation2 + $0xfa] sm:$0xff]  ;;  %v6019_v18 = vld [vmem:[#allocation18_spill] sm:$0xff] }
 0x15c   : > { %v2869_v59 = vmul.f32 %v4865_v53, %v5166_v23  ;;  %2033 = vst.msk [vmem:[#allocation3 + $0x129] sm:$0xff] %vm1953_vm3, %v1942_v0  ;;  %v3231_v55 = vadd.f32 %v3199_v43, %v1671_v7  ;;  %v1271_v45 = vadd.f32 %v1239_v28, %v1174_v13  ;;  %v689_v44 = vadd.f32 %v657_v2, %v560_v15  ;;  %v6020_v47 = vld [vmem:[#allocation23_spill] sm:$0xff]  ;;  %v6021_v0 = vld [vmem:[#allocation22_spill] sm:$0xff] }
 0x15d   : > { %v2609_v25 = vadd.f32 %v2577_v60, %v2512_v9  ;;  %v851_v32 = vmul.f32 %v6016_v16, %v3767_v24  ;;  %6017 = vst [vmem:[#allocation20_spill] sm:$0xff] %v5185_v50  ;;  %3440 = vmatmul.msk.f32.gmra.mxu2 %vm1953_vm3, %v2968_v5  ;;  %v948_v11 = vmul.f32 %v6019_v18, %v3784_v33  ;;  %v5200_v13 = vld [vmem:[#allocation3 + $0x108] sm:$0xff] }
 0x15e   : > { %6018 = vst [vmem:[#allocation21_spill] sm:$0xff] %v5187_v10  ;;  %v1045_v7 = vmul.f32 %v6020_v47, %v3789_v39  ;;  %v1143_v28 = vmul.f32 %v3796_v46, %v5176_v6  ;;  %v1368_v9 = vadd.f32 %v1336_v3, %v1271_v45  ;;  %v786_v15 = vadd.f32 %v754_v62, %v689_v44  ;;  %v1580_v3 = vpop.f32.mrf.mxu0  ;;  %v3108_v44 = vpop.f32.mrf.mxu2 }
 0x15f   : > { %3263 = vst.msk [vmem:[%s5109_s27 + $0x8] sm:$0xff] %vm1953_vm3, %v3231_v55  ;;  %v2707_v60 = vadd.f32 %v2675_v42, %v2609_v25  ;;  %v2093_v43 = vmul.f32 %v6021_v0, %v4026_v63  ;;  %v1240_v49 = vmul.f32 %v3799_v51, %v5185_v50  ;;  %v1337_v2 = vmul.f32 %v3803_v57, %v5187_v10  ;;  %v1913_v25 = vpop.f32.mrf.mxu3 }
 0x160   : > { %6022 = vst [vmem:[#allocation17_spill] sm:$0xff] %v5200_v13  ;;  %v2190_v29 = vmul.f32 %v4964_v26, %v4029_v8  ;;  %v2287_v5 = vmul.f32 %v4966_v27, %v4049_v40  ;;  %v1404_v42 = vadd.f32 %v5078_v34, %v1368_v9  ;;  %v883_v55 = vadd.f32 %v851_v32, %v786_v15 }
 0x161   : > { %v2804_v62 = vadd.f32 %v2772_v41, %v2707_v60  ;;  %v2384_v45 = vmul.f32 %v5063_v37, %v4071_v4  ;;  %v2481_v10 = vmul.f32 %v5096_v31, %v4097_v52  ;;  %v2578_v26 = vmul.f32 %v5101_v12, %v4129_v14  ;;  %v3483_v41 = vld [vmem:[%s5850_s6] ss:$0 sm:$0xff] }
 0x162   : > { %v2222_v0 = vadd.f32 %v2190_v29, %v2093_v43  ;;  %v2676_v27 = vmul.f32 %v4132_v61, %v5200_v13  ;;  %v1436_v50 = vmax.f32 %v1404_v42, 0.0  ;;  %v980_v9 = vadd.f32 %v948_v11, %v883_v55  ;;  %v5230_v11 = vld [vmem:[#allocation3 + $0x10a] sm:$0xff] }
 0x163   : > { %v2901_v6 = vadd.f32 %v2869_v59, %v2804_v62  ;;  %v1914_v32 = vadd.f32 %v3483_v41, %v1913_v25  ;;  %v1581_v15 = vadd.f32 %v5073_v22, %v1580_v3  ;;  %v3109_v43 = vadd.f32 %v5068_v54, %v3108_v44  ;;  %v5228_v59 = vld [vmem:[#allocation3 + $0x109] sm:$0xff]  ;;  %6023 = vst [vmem:[#allocation18_spill] sm:$0xff] %v5230_v11 }
 0x164   : > { %v2319_v60 = vadd.f32 %v2287_v5, %v2222_v0  ;;  %v561_v29 = vmul.f32 %v6005_v1, %v3755_v19  ;;  %3375 = vmatmul.msk.f32.gmra.mxu0 %vm421_vm1, %v1436_v50  ;;  %v1077_v42 = vadd.f32 %v1045_v7, %v980_v9  ;;  %v658_v5 = vmul.f32 %v4986_v38, %v3757_v20  ;;  %v5239_v7 = vld [vmem:[#allocation2 + $0x108] sm:$0xff] }
 0x165   : > { %v2937_v13 = vadd.f32 %v4922_v56, %v2901_v6  ;;  %v1949_v62 = vmax.f32 %v1914_v32, 0.0  ;;  %v1672_v3 = vmax.f32 %v1581_v15, 0.0  ;;  %v3200_v25 = vmax.f32 %v3109_v43, 0.0  ;;  %6024 = vst [vmem:[#allocation23_spill] sm:$0xff] %v5239_v7  ;;  %v6027_v15 = vld [vmem:[#allocation15_spill] sm:$0xff] }
 0x166   : > { %v2416_v55 = vadd.f32 %v2384_v45, %v2319_v60  ;;  %v755_v44 = vmul.f32 %v4995_v35, %v3761_v21  ;;  %v1175_v0 = vadd.f32 %v1143_v28, %v1077_v42  ;;  %v690_v6 = vadd.f32 %v658_v5, %v561_v29  ;;  %v5245_v35 = vld [vmem:[#allocation2 + $0x109] sm:$0xff] }
 0x167   : > { %v2969_v1 = vmax.f32 %v2937_v13, 0.0  ;;  %2040 = vst.msk [vmem:[#allocation3 + $0x181] sm:$0xff] %vm1953_vm3, %v1949_v62  ;;  %v852_v50 = vmul.f32 %v5118_v48, %v3767_v24  ;;  %v2773_v38 = vmul.f32 %v4235_v58, %v5228_v59  ;;  %v2870_v45 = vmul.f32 %v4865_v53, %v5230_v11  ;;  %v5247_v28 = vld [vmem:[#allocation2 + $0x10a] sm:$0xff] }
 0x168   : > { %v2513_v9 = vadd.f32 %v2481_v10, %v2416_v55  ;;  %v3232_v32 = vadd.f32 %v3200_v25, %v1672_v3  ;;  %6025 = vst [vmem:[#allocation22_spill] sm:$0xff] %v5245_v35  ;;  %v1272_v13 = vadd.f32 %v1240_v49, %v1175_v0  ;;  %v787_v60 = vadd.f32 %v755_v44, %v690_v6  ;;  %v6028_v10 = vld [vmem:[#allocation14_spill] sm:$0xff]  ;;  %v6029_v55 = vld [vmem:[#allocation5_spill] sm:$0xff]  ;;  %v1916_v0 = vpop.f32.mrf.mxu3 }
 0x169   : > { %6026 = vst [vmem:[#allocation26_spill] sm:$0xff] %v5247_v28  ;;  %3441 = vmatmul.msk.f32.gmra.mxu2 %vm1953_vm3, %v2969_v1  ;;  %v949_v43 = vmul.f32 %v6027_v15, %v3784_v33  ;;  %v1046_v29 = vmul.f32 %v6028_v10, %v3789_v39  ;;  %v1144_v62 = vmul.f32 %v3796_v46, %v5239_v7 }
 0x16a   : > { %v2610_v42 = vadd.f32 %v2578_v26, %v2513_v9  ;;  %3264 = vst.msk [vmem:[%s5109_s27 + $0x10] sm:$0xff] %vm1953_vm3, %v3232_v32  ;;  %v2094_v5 = vmul.f32 %v5010_v30, %v4026_v63  ;;  %v2191_v3 = vmul.f32 %v6029_v55, %v4029_v8  ;;  %v1369_v49 = vadd.f32 %v1337_v2, %v1272_v13  ;;  %v5266_v26 = vld [vmem:[#allocation3 + $0x110] sm:$0xff]  ;;  %v1583_v55 = vpop.f32.mrf.mxu0  ;;  %v3111_v2 = vpop.f32.mrf.mxu2 }
 0x16b   : > { %v884_v25 = vadd.f32 %v852_v50, %v787_v60  ;;  %v1241_v44 = vmul.f32 %v3799_v51, %v5245_v35  ;;  %v1338_v1 = vmul.f32 %v3803_v57, %v5247_v28  ;;  %6030 = vst [vmem:[#allocation15_spill] sm:$0xff] %v5266_v26  ;;  %v2288_v32 = vmul.f32 %v6009_v17, %v4049_v40  ;;  %v6031_v30 = vld [vmem:[#allocation24_spill] sm:$0xff] }
 0x16c   : > { %v2708_v6 = vadd.f32 %v2676_v27, %v2610_v42  ;;  %v2223_v9 = vadd.f32 %v2191_v3, %v2094_v5  ;;  %v2385_v7 = vmul.f32 %v6031_v30, %v4071_v4  ;;  %v1405_v50 = vadd.f32 %v5078_v34, %v1369_v49  ;;  %v5279_v30 = vld [vmem:[#allocation3 + $0x111] sm:$0xff] }
 0x16d   : > { %v981_v13 = vadd.f32 %v949_v43, %v884_v25  ;;  %v2482_v60 = vmul.f32 %v5164_v36, %v4097_v52  ;;  %v2579_v28 = vmul.f32 %v5166_v23, %v4129_v14  ;;  %v2677_v42 = vmul.f32 %v4132_v61, %v5266_v26  ;;  %6032 = vst [vmem:[#allocation5_spill] sm:$0xff] %v5279_v30 }
 0x16e   : > { %v2805_v35 = vadd.f32 %v2773_v38, %v2708_v6  ;;  %v2320_v27 = vadd.f32 %v2288_v32, %v2223_v9  ;;  %v1917_v17 = vadd.f32 %v3483_v41, %v1916_v0  ;;  %v1437_v5 = vmax.f32 %v1405_v50, 0.0  ;;  %v5286_v6 = vld [vmem:[#allocation3 + $0x112] sm:$0xff] }
 0x16f   : > { %v1078_v3 = vadd.f32 %v1046_v29, %v981_v13  ;;  %v1584_v10 = vadd.f32 %v5073_v22, %v1583_v55  ;;  %v3112_v43 = vadd.f32 %v5068_v54, %v3111_v2  ;;  %v562_v23 = vmul.f32 %v6016_v16, %v3755_v19  ;;  %6033 = vst [vmem:[#allocation27_spill] sm:$0xff] %v5286_v6  ;;  %v6035_v55 = vld [vmem:[#allocation19_spill] sm:$0xff] }
 0x170   : > { %v2902_v49 = vadd.f32 %v2870_v45, %v2805_v35  ;;  %v2417_v25 = vadd.f32 %v2385_v7, %v2320_v27  ;;  %v1950_v36 = vmax.f32 %v1917_v17, 0.0  ;;  %3376 = vmatmul.msk.f32.gmra.mxu0 %vm421_vm1, %v1437_v5  ;;  %v659_v29 = vmul.f32 %v6019_v18, %v3757_v20  ;;  %v5296_v45 = vld [vmem:[#allocation2 + $0x110] sm:$0xff] }
 0x171   : > { %v1176_v38 = vadd.f32 %v1144_v62, %v1078_v3  ;;  %v1673_v41 = vmax.f32 %v1584_v10, 0.0  ;;  %v3201_v0 = vmax.f32 %v3112_v43, 0.0  ;;  %v2774_v7 = vmul.f32 %v4235_v58, %v5279_v30  ;;  %6034 = vst [vmem:[#allocation28_spill] sm:$0xff] %v5296_v45  ;;  %v5306_v17 = vld [vmem:[#allocation2 + $0x112] sm:$0xff] }
 0x172   : > { %v2938_v9 = vadd.f32 %v4922_v56, %v2902_v49  ;;  %v2514_v32 = vadd.f32 %v2482_v60, %v2417_v25  ;;  %2041 = vst.msk [vmem:[#allocation3 + $0x189] sm:$0xff] %vm1953_vm3, %v1950_v36  ;;  %v756_v16 = vmul.f32 %v6020_v47, %v3761_v21  ;;  %v691_v62 = vadd.f32 %v659_v29, %v562_v23  ;;  %v6036_v60 = vld [vmem:[#allocation20_spill] sm:$0xff]  ;;  %v5304_v36 = vld [vmem:[#allocation2 + $0x111] sm:$0xff]  ;;  %v6039_v23 = vld [vmem:[#allocation21_spill] sm:$0xff]  ;;  %v1586_v29 = vpop.f32.mrf.mxu0 }
 0x173   : > { %v1273_v35 = vadd.f32 %v1241_v44, %v1176_v38  ;;  %v3233_v10 = vadd.f32 %v3201_v0, %v1673_v41  ;;  %v853_v18 = vmul.f32 %v6035_v55, %v3767_v24  ;;  %v2871_v13 = vmul.f32 %v4865_v53, %v5286_v6  ;;  %6037 = vst [vmem:[#allocation19_spill] sm:$0xff] %v5304_v36  ;;  %v5321_v25 = vld [vmem:[#allocation3 + $0x120] sm:$0xff] }
 0x174   : > { %v2970_v2 = vmax.f32 %v2938_v9, 0.0  ;;  %v2611_v50 = vadd.f32 %v2579_v28, %v2514_v32  ;;  %v950_v27 = vmul.f32 %v6036_v60, %v3784_v33  ;;  %6038 = vst [vmem:[#allocation20_spill] sm:$0xff] %v5306_v17  ;;  %v788_v44 = vadd.f32 %v756_v16, %v691_v62  ;;  %v3114_v9 = vpop.f32.mrf.mxu2 }
 0x175   : > { %v1370_v47 = vadd.f32 %v1338_v1, %v1273_v35  ;;  %3265 = vst.msk [vmem:[%s5109_s27 + $0x18] sm:$0xff] %vm1953_vm3, %v3233_v10  ;;  %v1047_v5 = vmul.f32 %v6039_v23, %v3789_v39  ;;  %v1145_v28 = vmul.f32 %v3796_v46, %v5296_v45  ;;  %v2095_v43 = vmul.f32 %v5063_v37, %v4026_v63 }
 0x176   : > { %3442 = vmatmul.msk.f32.gmra.mxu2 %vm1953_vm3, %v2970_v2  ;;  %v2709_v3 = vadd.f32 %v2677_v42, %v2611_v50  ;;  %v2192_v49 = vmul.f32 %v5096_v31, %v4029_v8  ;;  %v2289_v1 = vmul.f32 %v5101_v12, %v4049_v40  ;;  %v885_v41 = vadd.f32 %v853_v18, %v788_v44  ;;  %v6040_v31 = vld [vmem:[#allocation17_spill] sm:$0xff] }
 0x177   : > { %v1406_v38 = vadd.f32 %v5078_v34, %v1370_v47  ;;  %v1242_v0 = vmul.f32 %v3799_v51, %v5304_v36  ;;  %v1339_v42 = vmul.f32 %v3803_v57, %v5306_v17  ;;  %v2386_v16 = vmul.f32 %v6040_v31, %v4071_v4  ;;  %v5336_v47 = vld [vmem:[#allocation3 + $0x121] sm:$0xff] }
 0x178   : > { %v2806_v37 = vadd.f32 %v2774_v7, %v2709_v3  ;;  %v2224_v32 = vadd.f32 %v2192_v49, %v2095_v43  ;;  %v2483_v12 = vmul.f32 %v5228_v59, %v4097_v52  ;;  %v982_v10 = vadd.f32 %v950_v27, %v885_v41  ;;  %v5341_v43 = vld [vmem:[#allocation3 + $0x122] sm:$0xff] }
 0x179   : > { %v1438_v35 = vmax.f32 %v1406_v38, 0.0  ;;  %v2580_v62 = vmul.f32 %v5230_v11, %v4129_v14  ;;  %v2678_v18 = vmul.f32 %v4132_v61, %v5321_v25  ;;  %v1587_v7 = vadd.f32 %v5073_v22, %v1586_v29 }
 0x17a   : > { %v2903_v2 = vadd.f32 %v2871_v13, %v2806_v37  ;;  %v2321_v50 = vadd.f32 %v2289_v1, %v2224_v32  ;;  %v3115_v44 = vadd.f32 %v5068_v54, %v3114_v9  ;;  %v1079_v3 = vadd.f32 %v1047_v5, %v982_v10  ;;  %v6041_v13 = vld [vmem:[#allocation14_spill] sm:$0xff]  ;;  %v5354_v10 = vld [vmem:[#allocation2 + $0x120] sm:$0xff] }
 0x17b   : > { %3377 = vmatmul.msk.f32.gmra.mxu0 %vm421_vm1, %v1438_v35  ;;  %v563_v27 = vmul.f32 %v5118_v48, %v3755_v19  ;;  %v660_v49 = vmul.f32 %v6027_v15, %v3757_v20  ;;  %v757_v1 = vmul.f32 %v6041_v13, %v3761_v21  ;;  %v1674_v29 = vmax.f32 %v1587_v7, 0.0  ;;  %v6042_v35 = vld [vmem:[#allocation23_spill] sm:$0xff]  ;;  %6043 = vst [vmem:[#allocation21_spill] sm:$0xff] %v5354_v10  ;;  %v6045_v7 = vld [vmem:[#allocation22_spill] sm:$0xff] }
 0x17c   : > { %v2939_v38 = vadd.f32 %v4922_v56, %v2903_v2  ;;  %v2418_v41 = vadd.f32 %v2386_v16, %v2321_v50  ;;  %v3202_v37 = vmax.f32 %v3115_v44, 0.0  ;;  %v1177_v9 = vadd.f32 %v1145_v28, %v1079_v3  ;;  %v5358_v16 = vld [vmem:[#allocation2 + $0x121] sm:$0xff]  ;;  %v6046_v3 = vld [vmem:[#allocation26_spill] sm:$0xff] }
 0x17d   : > { %v2775_v5 = vmul.f32 %v4235_v58, %v5336_v47  ;;  %v692_v32 = vadd.f32 %v660_v49, %v563_v27  ;;  %v854_v48 = vmul.f32 %v6042_v35, %v3767_v24  ;;  %v2872_v13 = vmul.f32 %v4865_v53, %v5341_v43  ;;  %6044 = vst [vmem:[#allocation17_spill] sm:$0xff] %v5358_v16  ;;  %v5364_v49 = vld [vmem:[#allocation2 + $0x122] sm:$0xff] }
 0x17e   : > { %v2971_v15 = vmax.f32 %v2939_v38, 0.0  ;;  %v2515_v11 = vadd.f32 %v2483_v12, %v2418_v41  ;;  %v3234_v2 = vadd.f32 %v3202_v37, %v1674_v29  ;;  %v1274_v50 = vadd.f32 %v1242_v0, %v1177_v9  ;;  %6047 = vst [vmem:[#allocation14_spill] sm:$0xff] %v5364_v49  ;;  %v6048_v12 = vld [vmem:[#allocation24_spill] sm:$0xff]  ;;  %v6049_v37 = vld [vmem:[#allocation13_spill] sm:$0xff] }
 0x17f   : > { %v789_v28 = vadd.f32 %v757_v1, %v692_v32  ;;  %v951_v44 = vmul.f32 %v6045_v7, %v3784_v33  ;;  %v1048_v27 = vmul.f32 %v6046_v3, %v3789_v39  ;;  %v1146_v53 = vmul.f32 %v3796_v46, %v5354_v10  ;;  %v5377_v32 = vld [vmem:[#allocation3 + $0x128] sm:$0xff] }
 0x180   : > { %3443 = vmatmul.msk.f32.gmra.mxu2 %vm1953_vm3, %v2971_v15  ;;  %v2612_v38 = vadd.f32 %v2580_v62, %v2515_v11  ;;  %3266 = vst.msk [vmem:[%s5109_s27 + $0x20] sm:$0xff] %vm1953_vm3, %v3234_v2  ;;  %v2096_v0 = vmul.f32 %v6048_v12, %v4026_v63  ;;  %v1371_v1 = vadd.f32 %v1339_v42, %v1274_v50  ;;  %v1589_v15 = vpop.f32.mrf.mxu0  ;;  %v6050_v2 = vld [vmem:[#allocation25_spill] sm:$0xff]  ;;  %v5393_v7 = vld [vmem:[#allocation3 + $0x129] sm:$0xff] }
 0x181   : > { %v886_v41 = vadd.f32 %v854_v48, %v789_v28  ;;  %v1243_v29 = vmul.f32 %v3799_v51, %v5358_v16  ;;  %v2193_v9 = vmul.f32 %v6049_v37, %v4029_v8  ;;  %v1340_v62 = vmul.f32 %v3803_v57, %v5364_v49  ;;  %v3117_v48 = vpop.f32.mrf.mxu2 }
 0x182   : > { %v2710_v11 = vadd.f32 %v2678_v18, %v2612_v38  ;;  %v2290_v10 = vmul.f32 %v6050_v2, %v4049_v40  ;;  %v2387_v42 = vmul.f32 %v5266_v26, %v4071_v4  ;;  %v1407_v50 = vadd.f32 %v5078_v34, %v1371_v1  ;;  %v5395_v1 = vld [vmem:[#allocation3 + $0x12a] sm:$0xff] }
 0x183   : > { %v983_v28 = vadd.f32 %v951_v44, %v886_v41  ;;  %v2225_v12 = vadd.f32 %v2193_v9, %v2096_v0  ;;  %v2484_v37 = vmul.f32 %v5279_v30, %v4097_v52  ;;  %v2581_v18 = vmul.f32 %v5286_v6, %v4129_v14  ;;  %v5427_v30 = vld [vmem:[#allocation3 + $0x150] sm:$0xff] }
 0x184   : > { %v2807_v16 = vadd.f32 %v2775_v5, %v2710_v11  ;;  %v2679_v38 = vmul.f32 %v4132_v61, %v5377_v32  ;;  %v1590_v2 = vadd.f32 %v5073_v22, %v1589_v15  ;;  %v1439_v49 = vmax.f32 %v1407_v50, 0.0  ;;  %v5405_v50 = vld [vmem:[#allocation3 + $0x13a] sm:$0xff] }
 0x185   : > { %v1080_v3 = vadd.f32 %v1048_v27, %v983_v28  ;;  %v2322_v26 = vadd.f32 %v2290_v10, %v2225_v12  ;;  %v3118_v44 = vadd.f32 %v5068_v54, %v3117_v48  ;;  %v2099_v5 = vmul.f32 %v5321_v25, %v4026_v63  ;;  %v5421_v12 = vld [vmem:[#allocation3 + $0x139] sm:$0xff] }
 0x186   : > { %v2904_v0 = vadd.f32 %v2872_v13, %v2807_v16  ;;  %v1675_v41 = vmax.f32 %v1590_v2, 0.0  ;;  %v2196_v9 = vmul.f32 %v5336_v47, %v4029_v8  ;;  %3378 = vmatmul.msk.f32.gmra.mxu0 %vm421_vm1, %v1439_v49  ;;  %v2293_v10 = vmul.f32 %v5341_v43, %v4049_v40  ;;  %v5413_v16 = vld [vmem:[%s5851_s7 + $0x8] ss:$0 sm:$0xff] }
 0x187   : > { %v1178_v15 = vadd.f32 %v1146_v53, %v1080_v3  ;;  %v2419_v11 = vadd.f32 %v2387_v42, %v2322_v26  ;;  %v3203_v27 = vmax.f32 %v3118_v44, 0.0  ;;  %v2776_v13 = vmul.f32 %v4235_v58, %v5393_v7  ;;  %v5417_v49 = vld [vmem:[#allocation3 + $0x138] sm:$0xff] }
 0x188   : > { %v2940_v48 = vadd.f32 %v4922_v56, %v2904_v0  ;;  %v2873_v26 = vmul.f32 %v5413_v16, %v5395_v1  ;;  %v2228_v3 = vadd.f32 %v2196_v9, %v2099_v5  ;;  %v2390_v56 = vmul.f32 %v4071_v4, %v5417_v49 }
 0x189   : > { %v1275_v53 = vadd.f32 %v1243_v29, %v1178_v15  ;;  %v2516_v42 = vadd.f32 %v2484_v37, %v2419_v11  ;;  %v3235_v28 = vadd.f32 %v3203_v27, %v1675_v41  ;;  %v2487_v0 = vmul.f32 %v4097_v52, %v5421_v12  ;;  %v5433_v37 = vld [vmem:[#allocation3 + $0x151] sm:$0xff] }
 0x18a   : > { %v2972_v2 = vmax.f32 %v2940_v48, 0.0  ;;  %v2325_v44 = vadd.f32 %v2293_v10, %v2228_v3  ;;  %v2584_v6 = vmul.f32 %v4129_v14, %v5405_v50  ;;  %v2682_v29 = vmul.f32 %v4132_v61, %v5427_v30  ;;  %6051 = vst [vmem:[#allocation23_spill] sm:$0xff] %v5433_v37  ;;  %v5440_v27 = vld [vmem:[#allocation3 + $0x152] sm:$0xff]  ;;  %v1592_v48 = vpop.f32.mrf.mxu0  ;;  %v3120_v3 = vpop.f32.mrf.mxu2 }
 0x18b   : > { %v1372_v5 = vadd.f32 %v1340_v62, %v1275_v53  ;;  %v2613_v9 = vadd.f32 %v2581_v18, %v2516_v42  ;;  %3267 = vst.msk [vmem:[%s5109_s27 + $0x28] sm:$0xff] %vm1953_vm3, %v3235_v28  ;;  %v564_v41 = vmul.f32 %v6035_v55, %v3755_v19  ;;  %v2779_v11 = vmul.f32 %v4235_v58, %v5433_v37  ;;  %v5446_v10 = vld [vmem:[#allocation2 + $0x128] sm:$0xff] }
 0x18c   : > { %3444 = vmatmul.msk.f32.gmra.mxu2 %vm1953_vm3, %v2972_v2  ;;  %v2422_v15 = vadd.f32 %v2390_v56, %v2325_v44  ;;  %v661_v62 = vmul.f32 %v6036_v60, %v3757_v20  ;;  %v758_v18 = vmul.f32 %v6039_v23, %v3761_v21  ;;  %6052 = vst [vmem:[#allocation24_spill] sm:$0xff] %v5446_v10  ;;  %v5457_v44 = vld [vmem:[#allocation2 + $0x129] sm:$0xff] }
 0x18d   : > { %v1408_v55 = vadd.f32 %v5078_v34, %v1372_v5  ;;  %v2711_v53 = vadd.f32 %v2679_v38, %v2613_v9  ;;  %v2876_v42 = vmul.f32 %v5413_v16, %v5440_v27  ;;  %v855_v28 = vmul.f32 %v5296_v45, %v3767_v24  ;;  %6053 = vst [vmem:[#allocation13_spill] sm:$0xff] %v5457_v44  ;;  %v5459_v37 = vld [vmem:[#allocation2 + $0x12a] sm:$0xff] }
 0x18e   : > { %v2519_v56 = vadd.f32 %v2487_v0, %v2422_v15  ;;  %v693_v2 = vadd.f32 %v661_v62, %v564_v41  ;;  %v952_v60 = vmul.f32 %v5304_v36, %v3784_v33  ;;  %v1049_v23 = vmul.f32 %v5306_v17, %v3789_v39  ;;  %6054 = vst [vmem:[#allocation25_spill] sm:$0xff] %v5459_v37  ;;  %v6055_v62 = vld [vmem:[#allocation18_spill] sm:$0xff] }
 0x18f   : > { %v1440_v5 = vmax.f32 %v1408_v55, 0.0  ;;  %v2808_v38 = vadd.f32 %v2776_v13, %v2711_v53  ;;  %v1147_v9 = vmul.f32 %v3796_v46, %v5446_v10  ;;  %v2097_v45 = vmul.f32 %v6040_v31, %v4026_v63 }
 0x190   : > { %v2616_v0 = vadd.f32 %v2584_v6, %v2519_v56  ;;  %v790_v41 = vadd.f32 %v758_v18, %v693_v2  ;;  %v2194_v15 = vmul.f32 %v5228_v59, %v4029_v8  ;;  %v2291_v17 = vmul.f32 %v6055_v62, %v4049_v40  ;;  %v5481_v56 = vld [vmem:[%s5852_s8] ss:$0 sm:$0xff] }
 0x191   : > { %3379 = vmatmul.msk.f32.gmra.mxu0 %vm421_vm1, %v1440_v5  ;;  %v2905_v36 = vadd.f32 %v2873_v26, %v2808_v38  ;;  %v1244_v13 = vmul.f32 %v3799_v51, %v5457_v44  ;;  %v1341_v55 = vmul.f32 %v3803_v57, %v5459_v37  ;;  %v2388_v31 = vmul.f32 %v5321_v25, %v4071_v4  ;;  %v5494_v44 = vld [vmem:[#allocation3 + $0x140] sm:$0xff] }
 0x192   : > { %v2714_v6 = vadd.f32 %v2682_v29, %v2616_v0  ;;  %v887_v18 = vadd.f32 %v855_v28, %v790_v41  ;;  %v2226_v53 = vadd.f32 %v2194_v15, %v2097_v45  ;;  %v2485_v59 = vmul.f32 %v5336_v47, %v4097_v52 }
 0x193   : > { %v2941_v26 = vadd.f32 %v5481_v56, %v2905_v36  ;;  %v2582_v2 = vmul.f32 %v5341_v43, %v4129_v14  ;;  %v2680_v5 = vmul.f32 %v4132_v61, %v5417_v49  ;;  %v1593_v25 = vadd.f32 %v5073_v22, %v1592_v48  ;;  %v5496_v48 = vpop.f32.mrf.mxu0 }
 0x194   : > { %v2811_v29 = vadd.f32 %v2779_v11, %v2714_v6  ;;  %v984_v45 = vadd.f32 %v952_v60, %v887_v18  ;;  %v2323_v28 = vadd.f32 %v2291_v17, %v2226_v53  ;;  %v3121_v47 = vadd.f32 %v5068_v54, %v3120_v3  ;;  %v5498_v11 = vpop.f32.mrf.mxu2  ;;  %v5508_v53 = vld [vmem:[#allocation3 + $0x141] sm:$0xff] }
 0x195   : > { %v2973_v38 = vmax.f32 %v2941_v26, 0.0  ;;  %v1676_v0 = vmax.f32 %v1593_v25, 0.0  ;;  %v2100_v41 = vmul.f32 %v5377_v32, %v4026_v63  ;;  %v2197_v36 = vmul.f32 %v5393_v7, %v4029_v8  ;;  %v5510_v26 = vld [vmem:[#allocation3 + $0x142] sm:$0xff] }
 0x196   : > { %v2908_v15 = vadd.f32 %v2876_v42, %v2811_v29  ;;  %v1081_v43 = vadd.f32 %v1049_v23, %v984_v45  ;;  %v2420_v62 = vadd.f32 %v2388_v31, %v2323_v28  ;;  %v3204_v37 = vmax.f32 %v3121_v47, 0.0  ;;  %v5518_v47 = vld [vmem:[#allocation3 + $0x158] sm:$0xff] }
 0x197   : > { %3445 = vmatmul.msk.f32.gmra.mxu2 %vm1953_vm3, %v2973_v38  ;;  %v2777_v17 = vmul.f32 %v4235_v58, %v5421_v12  ;;  %v2874_v3 = vmul.f32 %v5413_v16, %v5405_v50  ;;  %v2229_v60 = vadd.f32 %v2197_v36, %v2100_v41  ;;  %v2294_v42 = vmul.f32 %v5395_v1, %v4049_v40  ;;  %v5524_v41 = vld [vmem:[#allocation3 + $0x159] sm:$0xff] }
 0x198   : > { %v2944_v23 = vadd.f32 %v5481_v56, %v2908_v15  ;;  %v1179_v31 = vadd.f32 %v1147_v9, %v1081_v43  ;;  %v2517_v6 = vadd.f32 %v2485_v59, %v2420_v62  ;;  %v3236_v18 = vadd.f32 %v3204_v37, %v1676_v0  ;;  %6056 = vst [vmem:[#allocation18_spill] sm:$0xff] %v5518_v47  ;;  %v5526_v36 = vld [vmem:[#allocation3 + $0x15a] sm:$0xff] }
 0x199   : > { %v2326_v25 = vadd.f32 %v2294_v42, %v2229_v60  ;;  %v2391_v29 = vmul.f32 %v4071_v4, %v5494_v44  ;;  %v2488_v45 = vmul.f32 %v4097_v52, %v5508_v53  ;;  %v2585_v28 = vmul.f32 %v4129_v14, %v5510_v26  ;;  %6057 = vst [vmem:[#allocation29_spill] sm:$0xff] %v5524_v41  ;;  %v6059_v43 = vld [vmem:[#allocation22_spill] sm:$0xff] }
 0x19a   : > { %v2976_v38 = vmax.f32 %v2944_v23, 0.0  ;;  %v1276_v9 = vadd.f32 %v1244_v13, %v1179_v31  ;;  %v2614_v59 = vadd.f32 %v2582_v2, %v2517_v6  ;;  %3268 = vst.msk [vmem:[%s5109_s27 + $0x30] sm:$0xff] %vm1953_vm3, %v3236_v18  ;;  %v2683_v37 = vmul.f32 %v4132_v61, %v5518_v47  ;;  %v6060_v60 = vld [vmem:[#allocation26_spill] sm:$0xff]  ;;  %v1115_v2 = vld [vmem:[#allocation2 + $0x138] sm:$0xff] }
 0x19b   : > { %v2423_v0 = vadd.f32 %v2391_v29, %v2326_v25  ;;  %6058 = vst [vmem:[#allocation30_spill] sm:$0xff] %v5526_v36  ;;  %v565_v15 = vmul.f32 %v6042_v35, %v3755_v19  ;;  %v662_v62 = vmul.f32 %v6059_v43, %v3757_v20  ;;  %v759_v13 = vmul.f32 %v6060_v60, %v3761_v21  ;;  %v6061_v35 = vld [vmem:[#allocation21_spill] sm:$0xff]  ;;  %v1212_v60 = vld [vmem:[#allocation2 + $0x139] sm:$0xff] }
 0x19c   : > { %3448 = vmatmul.msk.f32.vlgmr.msra.gmra.mxu3 %vm1953_vm3, %v2976_v38  ;;  %v1373_v42 = vadd.f32 %v1341_v55, %v1276_v9  ;;  %v2712_v23 = vadd.f32 %v2680_v5, %v2614_v59  ;;  %v2780_v31 = vmul.f32 %v4235_v58, %v5524_v41  ;;  %v2877_v6 = vmul.f32 %v5413_v16, %v5526_v36  ;;  %v6062_v43 = vld [vmem:[#allocation17_spill] sm:$0xff]  ;;  %v6063_v55 = vld [vmem:[#allocation14_spill] sm:$0xff]  ;;  %v1309_v36 = vld [vmem:[#allocation2 + $0x13a] sm:$0xff] }
 0x19d   : > { %v2520_v18 = vadd.f32 %v2488_v45, %v2423_v0  ;;  %v694_v25 = vadd.f32 %v662_v62, %v565_v15  ;;  %v856_v29 = vmul.f32 %v6061_v35, %v3767_v24  ;;  %v953_v47 = vmul.f32 %v6062_v43, %v3784_v33  ;;  %v6064_v45 = vld [vmem:[#allocation15_spill] sm:$0xff]  ;;  %v6065_v15 = vld [vmem:[#allocation5_spill] sm:$0xff] }
 0x19e   : > { %v1409_v10 = vadd.f32 %v5078_v34, %v1373_v42  ;;  %v2809_v38 = vadd.f32 %v2777_v17, %v2712_v23  ;;  %v1050_v5 = vmul.f32 %v6063_v55, %v3789_v39  ;;  %v1148_v9 = vmul.f32 %v3796_v46, %v1115_v2  ;;  %v6066_v17 = vld [vmem:[#allocation27_spill] sm:$0xff]  ;;  %v5554_v23 = vpop.f32.mrf.mxu0  ;;  %v5556_v55 = vpop.f32.mrf.mxu2 }
 0x19f   : > { %v2617_v59 = vadd.f32 %v2585_v28, %v2520_v18  ;;  %v791_v41 = vadd.f32 %v759_v13, %v694_v25  ;;  %v2098_v0 = vmul.f32 %v6064_v45, %v4026_v63  ;;  %v2195_v62 = vmul.f32 %v6065_v15, %v4029_v8 }
 0x1a0   : > { %v1441_v35 = vmax.f32 %v1409_v10, 0.0  ;;  %v2906_v43 = vadd.f32 %v2874_v3, %v2809_v38  ;;  %v1245_v33 = vmul.f32 %v3799_v51, %v1212_v60  ;;  %v2292_v42 = vmul.f32 %v6066_v17, %v4049_v40 }
 0x1a1   : > { %v2715_v28 = vadd.f32 %v2683_v37, %v2617_v59  ;;  %v888_v13 = vadd.f32 %v856_v29, %v791_v41  ;;  %v2227_v2 = vadd.f32 %v2195_v62, %v2098_v0  ;;  %v2389_v18 = vmul.f32 %v5377_v32, %v4071_v4 }
 0x1a2   : > { %3380 = vmatmul.msk.f32.gmra.mxu0 %vm421_vm1, %v1441_v35  ;;  %v2942_v10 = vadd.f32 %v5481_v56, %v2906_v43  ;;  %v1342_v3 = vmul.f32 %v3803_v57, %v1309_v36  ;;  %v2486_v25 = vmul.f32 %v5393_v7, %v4097_v52  ;;  %v2583_v60 = vmul.f32 %v5395_v1, %v4129_v14 }
 0x1a3   : > { %v2812_v38 = vadd.f32 %v2780_v31, %v2715_v28  ;;  %v985_v45 = vadd.f32 %v953_v47, %v888_v13  ;;  %v2324_v37 = vadd.f32 %v2292_v42, %v2227_v2  ;;  %v2681_v41 = vmul.f32 %v4132_v61, %v5494_v44 }
 0x1a4   : > { %v2974_v29 = vmax.f32 %v2942_v10, 0.0  ;;  %v1596_v32 = vadd.f32 %v5073_v22, %v5496_v48  ;;  %v3124_v59 = vadd.f32 %v5068_v54, %v5498_v11  ;;  %v2101_v36 = vmul.f32 %v5417_v49, %v4026_v63  ;;  %v5597_v10 = vld [vmem:[#allocation3 + $0x16a] sm:$0xff] }
 0x1a5   : > { %v2909_v7 = vadd.f32 %v2877_v6, %v2812_v38  ;;  %v1082_v0 = vadd.f32 %v1050_v5, %v985_v45  ;;  %v2421_v15 = vadd.f32 %v2389_v18, %v2324_v37  ;;  %v2198_v1 = vmul.f32 %v5421_v12, %v4029_v8  ;;  %v5583_v6 = vld [vmem:[#allocation3 + $0x168] sm:$0xff]  ;;  %v6068_v45 = vld [vmem:[#allocation28_spill] sm:$0xff] }
 0x1a6   : > { %3446 = vmatmul.msk.f32.gmra.mxu2 %vm1953_vm3, %v2974_v29  ;;  %v1677_v47 = vmax.f32 %v1596_v32, 0.0  ;;  %v3205_v31 = vmax.f32 %v3124_v59, 0.0  ;;  %v2295_v62 = vmul.f32 %v5405_v50, %v4049_v40  ;;  %v2392_v22 = vmul.f32 %v5427_v30, %v4071_v4  ;;  %v6067_v50 = vld [vmem:[#allocation23_spill] sm:$0xff]  ;;  %v5591_v17 = vpop.f32.mrf.mxu0  ;;  %v5593_v42 = vpop.f32.mrf.mxu2 }
 0x1a7   : > { %v2945_v54 = vadd.f32 %v5481_v56, %v2909_v7  ;;  %v1180_v48 = vadd.f32 %v1148_v9, %v1082_v0  ;;  %v2518_v49 = vadd.f32 %v2486_v25, %v2421_v15  ;;  %v2230_v11 = vadd.f32 %v2198_v1, %v2101_v36  ;;  %v5595_v18 = vld [vmem:[#allocation3 + $0x169] sm:$0xff] }
 0x1a8   : > { %v2778_v12 = vmul.f32 %v4235_v58, %v5508_v53  ;;  %v2875_v5 = vmul.f32 %v5413_v16, %v5510_v26  ;;  %v3237_v35 = vadd.f32 %v3205_v31, %v1677_v47  ;;  %v2489_v43 = vmul.f32 %v6067_v50, %v4097_v52  ;;  %v6069_v29 = vld [vmem:[#allocation19_spill] sm:$0xff]  ;;  %v6070_v36 = vld [vmem:[#allocation20_spill] sm:$0xff] }
 0x1a9   : > { %v2977_v9 = vmax.f32 %v2945_v54, 0.0  ;;  %v1277_v28 = vadd.f32 %v1245_v33, %v1180_v48  ;;  %v2615_v13 = vadd.f32 %v2583_v60, %v2518_v49  ;;  %v2327_v2 = vadd.f32 %v2295_v62, %v2230_v11  ;;  %v1116_v0 = vld [vmem:[#allocation2 + $0x140] sm:$0xff] }
 0x1aa   : > { %3269 = vst.msk [vmem:[%s5109_s27 + $0x38] sm:$0xff] %vm1953_vm3, %v3237_v35  ;;  %v2586_v25 = vmul.f32 %v5440_v27, %v4129_v14  ;;  %v2684_v38 = vmul.f32 %v4132_v61, %v5583_v6  ;;  %v566_v37 = vmul.f32 %v6068_v45, %v3755_v19  ;;  %v663_v33 = vmul.f32 %v6069_v29, %v3757_v20  ;;  %v6071_v19 = vld [vmem:[#allocation24_spill] sm:$0xff] }
 0x1ab   : > { %3449 = vmatmul.msk.f32.gmra.mxu3 %vm1953_vm3, %v2977_v9  ;;  %v1374_v60 = vadd.f32 %v1342_v3, %v1277_v28  ;;  %v2713_v32 = vadd.f32 %v2681_v41, %v2615_v13  ;;  %v2424_v59 = vadd.f32 %v2392_v22, %v2327_v2  ;;  %v760_v7 = vmul.f32 %v6070_v36, %v3761_v21  ;;  %v6072_v41 = vld [vmem:[#allocation7_spill] sm:$0xff]  ;;  %v6073_v22 = vld [vmem:[#allocation13_spill] sm:$0xff]  ;;  %v5627_v35 = vld [vmem:[%s5848_s4] ss:$0 sm:$0xff] }
 0x1ac   : > { %v2781_v15 = vmul.f32 %v4235_v58, %v5595_v18  ;;  %v2878_v1 = vmul.f32 %v5413_v16, %v5597_v10  ;;  %v695_v47 = vadd.f32 %v663_v33, %v566_v37  ;;  %v857_v31 = vmul.f32 %v6071_v19, %v3767_v24  ;;  %v6074_v21 = vld [vmem:[#allocation25_spill] sm:$0xff]  ;;  %v5634_v28 = vld [vmem:[%s5854_s10] ss:$0 sm:$0xff] }
 0x1ad   : > { %v1410_v20 = vadd.f32 %v5078_v34, %v1374_v60  ;;  %v2810_v62 = vadd.f32 %v2778_v12, %v2713_v32  ;;  %v2521_v3 = vadd.f32 %v2489_v43, %v2424_v59  ;;  %v954_v54 = vmul.f32 %v6073_v22, %v6072_v41  ;;  %v1213_v9 = vld [vmem:[#allocation2 + $0x141] sm:$0xff] }
 0x1ae   : > { %v792_v48 = vadd.f32 %v760_v7, %v695_v47  ;;  %v1051_v49 = vmul.f32 %v6074_v21, %v3789_v39  ;;  %v1149_v11 = vmul.f32 %v3796_v46, %v1116_v0  ;;  %v1599_v24 = vadd.f32 %v5627_v35, %v5554_v23  ;;  %v1310_v13 = vld [vmem:[#allocation2 + $0x142] sm:$0xff] }
 0x1af   : > { %v1442_v34 = vmax.f32 %v1410_v20, 0.0  ;;  %v2907_v12 = vadd.f32 %v2875_v5, %v2810_v62  ;;  %v2618_v43 = vadd.f32 %v2586_v25, %v2521_v3  ;;  %v3127_v39 = vadd.f32 %v5634_v28, %v5556_v55  ;;  %v1604_v5 = vpop.f32.mrf.mxu0  ;;  %v3132_v25 = vpop.f32.mrf.mxu2  ;;  %v6076_v20 = vld [vmem:[#allocation29_spill] sm:$0xff]  ;;  %v6077_v62 = vld [vmem:[#allocation30_spill] sm:$0xff] }
 0x1b0   : > { %v889_v46 = vadd.f32 %v857_v31, %v792_v48  ;;  %v1678_v2 = vmax.f32 %v1599_v24, 0.0  ;;  %v2102_v45 = vmul.f32 %v5494_v44, %v4026_v63  ;;  %v2199_v23 = vmul.f32 %v5508_v53, %v4029_v8  ;;  %v6075_v44 = vld [vmem:[#allocation18_spill] sm:$0xff]  ;;  %v5649_v53 = vld [vmem:[#allocation3 + $0x170] sm:$0xff] }
 0x1b1   : > { %3381 = vmatmul.msk.f32.gmra.mxu0 %vm421_vm1, %v1442_v34  ;;  %v2943_v37 = vadd.f32 %v5481_v56, %v2907_v12  ;;  %v2716_v29 = vadd.f32 %v2684_v38, %v2618_v43  ;;  %v3206_v33 = vmax.f32 %v3127_v39, 0.0  ;;  %v2296_v55 = vmul.f32 %v5510_v26, %v4049_v40  ;;  %v5665_v48 = vld [vmem:[#allocation3 + $0x172] sm:$0xff]  ;;  %v2653_v39 = vld [vmem:[#allocation3 + $0x180] sm:$0xff] }
 0x1b2   : > { %v986_v60 = vadd.f32 %v954_v54, %v889_v46  ;;  %v1246_v32 = vmul.f32 %v3799_v51, %v1213_v9  ;;  %v2231_v59 = vadd.f32 %v2199_v23, %v2102_v45  ;;  %v2393_v36 = vmul.f32 %v6075_v44, %v4071_v4 }
 0x1b3   : > { %v2975_v7 = vmax.f32 %v2943_v37, 0.0  ;;  %v2813_v0 = vadd.f32 %v2781_v15, %v2716_v29  ;;  %v1343_v47 = vmul.f32 %v3803_v57, %v1310_v13  ;;  %v3238_v19 = vadd.f32 %v3206_v33, %v1678_v2  ;;  %v5661_v15 = vld [vmem:[#allocation3 + $0x171] sm:$0xff] }
 0x1b4   : > { %v1083_v38 = vadd.f32 %v1051_v49, %v986_v60  ;;  %v2328_v31 = vadd.f32 %v2296_v55, %v2231_v59  ;;  %v2490_v26 = vmul.f32 %v6076_v20, %v4097_v52  ;;  %v2587_v3 = vmul.f32 %v6077_v62, %v4129_v14  ;;  %v2750_v60 = vld [vmem:[#allocation3 + $0x181] sm:$0xff]  ;;  %v3488_v59 = vld [vmem:[%s5846_s2] ss:$0 sm:$0xff] }
 0x1b5   : > { %3447 = vmatmul.msk.f32.gmra.mxu2 %vm1953_vm3, %v2975_v7  ;;  %v2910_v51 = vadd.f32 %v2878_v1, %v2813_v0  ;;  %3270 = vst.msk [vmem:[%s5109_s27 + $0x40] sm:$0xff] %vm1953_vm3, %v3238_v19  ;;  %v2685_v41 = vmul.f32 %v4132_v61, %v5649_v53  ;;  %v1602_v57 = vadd.f32 %v5627_v35, %v5591_v17  ;;  %v2847_v0 = vld [vmem:[#allocation3 + $0x182] sm:$0xff] }
 0x1b6   : > { %v1181_v22 = vadd.f32 %v1149_v11, %v1083_v38  ;;  %v2425_v54 = vadd.f32 %v2393_v36, %v2328_v31  ;;  %v3130_v21 = vadd.f32 %v5634_v28, %v5593_v42  ;;  %v2103_v1 = vmul.f32 %v5427_v30, %v4026_v63 }
 0x1b7   : > { %v2946_v49 = vadd.f32 %v5481_v56, %v2910_v51  ;;  %v1679_v24 = vmax.f32 %v1602_v57, 0.0  ;;  %v2200_v34 = vmul.f32 %v6067_v50, %v4029_v8  ;;  %v2297_v12 = vmul.f32 %v5440_v27, %v4049_v40  ;;  %v1607_v42 = vpop.f32.mrf.mxu0  ;;  %v3135_v46 = vpop.f32.mrf.mxu2 }
 0x1b8   : > { %v1278_v17 = vadd.f32 %v1246_v32, %v1181_v22  ;;  %v2522_v11 = vadd.f32 %v2490_v26, %v2425_v54  ;;  %v2782_v43 = vmul.f32 %v4235_v58, %v5661_v15  ;;  %v3207_v9 = vmax.f32 %v3130_v21, 0.0  ;;  %v2654_v22 = vld [vmem:[#allocation3 + $0x188] sm:$0xff] }
 0x1b9   : > { %v2978_v13 = vmax.f32 %v2946_v49, 0.0  ;;  %v2879_v30 = vmul.f32 %v5413_v16, %v5665_v48  ;;  %v2232_v2 = vadd.f32 %v2200_v34, %v2103_v1  ;;  %v2394_v50 = vmul.f32 %v5583_v6, %v4071_v4 }
 0x1ba   : > { %v1375_v45 = vadd.f32 %v1343_v47, %v1278_v17  ;;  %v2619_v27 = vadd.f32 %v2587_v3, %v2522_v11  ;;  %v3239_v23 = vadd.f32 %v3207_v9, %v1679_v24  ;;  %v2491_v37 = vmul.f32 %v5595_v18, %v4097_v52 }
 0x1bb   : > { %3450 = vmatmul.msk.f32.gmra.mxu3 %vm1953_vm3, %v2978_v13  ;;  %v2329_v29 = vadd.f32 %v2297_v12, %v2232_v2  ;;  %v2588_v33 = vmul.f32 %v5597_v10, %v4129_v14  ;;  %v2686_v55 = vmul.f32 %v4132_v61, %v2653_v39  ;;  %v1605_v32 = vadd.f32 %v5627_v35, %v1604_v5  ;;  %v2751_v13 = vld [vmem:[#allocation3 + $0x189] sm:$0xff] }
 0x1bc   : > { %v1411_v36 = vadd.f32 %v3488_v59, %v1375_v45  ;;  %v2717_v7 = vadd.f32 %v2685_v41, %v2619_v27  ;;  %3271 = vst.msk [vmem:[%s5109_s27 + $0x48] sm:$0xff] %vm1953_vm3, %v3239_v23  ;;  %v3133_v47 = vadd.f32 %v5634_v28, %v3132_v25  ;;  %v2104_v19 = vmul.f32 %v6075_v44, %v4026_v63 }
 0x1bd   : > { %v2426_v38 = vadd.f32 %v2394_v50, %v2329_v29  ;;  %v1680_v31 = vmax.f32 %v1605_v32, 0.0  ;;  %v2201_v26 = vmul.f32 %v6076_v20, %v4029_v8  ;;  %v2298_v5 = vmul.f32 %v6077_v62, %v4049_v40 }
 0x1be   : > { %v1443_v3 = vmax.f32 %v1411_v36, 0.0  ;;  %v2814_v51 = vadd.f32 %v2782_v43, %v2717_v7  ;;  %v2783_v41 = vmul.f32 %v4235_v58, %v2750_v60  ;;  %v3208_v57 = vmax.f32 %v3133_v47, 0.0  ;;  %v2655_v36 = vld [vmem:[#allocation3 + $0x198] sm:$0xff] }
 0x1bf   : > { %v2523_v54 = vadd.f32 %v2491_v37, %v2426_v38  ;;  %v2880_v25 = vmul.f32 %v5413_v16, %v2847_v0  ;;  %v2233_v21 = vadd.f32 %v2201_v26, %v2104_v19  ;;  %v2395_v44 = vmul.f32 %v5649_v53, %v4071_v4  ;;  %v1610_v24 = vpop.f32.mrf.mxu0  ;;  %v3138_v34 = vpop.f32.mrf.mxu2 }
 0x1c0   : > { %3382 = vmatmul.msk.f32.gmra.mxu0 %vm421_vm1, %v1443_v3  ;;  %v2911_v20 = vadd.f32 %v2879_v30, %v2814_v51  ;;  %v3240_v1 = vadd.f32 %v3208_v57, %v1680_v31  ;;  %v2492_v62 = vmul.f32 %v5661_v15, %v4097_v52  ;;  %v2589_v49 = vmul.f32 %v5665_v48, %v4129_v14  ;;  %v2848_v30 = vld [vmem:[#allocation3 + $0x18a] sm:$0xff]  ;;  %v2752_v3 = vld [vmem:[#allocation3 + $0x199] sm:$0xff] }
 0x1c1   : > { %v2620_v12 = vadd.f32 %v2588_v33, %v2523_v54  ;;  %v2330_v17 = vadd.f32 %v2298_v5, %v2233_v21  ;;  %v2687_v11 = vmul.f32 %v4132_v61, %v2654_v22  ;;  %v1608_v43 = vadd.f32 %v5627_v35, %v1607_v42 }
 0x1c2   : > { %v2947_v9 = vadd.f32 %v5481_v56, %v2911_v20  ;;  %3272 = vst.msk [vmem:[%s5109_s27 + $0x50] sm:$0xff] %vm1953_vm3, %v3240_v1  ;;  %v3136_v2 = vadd.f32 %v5634_v28, %v3135_v46  ;;  %v2105_v50 = vmul.f32 %v5583_v6, %v4026_v63  ;;  %v2202_v45 = vmul.f32 %v5595_v18, %v4029_v8 }
 0x1c3   : > { %v2718_v27 = vadd.f32 %v2686_v55, %v2620_v12  ;;  %v2427_v23 = vadd.f32 %v2395_v44, %v2330_v17  ;;  %v1681_v37 = vmax.f32 %v1608_v43, 0.0  ;;  %v2299_v42 = vmul.f32 %v5597_v10, %v4049_v40 }
 0x1c4   : > { %v2979_v29 = vmax.f32 %v2947_v9, 0.0  ;;  %v3209_v33 = vmax.f32 %v3136_v2, 0.0  ;;  %v2234_v32 = vadd.f32 %v2202_v45, %v2105_v50  ;;  %v2396_v59 = vmul.f32 %v2653_v39, %v4071_v4 }
 0x1c5   : > { %v2815_v46 = vadd.f32 %v2783_v41, %v2718_v27  ;;  %v2524_v7 = vadd.f32 %v2492_v62, %v2427_v23  ;;  %v2784_v6 = vmul.f32 %v4235_v58, %v2751_v13  ;;  %v2881_v47 = vmul.f32 %v5413_v16, %v2848_v30 }
 0x1c6   : > { %3451 = vmatmul.msk.f32.gmra.mxu3 %vm1953_vm3, %v2979_v29  ;;  %v3241_v18 = vadd.f32 %v3209_v33, %v1681_v37  ;;  %v2331_v55 = vadd.f32 %v2299_v42, %v2234_v32  ;;  %v2493_v19 = vmul.f32 %v2750_v60, %v4097_v52  ;;  %v2590_v10 = vmul.f32 %v2847_v0, %v4129_v14  ;;  %v2753_v37 = vld [vmem:[#allocation3 + $0x1a1] sm:$0xff] }
 0x1c7   : > { %v2912_v38 = vadd.f32 %v2880_v25, %v2815_v46  ;;  %v2621_v31 = vadd.f32 %v2589_v49, %v2524_v7  ;;  %v2688_v26 = vmul.f32 %v4132_v61, %v2655_v36  ;;  %v1611_v39 = vadd.f32 %v5627_v35, %v1610_v24  ;;  %v1613_v57 = vpop.f32.mrf.mxu0  ;;  %v3141_v0 = vpop.f32.mrf.mxu2 }
 0x1c8   : > { %3273 = vst.msk [vmem:[%s5109_s27 + $0x58] sm:$0xff] %vm1953_vm3, %v3241_v18  ;;  %v2428_v5 = vadd.f32 %v2396_v59, %v2331_v55  ;;  %v3139_v51 = vadd.f32 %v5634_v28, %v3138_v34  ;;  %v2106_v41 = vmul.f32 %v5649_v53, %v4026_v63  ;;  %v2203_v60 = vmul.f32 %v5661_v15, %v4029_v8  ;;  %v2849_v15 = vld [vmem:[#allocation3 + $0x19a] sm:$0xff] }
 0x1c9   : > { %v2948_v54 = vadd.f32 %v5481_v56, %v2912_v38  ;;  %v2719_v25 = vadd.f32 %v2687_v11, %v2621_v31  ;;  %v1682_v21 = vmax.f32 %v1611_v39, 0.0  ;;  %v2300_v44 = vmul.f32 %v5665_v48, %v4049_v40  ;;  %v2656_v11 = vld [vmem:[#allocation3 + $0x1a0] sm:$0xff] }
 0x1ca   : > { %v2525_v20 = vadd.f32 %v2493_v19, %v2428_v5  ;;  %v3210_v1 = vmax.f32 %v3139_v51, 0.0  ;;  %v2235_v62 = vadd.f32 %v2203_v60, %v2106_v41  ;;  %v2397_v49 = vmul.f32 %v2654_v22, %v4071_v4 }
 0x1cb   : > { %v2980_v24 = vmax.f32 %v2948_v54, 0.0  ;;  %v2816_v63 = vadd.f32 %v2784_v6, %v2719_v25  ;;  %v2785_v53 = vmul.f32 %v4235_v58, %v2752_v3  ;;  %v2494_v17 = vmul.f32 %v2751_v13, %v4097_v52 }
 0x1cc   : > { %v2622_v8 = vadd.f32 %v2590_v10, %v2525_v20  ;;  %v3242_v34 = vadd.f32 %v3210_v1, %v1682_v21  ;;  %v2332_v12 = vadd.f32 %v2300_v44, %v2235_v62  ;;  %v2591_v40 = vmul.f32 %v2848_v30, %v4129_v14 }
 0x1cd   : > { %v2913_v43 = vadd.f32 %v2881_v47, %v2816_v63  ;;  %v1614_v48 = vadd.f32 %v5627_v35, %v1613_v57  ;;  %v3142_v22 = vadd.f32 %v5634_v28, %v3141_v0  ;;  %v2882_v2 = vmul.f32 %v5413_v16, %v2849_v15  ;;  %v2850_v47 = vld [vmem:[#allocation3 + $0x1a2] sm:$0xff] }
 0x1ce   : > { %3452 = vmatmul.msk.f32.gmra.mxu3 %vm1953_vm3, %v2980_v24  ;;  %v2720_v9 = vadd.f32 %v2688_v26, %v2622_v8  ;;  %3274 = vst.msk [vmem:[%s5109_s27 + $0x60] sm:$0xff] %vm1953_vm3, %v3242_v34  ;;  %v2429_v4 = vadd.f32 %v2397_v49, %v2332_v12  ;;  %v2689_v50 = vmul.f32 %v4132_v61, %v2656_v11 }
 0x1cf   : > { %v1683_v45 = vmax.f32 %v1614_v48, 0.0  ;;  %v2949_v52 = vadd.f32 %v5481_v56, %v2913_v43  ;;  %v3211_v30 = vmax.f32 %v3142_v22, 0.0  ;;  %v1616_v27 = vpop.f32.mrf.mxu0  ;;  %v3144_v23 = vpop.f32.mrf.mxu2  ;;  %v2786_v6 = vmul.f32 %v4235_v58, %v2753_v37 }
 0x1d0   : > { %v2817_v13 = vadd.f32 %v2785_v53, %v2720_v9  ;;  %v2526_v14 = vadd.f32 %v2494_v17, %v2429_v4  ;;  %v1617_v42 = vadd.f32 %v5627_v35, %v1616_v27  ;;  %v3145_v29 = vadd.f32 %v5634_v28, %v3144_v23 }
 0x1d1   : > { %v3243_v32 = vadd.f32 %v3211_v30, %v1683_v45  ;;  %v2981_v61 = vmax.f32 %v2949_v52, 0.0  ;;  %v2883_v10 = vmul.f32 %v5413_v16, %v2850_v47 }
 0x1d2   : > { %v2623_v33 = vadd.f32 %v2591_v40, %v2526_v14  ;;  %v1684_v59 = vmax.f32 %v1617_v42, 0.0  ;;  %v3212_v36 = vmax.f32 %v3145_v29, 0.0  ;;  %v2914_v46 = vadd.f32 %v2882_v2, %v2817_v13  ;;  %v6078_v29 = vld [vmem:[#allocation6_spill] sm:$0xff] }
 0x1d3   : > { %3275 = vst.msk [vmem:[%s5109_s27 + $0x68] sm:$0xff] %vm1953_vm3, %v3243_v32 }
 0x1d4   : > { %v2721_v7 = vadd.f32 %v2689_v50, %v2623_v33  ;;  %v3244_v18 = vadd.f32 %v3212_v36, %v1684_v59  ;;  %v2950_v55 = vadd.f32 %v5481_v56, %v2914_v46  ;;  %v1647_v33 = vadd.f32 %v5627_v35, %v6078_v29 }
 0x1d6   : > { %3453 = vmatmul.msk.f32.gmra.mxu3 %vm1953_vm3, %v2981_v61  ;;  %3276 = vst.msk [vmem:[%s5109_s27 + $0x70] sm:$0xff] %vm1953_vm3, %v3244_v18  ;;  %v2818_v19 = vadd.f32 %v2786_v6, %v2721_v7  ;;  %v2982_v3 = vmax.f32 %v2950_v55, 0.0  ;;  %v1694_v7 = vmax.f32 %v1647_v33, 0.0 }
 0x1d7   : > { %v1619_v38 = vpop.f32.mrf.mxu0  ;;  %v3147_v31 = vpop.f32.mrf.mxu2 }
 0x1d8   : > { %v1620_v26 = vadd.f32 %v5627_v35, %v1619_v38  ;;  %v3148_v58 = vadd.f32 %v5634_v28, %v3147_v31  ;;  %v2915_v51 = vadd.f32 %v2883_v10, %v2818_v19  ;;  %v6079_v38 = vld [vmem:[#allocation10_spill] sm:$0xff] }
 0x1d9   : > { %v1650_v31 = vadd.f32 %v5627_v35, %v6079_v38 }
 0x1da   : > { %v1685_v39 = vmax.f32 %v1620_v26, 0.0  ;;  %v3213_v5 = vmax.f32 %v3148_v58, 0.0  ;;  %v2951_v60 = vadd.f32 %v5481_v56, %v2915_v51 }
 0x1db   : > { %v1695_v51 = vmax.f32 %v1650_v31, 0.0 }
 0x1dc   : > { %v3245_v41 = vadd.f32 %v3213_v5, %v1685_v39  ;;  %v2983_v25 = vmax.f32 %v2951_v60, 0.0 }
 0x1de   : > { %3454 = vmatmul.msk.f32.gmra.mxu3 %vm1953_vm3, %v2982_v3  ;;  %3277 = vst.msk [vmem:[%s5109_s27 + $0x78] sm:$0xff] %vm1953_vm3, %v3245_v41 }
 0x1e0   : > { %v3150_v57 = vpop.f32.mrf.mxu2 }
 0x1e1   : > { %v1622_v16 = vpop.f32.mrf.mxu0  ;;  %v3151_v0 = vadd.f32 %v5634_v28, %v3150_v57 }
 0x1e2   : > { %v1623_v54 = vadd.f32 %v5627_v35, %v1622_v16 }
 0x1e3   : > { %v3214_v21 = vmax.f32 %v3151_v0, 0.0 }
 0x1e4   : > { %v1686_v44 = vmax.f32 %v1623_v54, 0.0 }
 0x1e6   : > { %3455 = vmatmul.msk.f32.gmra.mxu3 %vm1953_vm3, %v2983_v25  ;;  %v3246_v20 = vadd.f32 %v3214_v21, %v1686_v44  ;;  %v6080_v25 = vld [vmem:[#allocation8_spill] sm:$0xff] }
 0x1e7   : > { %v1653_v21 = vadd.f32 %v5627_v35, %v6080_v25 }
 0x1e8   : > { %3278 = vst.msk [vmem:[%s5109_s27 + $0x80] sm:$0xff] %vm1953_vm3, %v3246_v20 }
 0x1ec   : > { %v3153_v1 = vpop.f32.mrf.mxu2 }
 0x1ed   : > { %v3154_v62 = vadd.f32 %v5634_v28, %v3153_v1  ;;  %v1625_v56 = vpop.f32.mrf.mxu0 }
 0x1ee   : > { %v1626_v49 = vadd.f32 %v5627_v35, %v1625_v56 }
 0x1ef   : > { %v3215_v24 = vmax.f32 %v3154_v62, 0.0 }
 0x1f0   : > { %v1687_v63 = vmax.f32 %v1626_v49, 0.0 }
 0x1f2   : > { %v3247_v53 = vadd.f32 %v3215_v24, %v1687_v63  ;;  %v1696_v24 = vmax.f32 %v1653_v21, 0.0 }
 0x1f4   : > { %3279 = vst.msk [vmem:[%s5109_s27 + $0x88] sm:$0xff] %vm1953_vm3, %v3247_v53 }
 0x1f8   : > { %v1628_v8 = vpop.f32.mrf.mxu0 }
 0x1f9   : > { %v1629_v15 = vadd.f32 %v5627_v35, %v1628_v8  ;;  %v3156_v34 = vpop.f32.mrf.mxu2 }
 0x1fa   : > { %v3157_v12 = vadd.f32 %v5634_v28, %v3156_v34 }
 0x1fb   : > { %v1688_v17 = vmax.f32 %v1629_v15, 0.0  ;;  %v6081_v15 = vld [vmem:[#allocation9_spill] sm:$0xff] }
 0x1fc   : > { %v3216_v11 = vmax.f32 %v3157_v12, 0.0  ;;  %v1656_v34 = vadd.f32 %v5627_v35, %v6081_v15 }
 0x1fe   : > { %v3248_v43 = vadd.f32 %v3216_v11, %v1688_v17  ;;  %v1697_v11 = vmax.f32 %v1656_v34, 0.0 }
 0x200   : > { %3280 = vst.msk [vmem:[%s5109_s27 + $0x90] sm:$0xff] %vm1953_vm3, %v3248_v43 }
 0x203   : > { %v3159_v40 = vpop.f32.mrf.mxu2  ;;  %v1631_v48 = vpop.f32.mrf.mxu0 }
 0x204   : > { %v3160_v9 = vadd.f32 %v5634_v28, %v3159_v40  ;;  %v1632_v4 = vadd.f32 %v5627_v35, %v1631_v48  ;;  %v6082_v48 = vld [vmem:[#allocation12_spill] sm:$0xff] }
 0x206   : > { %v3217_v22 = vmax.f32 %v3160_v9, 0.0  ;;  %v1689_v2 = vmax.f32 %v1632_v4, 0.0  ;;  %v1659_v9 = vadd.f32 %v5627_v35, %v6082_v48 }
 0x208   : > { %v3249_v50 = vadd.f32 %v3217_v22, %v1689_v2  ;;  %v1698_v2 = vmax.f32 %v1659_v9, 0.0 }
 0x20a   : > { %3281 = vst.msk [vmem:[%s5109_s27 + $0x98] sm:$0xff] %vm1953_vm3, %v3249_v50 }
 0x20e   : > { %v1634_v45 = vpop.f32.mrf.mxu0 }
 0x20f   : > { %v1635_v52 = vadd.f32 %v5627_v35, %v1634_v45  ;;  %v3162_v13 = vpop.f32.mrf.mxu2 }
 0x210   : > { %v3163_v14 = vadd.f32 %v5634_v28, %v3162_v13 }
 0x211   : > { %v1690_v30 = vmax.f32 %v1635_v52, 0.0  ;;  %v6083_v52 = vld [vmem:[#allocation4_spill] sm:$0xff] }
 0x212   : > { %v3218_v27 = vmax.f32 %v3163_v14, 0.0  ;;  %v1662_v13 = vadd.f32 %v5627_v35, %v6083_v52 }
 0x214   : > { %v3250_v23 = vadd.f32 %v3218_v27, %v1690_v30  ;;  %v1699_v27 = vmax.f32 %v1662_v13, 0.0 }
 0x216   : > { %3282 = vst.msk [vmem:[%s5109_s27 + $0xa0] sm:$0xff] %vm1953_vm3, %v3250_v23 }
 0x21a   : > { %v3165_v37 = vpop.f32.mrf.mxu2 }
 0x21b   : > { %v3166_v42 = vadd.f32 %v5634_v28, %v3165_v37 }
 0x21d   : > { %v3219_v61 = vmax.f32 %v3166_v42, 0.0  ;;  %v6084_v42 = vld [vmem:[#allocation11_spill] sm:$0xff] }
 0x21e   : > { %v1665_v29 = vadd.f32 %v5627_v35, %v6084_v42 }
 0x21f   : > { %v1637_v32 = vpop.f32.mrf.mxu0  ;;  %v3174_v59 = vpop.f32.mrf.mxu3 }
 0x220   : > { %v1638_v36 = vadd.f32 %v5627_v35, %v1637_v32  ;;  %v3175_v46 = vadd.f32 %v5634_v28, %v3174_v59  ;;  %v1700_v59 = vmax.f32 %v1665_v29, 0.0 }
 0x222   : > { %v1691_v6 = vmax.f32 %v1638_v36, 0.0  ;;  %v3222_v47 = vmax.f32 %v3175_v46, 0.0  ;;  %v6085_v46 = vld [vmem:[#allocation16_spill] sm:$0xff] }
 0x224   : > { %v3251_v18 = vadd.f32 %v3219_v61, %v1691_v6  ;;  %v3254_v55 = vadd.f32 %v3222_v47, %v1694_v7  ;;  %v1668_v7 = vadd.f32 %v5627_v35, %v6085_v46 }
 0x226   : > { %3283 = vst.msk [vmem:[%s5109_s27 + $0xa8] sm:$0xff] %vm1953_vm3, %v3251_v18  ;;  %v1701_v18 = vmax.f32 %v1668_v7, 0.0 }
 0x227   : > { %3286 = vst.msk [vmem:[%s5109_s27 + $0xc0] sm:$0xff] %vm1953_vm3, %v3254_v55 }
 0x229   : > { %v3168_v19 = vpop.f32.mrf.mxu2 }
 0x22a   : > { %v3169_v10 = vadd.f32 %v5634_v28, %v3168_v19 }
 0x22c   : > { %v3220_v5 = vmax.f32 %v3169_v10, 0.0 }
 0x22e   : > { %v1640_v26 = vpop.f32.mrf.mxu0  ;;  %v3177_v58 = vpop.f32.mrf.mxu3 }
 0x22f   : > { %v1641_v39 = vadd.f32 %v5627_v35, %v1640_v26  ;;  %v3178_v3 = vadd.f32 %v5634_v28, %v3177_v58 }
 0x231   : > { %v1692_v41 = vmax.f32 %v1641_v39, 0.0  ;;  %v3223_v60 = vmax.f32 %v3178_v3, 0.0 }
 0x233   : > { %v3252_v57 = vadd.f32 %v3220_v5, %v1692_v41  ;;  %v3255_v16 = vadd.f32 %v3223_v60, %v1695_v51 }
 0x235   : > { %3284 = vst.msk [vmem:[%s5109_s27 + $0xb0] sm:$0xff] %vm1953_vm3, %v3252_v57 }
 0x236   : > { %3287 = vst.msk [vmem:[%s5109_s27 + $0xc8] sm:$0xff] %vm1953_vm3, %v3255_v16 }
 0x238   : > { %v3171_v0 = vpop.f32.mrf.mxu2 }
 0x239   : > { %v3172_v54 = vadd.f32 %v5634_v28, %v3171_v0 }
 0x23b   : > { %v3221_v1 = vmax.f32 %v3172_v54, 0.0 }
 0x23d   : > { %v1643_v44 = vpop.f32.mrf.mxu0 }
 0x23e   : > { %v1644_v20 = vadd.f32 %v5627_v35, %v1643_v44  ;;  %v3180_v62 = vpop.f32.mrf.mxu3 }
 0x23f   : > { %v3181_v56 = vadd.f32 %v5634_v28, %v3180_v62 }
 0x240   : > { %v1693_v49 = vmax.f32 %v1644_v20, 0.0 }
 0x241   : > { %v3224_v63 = vmax.f32 %v3181_v56, 0.0 }
 0x242   : > { %v3253_v53 = vadd.f32 %v3221_v1, %v1693_v49 }
 0x243   : > { %v3256_v8 = vadd.f32 %v3224_v63, %v1696_v24 }
 0x244   : > { %3285 = vst.msk [vmem:[%s5109_s27 + $0xb8] sm:$0xff] %vm1953_vm3, %v3253_v53 }
 0x245   : > { %3288 = vst.msk [vmem:[%s5109_s27 + $0xd0] sm:$0xff] %vm1953_vm3, %v3256_v8 }
 0x249   : > { %v3183_v12 = vpop.f32.mrf.mxu3 }
 0x24a   : > { %v3184_v17 = vadd.f32 %v5634_v28, %v3183_v12 }
 0x24c   : > { %v3225_v43 = vmax.f32 %v3184_v17, 0.0 }
 0x24e   : > { %v3257_v40 = vadd.f32 %v3225_v43, %v1697_v11 }
 0x250   : > { %3289 = vst.msk [vmem:[%s5109_s27 + $0xd8] sm:$0xff] %vm1953_vm3, %v3257_v40 }
 0x251   : > { %v3186_v4 = vpop.f32.mrf.mxu3 }
 0x252   : > { %v3187_v22 = vadd.f32 %v5634_v28, %v3186_v4 }
 0x254   : > { %v3226_v50 = vmax.f32 %v3187_v22, 0.0 }
 0x256   : > { %v3258_v45 = vadd.f32 %v3226_v50, %v1698_v2 }
 0x258   : > { %3290 = vst.msk [vmem:[%s5109_s27 + $0xe0] sm:$0xff] %vm1953_vm3, %v3258_v45 }
 0x259   : > { %v3189_v14 = vpop.f32.mrf.mxu3 }
 0x25a   : > { %v3190_v30 = vadd.f32 %v5634_v28, %v3189_v14 }
 0x25c   : > { %v3227_v23 = vmax.f32 %v3190_v30, 0.0 }
 0x25e   : > { %v3259_v37 = vadd.f32 %v3227_v23, %v1699_v27 }
 0x260   : > { %3291 = vst.msk [vmem:[%s5109_s27 + $0xe8] sm:$0xff] %vm1953_vm3, %v3259_v37 }
 0x261   : > { %v3192_v33 = vpop.f32.mrf.mxu3 }
 0x262   : > { %v3193_v32 = vadd.f32 %v5634_v28, %v3192_v33 }
 0x264   : > { %v3228_v36 = vmax.f32 %v3193_v32, 0.0 }
 0x266   : > { %v3260_v61 = vadd.f32 %v3228_v36, %v1700_v59 }
 0x268   : > { %3292 = vst.msk [vmem:[%s5109_s27 + $0xf0] sm:$0xff] %vm1953_vm3, %v3260_v61 }
 0x269   : > { %v3195_v6 = vpop.f32.mrf.mxu3 }
 0x26a   : > { %v3196_v47 = vadd.f32 %v5634_v28, %v3195_v6 }
 0x26c   : > { %v3229_v55 = vmax.f32 %v3196_v47, 0.0 }
 0x26e   : > { %v3261_v19 = vadd.f32 %v3229_v55, %v1701_v18 }
 0x270   : > { %3293 = vst.msk [vmem:[%s5109_s27 + $0xf8] sm:$0xff] %vm1953_vm3, %v3261_v19 }
 0x271 PF: > { %s21_s17 = sadd.s32 1, %s3495_s17  }
 0x272   : > { %p18_p4 = scmp.ge.s32.totalorder %s21_s17, 4  }
 0x274   :  { %20 = sbr.rel (!%p18_p4) target bundleno = 1 (0x1), region = 98 }

</bundles_post_ra>
